<compile_context>
chip_gen: v7x
topology: tpu7x:2x2x1
jax: 0.10.0
libtpu: 0.0.40
codegen_flags: <defaults>
</compile_context>

<pallas_src>
import math

import jax
import jax.numpy as jnp
from jax.experimental import pallas as pl
from jax.experimental.pallas import tpu as pltpu


def make_gcn_kernel(support_len: int, order: int, c_out: int, compute_dtype):
    """Kernel body for one (batch b, patch-chunk g) grid step."""

    def gcn_kernel(x_ref, *refs):
        a_refs = refs[:support_len]          # each (1, N, N, tm): A[b, m, n, v] with m in lanes
        w_ref = refs[support_len]            # SMEM (c_out, c_total), un-transposed
        b_ref = refs[support_len + 1]        # SMEM (c_out,)
        o_ref = refs[support_len + 2]        # VMEM (1, c_out, N, tm)

        _, c, n, tm = x_ref.shape

        x_f32 = x_ref[0].astype(jnp.float32)                 # (C, N, tm)

        # Per-output-channel accumulators (f32, lane-dense (N, tm) tiles).
        y = [None] * c_out

        def conv_accumulate(piece, base):
            # y[o] += sum_ci W[o, base+ci] * piece[ci]
            # Scalar(SMEM) x tile FMAs on the VPU: keeps everything in the (N, tm) lane-dense
            # layout with zero reshapes/transposes (the conv's K dim is tiny, MXU not worth it).
            for o in range(c_out):
                acc_o = y[o]
                for ci in range(c):
                    term = w_ref[o, base + ci] * piece[ci]    # scalar * (N, tm)
                    acc_o = term if acc_o is None else acc_o + term
                y[o] = acc_o

        # Identity piece goes into the conv at full f32 precision even in bf16 mode.
        conv_accumulate(x_f32, 0)
        base = c

        x_cd = x_f32.astype(compute_dtype)
        for s in range(support_len):
            a = a_refs[s][0].astype(compute_dtype)            # (N_n, N_v, tm)
            xk = x_cd                                         # (C, N, tm)
            for _ in range(order):
                # next[ci, v, :] = sum_n A[n, v, :] * xk[ci, n, :]
                # N broadcast multiply-adds over (C, N, tm) tiles; accumulate in f32.
                acc = None
                for nn in range(n):
                    prod = (xk[:, nn:nn + 1, :] * a[nn:nn + 1, :, :]).astype(jnp.float32)
                    acc = prod if acc is None else acc + prod
                conv_accumulate(acc, base)                    # f32 piece into the conv
                base += c
                xk = acc.astype(compute_dtype)                # carried piece in compute_dtype

        for o in range(c_out):
            o_ref[0, o] = jnp.maximum(y[o] + b_ref[o], 0.0).astype(o_ref.dtype)

    return gcn_kernel


def _round_up(v, m):
    return ((v + m - 1) // m) * m


def _padded_bytes(shape, itemsize):
    """VMEM footprint of a buffer including (sublane, lane) tile padding."""
    sublane = 8 if itemsize >= 4 else 8 * (4 // itemsize)     # 8 for f32, 16 for bf16
    lanes = _round_up(shape[-1], 128)
    subl = _round_up(shape[-2], sublane)
    lead = 1
    for d in shape[:-2]:
        lead *= d
    return lead * subl * lanes * itemsize


def _vmem_bytes_estimate(tm, n, c, c_out, support_len, cd_bytes, support_buffers):
    f32 = 4
    # pipeline buffers (x / supports / output, double- or deeper-buffered)
    pipe = 2 * _padded_bytes((c, n, tm), f32)
    pipe += support_buffers * support_len * _padded_bytes((n, n, tm), f32)
    pipe += 2 * _padded_bytes((c_out, n, tm), f32)
    # live in-kernel intermediates
    live = 2 * _padded_bytes((c, n, tm), cd_bytes)            # x_cd, xk
    live += _padded_bytes((n, n, tm), cd_bytes)               # cast support tile
    live += 2 * _padded_bytes((c, n, tm), f32)                # acc + broadcast product
    live += _padded_bytes((c_out, n, tm), f32)                # conv accumulators
    return pipe + live


def _pick_tm(m_pad, n, c, c_out, support_len, cd_bytes, budget_bytes, batch,
             support_buffers=2, min_steps=8, cap=512):
    """Largest multiple-of-128 divisor of m_pad (<= cap) that fits the padded VMEM budget
    while keeping at least `min_steps` grid steps (so both v7x TensorCores get work and the
    pipeline has depth); for small problems, the smallest fitting candidate (most steps)."""
    cands = []
    tm = 128
    while tm <= min(m_pad, cap):
        if m_pad % tm == 0 and _vmem_bytes_estimate(
                tm, n, c, c_out, support_len, cd_bytes, support_buffers) <= budget_bytes:
            cands.append(tm)
        tm += 128
    if not cands:
        return 128
    good = [t for t in cands if batch * (m_pad // t) >= min_steps]
    return max(good) if good else min(cands)


def _vmem_budget_bytes():
    """~50% of this generation's per-core VMEM (=> ~32 MiB on v7x, ~64 MiB on v5e/v6e)."""
    try:
        cap = pltpu.get_tpu_info().vmem_capacity_bytes
    except Exception:
        cap = 64 * 1024 * 1024          # conservative fallback (v7x per-TC VMEM)
    return max(16 * 1024 * 1024, cap // 2)


def _default_compute_dtype():
    """bf16 propagation/pieces on v6e/v7x (bf16 VALUs, half the VMEM traffic);
    f32 on v5e and older (no bf16 VPU -> bf16 would only add converts)."""
    try:
        kind = jax.devices()[0].device_kind.lower()
    except Exception:
        return jnp.float32
    if "v6" in kind or "v7" in kind:
        return jnp.bfloat16
    return jnp.float32


def gcn_forward(x, support, weight, bias, order=2, *,
                compute_dtype=None, vmem_limit_bytes=None, support_buffering=None):
    """x: (B, C, N, M) NCHW; support: list of (B, M, N, N); weight: (C_out, (order*S+1)*C);
    bias: (C_out,).  Returns relu(conv1x1(concat([x] + nconv pieces))) as (B, C_out, N, M)."""
    B, C, N, M = x.shape
    S = len(support)
    c_out, c_total = weight.shape
    assert c_total == (order * S + 1) * C

    if compute_dtype is None:
        compute_dtype = _default_compute_dtype()
    cd_bytes = jnp.dtype(compute_dtype).itemsize

    budget = _vmem_budget_bytes()
    if vmem_limit_bytes is None:
        vmem_limit_bytes = budget
    support_buffers = 2 if support_buffering is None else support_buffering

    # The lane axis (tm) must be a multiple of 128: zero-pad M if needed.  Padded columns of
    # x / A are zero, so the corresponding outputs are just relu(bias) and get sliced off.
    m_pad = max(_round_up(M, 128), 128)
    tm = _pick_tm(m_pad, N, C, c_out, S, cd_bytes, budget - (2 << 20), B,
                  support_buffers=support_buffers)
    G = m_pad // tm

    if m_pad != M:
        pad = m_pad - M
        x = jnp.pad(x, ((0, 0), (0, 0), (0, 0), (0, pad)))
        support = [jnp.pad(a, ((0, 0), (0, pad), (0, 0), (0, 0))) for a in support]

    # One-time wrapper transpose of each support to (B, N_n, N_v, M) so the kernel sees the
    # patch axis in lanes; x is consumed in its native NCHW layout (no wrapper copy of x).
    support_t = [jnp.transpose(a, (0, 2, 3, 1)) for a in support]

    w = weight.astype(jnp.float32)      # resident in SMEM; scalars feed VPU FMAs
    b = bias.astype(jnp.float32)

    kernel = make_gcn_kernel(S, order, c_out, compute_dtype)

    def data_map(bi, gi):
        return (bi, 0, 0, gi)

    x_spec = pl.BlockSpec((1, C, N, tm), data_map)
    if support_buffering is None:
        a_specs = [pl.BlockSpec((1, N, N, tm), data_map) for _ in range(S)]
    else:
        # TODO(synk): sweep pl.Buffered(3) on the dominant support stream once DMA-exposed.
        a_specs = [pl.BlockSpec((1, N, N, tm), data_map,
                                pipeline_mode=pl.Buffered(support_buffering))
                   for _ in range(S)]
    in_specs = ([x_spec] + a_specs +
                [pl.BlockSpec(memory_space=pltpu.MemorySpace.SMEM),   # weight (C_out, C_total)
                 pl.BlockSpec(memory_space=pltpu.MemorySpace.SMEM)])  # bias   (C_out,)

    out = pl.pallas_call(
        kernel,
        out_shape=jax.ShapeDtypeStruct((B, c_out, N, m_pad), x.dtype),
        grid_spec=pltpu.PrefetchScalarGridSpec(
            num_scalar_prefetch=0,
            grid=(B, G),
            in_specs=in_specs,
            # Direct NCHW output, lane-dense (trailing tm multiple of 128 -> unmasked stores).
            out_specs=pl.BlockSpec((1, c_out, N, tm), data_map),
        ),
        compiler_params=pltpu.CompilerParams(
            dimension_semantics=("parallel", "parallel"),
            vmem_limit_bytes=vmem_limit_bytes),
    )(x, *support_t, w, b)

    if m_pad != M:
        out = out[..., :M]
    return out


def gcn_ref(x, support, weight, bias, order=2):
    """Pure-JAX reference mirroring the PyTorch forward (nconv + concat + 1x1 conv + ReLU)."""
    hp = jax.lax.Precision.HIGHEST
    out = [x]
    for a in support:
        x1 = jnp.einsum('bfnm,bmnv->bfvm', x, a, precision=hp)
        out.append(x1)
        for _ in range(2, order + 1):
            x2 = jnp.einsum('bfnm,bmnv->bfvm', x1, a, precision=hp)
            out.append(x2)
            x1 = x2
    h = jnp.concatenate(out, axis=1)
    y = jnp.einsum('bcnm,oc->bonm', h, weight, precision=hp) + bias[None, :, None, None]
    return jnp.maximum(y, 0.0)


if __name__ == "__main__":
    B, C_IN, N, M = 2, 4, 8, 512
    C_OUT = 8
    SUPPORT_LEN = 3
    ORDER = 2
    C_IN_TOTAL = (ORDER * SUPPORT_LEN + 1) * C_IN

    key = jax.random.PRNGKey(0)
    kx, ka, kw, kb = jax.random.split(key, 4)

    x = jax.random.normal(kx, (B, C_IN, N, M), dtype=jnp.float32)
    a_keys = jax.random.split(ka, SUPPORT_LEN)
    support = [jax.random.normal(a_keys[s], (B, M, N, N), dtype=jnp.float32) * 0.3
               for s in range(SUPPORT_LEN)]

    # Deterministic Conv2d(1x1)-style parameter init (kaiming-uniform-ish bounds).
    bound = 1.0 / math.sqrt(C_IN_TOTAL)
    weight = jax.random.uniform(kw, (C_OUT, C_IN_TOTAL), jnp.float32, -bound, bound)
    bias = jax.random.uniform(kb, (C_OUT,), jnp.float32, -bound, bound)

    ref = gcn_ref(x, support, weight, bias, order=ORDER)

    # f32 end-to-end path (tight tolerance).
    out = jax.block_until_ready(
        gcn_forward(x, support, weight, bias, order=ORDER, compute_dtype=jnp.float32))
    assert out.shape == (B, C_OUT, N, M)
    assert jnp.allclose(out, ref, rtol=1e-3, atol=1e-3), "f32 kernel mismatch vs reference"

    # bf16 propagation / pieces (v6e / v7x fast path) with f32 accumulation -- looser tolerance.
    out_bf16 = jax.block_until_ready(
        gcn_forward(x, support, weight, bias, order=ORDER, compute_dtype=jnp.bfloat16))
    assert out_bf16.shape == (B, C_OUT, N, M)
    assert jnp.allclose(out_bf16, ref, rtol=5e-2, atol=5e-2), "bf16 kernel mismatch vs reference"

    # Non-multiple-of-128 patch count exercises the M-padding path with the auto compute_dtype.
    M2 = 200
    x2 = jax.random.normal(kx, (B, C_IN, N, M2), dtype=jnp.float32)
    support2 = [jax.random.normal(a_keys[s], (B, M2, N, N), dtype=jnp.float32) * 0.3
                for s in range(SUPPORT_LEN)]
    ref2 = gcn_ref(x2, support2, weight, bias, order=ORDER)
    out2 = jax.block_until_ready(gcn_forward(x2, support2, weight, bias, order=ORDER))
    assert out2.shape == (B, C_OUT, N, M2)
    assert jnp.allclose(out2, ref2, rtol=5e-2, atol=5e-2), "padded-M kernel mismatch vs reference"

    print("KERNEL_OK")
</pallas_src>

<mosaic_0001>
module attributes {stable_mosaic.version = 11 : i64} {
  func.func @gcn_kernel(%arg0: i32, %arg1: i32, %arg2: memref<1x4x8x128xf32, #tpu.memory_space<vmem>>, %arg3: memref<1x8x8x128xf32, #tpu.memory_space<vmem>>, %arg4: memref<1x8x8x128xf32, #tpu.memory_space<vmem>>, %arg5: memref<1x8x8x128xf32, #tpu.memory_space<vmem>>, %arg6: memref<8x28xf32, #tpu.memory_space<smem>>, %arg7: memref<8xf32, #tpu.memory_space<smem>>, %arg8: memref<1x8x8x128xf32, #tpu.memory_space<vmem>>) attributes {dimension_semantics = [#tpu.dimension_semantics<parallel>, #tpu.dimension_semantics<parallel>], iteration_bounds = array<i64: 2, 4>, scalar_prefetch = 0 : i64, scratch_operands = 0 : i64, tpu.core_type = #tpu.core_type<tc>, window_params = [{transform_indices = @transform_0, window_bounds = array<i64: 1, 4, 8, 128>}, {transform_indices = @transform_1, window_bounds = array<i64: 1, 8, 8, 128>}, {transform_indices = @transform_2, window_bounds = array<i64: 1, 8, 8, 128>}, {transform_indices = @transform_3, window_bounds = array<i64: 1, 8, 8, 128>}, {transform_indices = @transform_4, window_bounds = array<i64: 8, 28>}, {transform_indices = @transform_5, window_bounds = array<i64: 8>}, {transform_indices = @transform_6, window_bounds = array<i64: 1, 8, 8, 128>}]} {
    %c0 = arith.constant 0 : index
    %c0_0 = arith.constant 0 : index
    %c0_1 = arith.constant 0 : index
    %c0_2 = arith.constant 0 : index
    %0 = vector.load %arg2[%c0, %c0_0, %c0_1, %c0_2] : memref<1x4x8x128xf32, #tpu.memory_space<vmem>>, vector<1x4x8x128xf32>
    %1 = vector.shape_cast %0 : vector<1x4x8x128xf32> to vector<4x8x128xf32>
    %c0_3 = arith.constant 0 : index
    %c0_4 = arith.constant 0 : index
    %2 = memref.load %arg6[%c0_3, %c0_4] : memref<8x28xf32, #tpu.memory_space<smem>>
    %3 = vector.extract_strided_slice %1 {offsets = [0, 0, 0], sizes = [1, 8, 128], strides = [1, 1, 1]} : vector<4x8x128xf32> to vector<1x8x128xf32>
    %4 = vector.shape_cast %3 : vector<1x8x128xf32> to vector<8x128xf32>
    %5 = vector.broadcast %2 : f32 to vector<8x128xf32>
    %6 = arith.mulf %5, %4 : vector<8x128xf32>
    %c0_5 = arith.constant 0 : index
    %c1 = arith.constant 1 : index
    %7 = memref.load %arg6[%c0_5, %c1] : memref<8x28xf32, #tpu.memory_space<smem>>
    %8 = vector.extract_strided_slice %1 {offsets = [1, 0, 0], sizes = [1, 8, 128], strides = [1, 1, 1]} : vector<4x8x128xf32> to vector<1x8x128xf32>
    %9 = vector.shape_cast %8 : vector<1x8x128xf32> to vector<8x128xf32>
    %10 = vector.broadcast %7 : f32 to vector<8x128xf32>
    %11 = arith.mulf %10, %9 : vector<8x128xf32>
    %12 = arith.addf %6, %11 : vector<8x128xf32>
    %c0_6 = arith.constant 0 : index
    %c2 = arith.constant 2 : index
    %13 = memref.load %arg6[%c0_6, %c2] : memref<8x28xf32, #tpu.memory_space<smem>>
    %14 = vector.extract_strided_slice %1 {offsets = [2, 0, 0], sizes = [1, 8, 128], strides = [1, 1, 1]} : vector<4x8x128xf32> to vector<1x8x128xf32>
    %15 = vector.shape_cast %14 : vector<1x8x128xf32> to vector<8x128xf32>
    %16 = vector.broadcast %13 : f32 to vector<8x128xf32>
    %17 = arith.mulf %16, %15 : vector<8x128xf32>
    %18 = arith.addf %12, %17 : vector<8x128xf32>
    %c0_7 = arith.constant 0 : index
    %c3 = arith.constant 3 : index
    %19 = memref.load %arg6[%c0_7, %c3] : memref<8x28xf32, #tpu.memory_space<smem>>
    %20 = vector.extract_strided_slice %1 {offsets = [3, 0, 0], sizes = [1, 8, 128], strides = [1, 1, 1]} : vector<4x8x128xf32> to vector<1x8x128xf32>
    %21 = vector.shape_cast %20 : vector<1x8x128xf32> to vector<8x128xf32>
    %22 = vector.broadcast %19 : f32 to vector<8x128xf32>
    %23 = arith.mulf %22, %21 : vector<8x128xf32>
    %24 = arith.addf %18, %23 : vector<8x128xf32>
    %c1_8 = arith.constant 1 : index
    %c0_9 = arith.constant 0 : index
    %25 = memref.load %arg6[%c1_8, %c0_9] : memref<8x28xf32, #tpu.memory_space<smem>>
    %26 = vector.extract_strided_slice %1 {offsets = [0, 0, 0], sizes = [1, 8, 128], strides = [1, 1, 1]} : vector<4x8x128xf32> to vector<1x8x128xf32>
    %27 = vector.shape_cast %26 : vector<1x8x128xf32> to vector<8x128xf32>
    %28 = vector.broadcast %25 : f32 to vector<8x128xf32>
    %29 = arith.mulf %28, %27 : vector<8x128xf32>
    %c1_10 = arith.constant 1 : index
    %c1_11 = arith.constant 1 : index
    %30 = memref.load %arg6[%c1_10, %c1_11] : memref<8x28xf32, #tpu.memory_space<smem>>
    %31 = vector.extract_strided_slice %1 {offsets = [1, 0, 0], sizes = [1, 8, 128], strides = [1, 1, 1]} : vector<4x8x128xf32> to vector<1x8x128xf32>
    %32 = vector.shape_cast %31 : vector<1x8x128xf32> to vector<8x128xf32>
    %33 = vector.broadcast %30 : f32 to vector<8x128xf32>
    %34 = arith.mulf %33, %32 : vector<8x128xf32>
    %35 = arith.addf %29, %34 : vector<8x128xf32>
    %c1_12 = arith.constant 1 : index
    %c2_13 = arith.constant 2 : index
    %36 = memref.load %arg6[%c1_12, %c2_13] : memref<8x28xf32, #tpu.memory_space<smem>>
    %37 = vector.extract_strided_slice %1 {offsets = [2, 0, 0], sizes = [1, 8, 128], strides = [1, 1, 1]} : vector<4x8x128xf32> to vector<1x8x128xf32>
    %38 = vector.shape_cast %37 : vector<1x8x128xf32> to vector<8x128xf32>
    %39 = vector.broadcast %36 : f32 to vector<8x128xf32>
    %40 = arith.mulf %39, %38 : vector<8x128xf32>
    %41 = arith.addf %35, %40 : vector<8x128xf32>
    %c1_14 = arith.constant 1 : index
    %c3_15 = arith.constant 3 : index
    %42 = memref.load %arg6[%c1_14, %c3_15] : memref<8x28xf32, #tpu.memory_space<smem>>
    %43 = vector.extract_strided_slice %1 {offsets = [3, 0, 0], sizes = [1, 8, 128], strides = [1, 1, 1]} : vector<4x8x128xf32> to vector<1x8x128xf32>
    %44 = vector.shape_cast %43 : vector<1x8x128xf32> to vector<8x128xf32>
    %45 = vector.broadcast %42 : f32 to vector<8x128xf32>
    %46 = arith.mulf %45, %44 : vector<8x128xf32>
    %47 = arith.addf %41, %46 : vector<8x128xf32>
    %c2_16 = arith.constant 2 : index
    %c0_17 = arith.constant 0 : index
    %48 = memref.load %arg6[%c2_16, %c0_17] : memref<8x28xf32, #tpu.memory_space<smem>>
    %49 = vector.extract_strided_slice %1 {offsets = [0, 0, 0], sizes = [1, 8, 128], strides = [1, 1, 1]} : vector<4x8x128xf32> to vector<1x8x128xf32>
    %50 = vector.shape_cast %49 : vector<1x8x128xf32> to vector<8x128xf32>
    %51 = vector.broadcast %48 : f32 to vector<8x128xf32>
    %52 = arith.mulf %51, %50 : vector<8x128xf32>
    %c2_18 = arith.constant 2 : index
    %c1_19 = arith.constant 1 : index
    %53 = memref.load %arg6[%c2_18, %c1_19] : memref<8x28xf32, #tpu.memory_space<smem>>
    %54 = vector.extract_strided_slice %1 {offsets = [1, 0, 0], sizes = [1, 8, 128], strides = [1, 1, 1]} : vector<4x8x128xf32> to vector<1x8x128xf32>
    %55 = vector.shape_cast %54 : vector<1x8x128xf32> to vector<8x128xf32>
    %56 = vector.broadcast %53 : f32 to vector<8x128xf32>
    %57 = arith.mulf %56, %55 : vector<8x128xf32>
    %58 = arith.addf %52, %57 : vector<8x128xf32>
    %c2_20 = arith.constant 2 : index
    %c2_21 = arith.constant 2 : index
    %59 = memref.load %arg6[%c2_20, %c2_21] : memref<8x28xf32, #tpu.memory_space<smem>>
    %60 = vector.extract_strided_slice %1 {offsets = [2, 0, 0], sizes = [1, 8, 128], strides = [1, 1, 1]} : vector<4x8x128xf32> to vector<1x8x128xf32>
    %61 = vector.shape_cast %60 : vector<1x8x128xf32> to vector<8x128xf32>
    %62 = vector.broadcast %59 : f32 to vector<8x128xf32>
    %63 = arith.mulf %62, %61 : vector<8x128xf32>
    %64 = arith.addf %58, %63 : vector<8x128xf32>
    %c2_22 = arith.constant 2 : index
    %c3_23 = arith.constant 3 : index
    %65 = memref.load %arg6[%c2_22, %c3_23] : memref<8x28xf32, #tpu.memory_space<smem>>
    %66 = vector.extract_strided_slice %1 {offsets = [3, 0, 0], sizes = [1, 8, 128], strides = [1, 1, 1]} : vector<4x8x128xf32> to vector<1x8x128xf32>
    %67 = vector.shape_cast %66 : vector<1x8x128xf32> to vector<8x128xf32>
    %68 = vector.broadcast %65 : f32 to vector<8x128xf32>
    %69 = arith.mulf %68, %67 : vector<8x128xf32>
    %70 = arith.addf %64, %69 : vector<8x128xf32>
    %c3_24 = arith.constant 3 : index
    %c0_25 = arith.constant 0 : index
    %71 = memref.load %arg6[%c3_24, %c0_25] : memref<8x28xf32, #tpu.memory_space<smem>>
    %72 = vector.extract_strided_slice %1 {offsets = [0, 0, 0], sizes = [1, 8, 128], strides = [1, 1, 1]} : vector<4x8x128xf32> to vector<1x8x128xf32>
    %73 = vector.shape_cast %72 : vector<1x8x128xf32> to vector<8x128xf32>
    %74 = vector.broadcast %71 : f32 to vector<8x128xf32>
    %75 = arith.mulf %74, %73 : vector<8x128xf32>
    %c3_26 = arith.constant 3 : index
    %c1_27 = arith.constant 1 : index
    %76 = memref.load %arg6[%c3_26, %c1_27] : memref<8x28xf32, #tpu.memory_space<smem>>
    %77 = vector.extract_strided_slice %1 {offsets = [1, 0, 0], sizes = [1, 8, 128], strides = [1, 1, 1]} : vector<4x8x128xf32> to vector<1x8x128xf32>
    %78 = vector.shape_cast %77 : vector<1x8x128xf32> to vector<8x128xf32>
    %79 = vector.broadcast %76 : f32 to vector<8x128xf32>
    %80 = arith.mulf %79, %78 : vector<8x128xf32>
    %81 = arith.addf %75, %80 : vector<8x128xf32>
    %c3_28 = arith.constant 3 : index
    %c2_29 = arith.constant 2 : index
    %82 = memref.load %arg6[%c3_28, %c2_29] : memref<8x28xf32, #tpu.memory_space<smem>>
    %83 = vector.extract_strided_slice %1 {offsets = [2, 0, 0], sizes = [1, 8, 128], strides = [1, 1, 1]} : vector<4x8x128xf32> to vector<1x8x128xf32>
    %84 = vector.shape_cast %83 : vector<1x8x128xf32> to vector<8x128xf32>
    %85 = vector.broadcast %82 : f32 to vector<8x128xf32>
    %86 = arith.mulf %85, %84 : vector<8x128xf32>
    %87 = arith.addf %81, %86 : vector<8x128xf32>
    %c3_30 = arith.constant 3 : index
    %c3_31 = arith.constant 3 : index
    %88 = memref.load %arg6[%c3_30, %c3_31] : memref<8x28xf32, #tpu.memory_space<smem>>
    %89 = vector.extract_strided_slice %1 {offsets = [3, 0, 0], sizes = [1, 8, 128], strides = [1, 1, 1]} : vector<4x8x128xf32> to vector<1x8x128xf32>
    %90 = vector.shape_cast %89 : vector<1x8x128xf32> to vector<8x128xf32>
    %91 = vector.broadcast %88 : f32 to vector<8x128xf32>
    %92 = arith.mulf %91, %90 : vector<8x128xf32>
    %93 = arith.addf %87, %92 : vector<8x128xf32>
    %c4 = arith.constant 4 : index
    %c0_32 = arith.constant 0 : index
    %94 = memref.load %arg6[%c4, %c0_32] : memref<8x28xf32, #tpu.memory_space<smem>>
    %95 = vector.extract_strided_slice %1 {offsets = [0, 0, 0], sizes = [1, 8, 128], strides = [1, 1, 1]} : vector<4x8x128xf32> to vector<1x8x128xf32>
    %96 = vector.shape_cast %95 : vector<1x8x128xf32> to vector<8x128xf32>
    %97 = vector.broadcast %94 : f32 to vector<8x128xf32>
    %98 = arith.mulf %97, %96 : vector<8x128xf32>
    %c4_33 = arith.constant 4 : index
    %c1_34 = arith.constant 1 : index
    %99 = memref.load %arg6[%c4_33, %c1_34] : memref<8x28xf32, #tpu.memory_space<smem>>
    %100 = vector.extract_strided_slice %1 {offsets = [1, 0, 0], sizes = [1, 8, 128], strides = [1, 1, 1]} : vector<4x8x128xf32> to vector<1x8x128xf32>
    %101 = vector.shape_cast %100 : vector<1x8x128xf32> to vector<8x128xf32>
    %102 = vector.broadcast %99 : f32 to vector<8x128xf32>
    %103 = arith.mulf %102, %101 : vector<8x128xf32>
    %104 = arith.addf %98, %103 : vector<8x128xf32>
    %c4_35 = arith.constant 4 : index
    %c2_36 = arith.constant 2 : index
    %105 = memref.load %arg6[%c4_35, %c2_36] : memref<8x28xf32, #tpu.memory_space<smem>>
    %106 = vector.extract_strided_slice %1 {offsets = [2, 0, 0], sizes = [1, 8, 128], strides = [1, 1, 1]} : vector<4x8x128xf32> to vector<1x8x128xf32>
    %107 = vector.shape_cast %106 : vector<1x8x128xf32> to vector<8x128xf32>
    %108 = vector.broadcast %105 : f32 to vector<8x128xf32>
    %109 = arith.mulf %108, %107 : vector<8x128xf32>
    %110 = arith.addf %104, %109 : vector<8x128xf32>
    %c4_37 = arith.constant 4 : index
    %c3_38 = arith.constant 3 : index
    %111 = memref.load %arg6[%c4_37, %c3_38] : memref<8x28xf32, #tpu.memory_space<smem>>
    %112 = vector.extract_strided_slice %1 {offsets = [3, 0, 0], sizes = [1, 8, 128], strides = [1, 1, 1]} : vector<4x8x128xf32> to vector<1x8x128xf32>
    %113 = vector.shape_cast %112 : vector<1x8x128xf32> to vector<8x128xf32>
    %114 = vector.broadcast %111 : f32 to vector<8x128xf32>
    %115 = arith.mulf %114, %113 : vector<8x128xf32>
    %116 = arith.addf %110, %115 : vector<8x128xf32>
    %c5 = arith.constant 5 : index
    %c0_39 = arith.constant 0 : index
    %117 = memref.load %arg6[%c5, %c0_39] : memref<8x28xf32, #tpu.memory_space<smem>>
    %118 = vector.extract_strided_slice %1 {offsets = [0, 0, 0], sizes = [1, 8, 128], strides = [1, 1, 1]} : vector<4x8x128xf32> to vector<1x8x128xf32>
    %119 = vector.shape_cast %118 : vector<1x8x128xf32> to vector<8x128xf32>
    %120 = vector.broadcast %117 : f32 to vector<8x128xf32>
    %121 = arith.mulf %120, %119 : vector<8x128xf32>
    %c5_40 = arith.constant 5 : index
    %c1_41 = arith.constant 1 : index
    %122 = memref.load %arg6[%c5_40, %c1_41] : memref<8x28xf32, #tpu.memory_space<smem>>
    %123 = vector.extract_strided_slice %1 {offsets = [1, 0, 0], sizes = [1, 8, 128], strides = [1, 1, 1]} : vector<4x8x128xf32> to vector<1x8x128xf32>
    %124 = vector.shape_cast %123 : vector<1x8x128xf32> to vector<8x128xf32>
    %125 = vector.broadcast %122 : f32 to vector<8x128xf32>
    %126 = arith.mulf %125, %124 : vector<8x128xf32>
    %127 = arith.addf %121, %126 : vector<8x128xf32>
    %c5_42 = arith.constant 5 : index
    %c2_43 = arith.constant 2 : index
    %128 = memref.load %arg6[%c5_42, %c2_43] : memref<8x28xf32, #tpu.memory_space<smem>>
    %129 = vector.extract_strided_slice %1 {offsets = [2, 0, 0], sizes = [1, 8, 128], strides = [1, 1, 1]} : vector<4x8x128xf32> to vector<1x8x128xf32>
    %130 = vector.shape_cast %129 : vector<1x8x128xf32> to vector<8x128xf32>
    %131 = vector.broadcast %128 : f32 to vector<8x128xf32>
    %132 = arith.mulf %131, %130 : vector<8x128xf32>
    %133 = arith.addf %127, %132 : vector<8x128xf32>
    %c5_44 = arith.constant 5 : index
    %c3_45 = arith.constant 3 : index
    %134 = memref.load %arg6[%c5_44, %c3_45] : memref<8x28xf32, #tpu.memory_space<smem>>
    %135 = vector.extract_strided_slice %1 {offsets = [3, 0, 0], sizes = [1, 8, 128], strides = [1, 1, 1]} : vector<4x8x128xf32> to vector<1x8x128xf32>
    %136 = vector.shape_cast %135 : vector<1x8x128xf32> to vector<8x128xf32>
    %137 = vector.broadcast %134 : f32 to vector<8x128xf32>
    %138 = arith.mulf %137, %136 : vector<8x128xf32>
    %139 = arith.addf %133, %138 : vector<8x128xf32>
    %c6 = arith.constant 6 : index
    %c0_46 = arith.constant 0 : index
    %140 = memref.load %arg6[%c6, %c0_46] : memref<8x28xf32, #tpu.memory_space<smem>>
    %141 = vector.extract_strided_slice %1 {offsets = [0, 0, 0], sizes = [1, 8, 128], strides = [1, 1, 1]} : vector<4x8x128xf32> to vector<1x8x128xf32>
    %142 = vector.shape_cast %141 : vector<1x8x128xf32> to vector<8x128xf32>
    %143 = vector.broadcast %140 : f32 to vector<8x128xf32>
    %144 = arith.mulf %143, %142 : vector<8x128xf32>
    %c6_47 = arith.constant 6 : index
    %c1_48 = arith.constant 1 : index
    %145 = memref.load %arg6[%c6_47, %c1_48] : memref<8x28xf32, #tpu.memory_space<smem>>
    %146 = vector.extract_strided_slice %1 {offsets = [1, 0, 0], sizes = [1, 8, 128], strides = [1, 1, 1]} : vector<4x8x128xf32> to vector<1x8x128xf32>
    %147 = vector.shape_cast %146 : vector<1x8x128xf32> to vector<8x128xf32>
    %148 = vector.broadcast %145 : f32 to vector<8x128xf32>
    %149 = arith.mulf %148, %147 : vector<8x128xf32>
    %150 = arith.addf %144, %149 : vector<8x128xf32>
    %c6_49 = arith.constant 6 : index
    %c2_50 = arith.constant 2 : index
    %151 = memref.load %arg6[%c6_49, %c2_50] : memref<8x28xf32, #tpu.memory_space<smem>>
    %152 = vector.extract_strided_slice %1 {offsets = [2, 0, 0], sizes = [1, 8, 128], strides = [1, 1, 1]} : vector<4x8x128xf32> to vector<1x8x128xf32>
    %153 = vector.shape_cast %152 : vector<1x8x128xf32> to vector<8x128xf32>
    %154 = vector.broadcast %151 : f32 to vector<8x128xf32>
    %155 = arith.mulf %154, %153 : vector<8x128xf32>
    %156 = arith.addf %150, %155 : vector<8x128xf32>
    %c6_51 = arith.constant 6 : index
    %c3_52 = arith.constant 3 : index
    %157 = memref.load %arg6[%c6_51, %c3_52] : memref<8x28xf32, #tpu.memory_space<smem>>
    %158 = vector.extract_strided_slice %1 {offsets = [3, 0, 0], sizes = [1, 8, 128], strides = [1, 1, 1]} : vector<4x8x128xf32> to vector<1x8x128xf32>
    %159 = vector.shape_cast %158 : vector<1x8x128xf32> to vector<8x128xf32>
    %160 = vector.broadcast %157 : f32 to vector<8x128xf32>
    %161 = arith.mulf %160, %159 : vector<8x128xf32>
    %162 = arith.addf %156, %161 : vector<8x128xf32>
    %c7 = arith.constant 7 : index
    %c0_53 = arith.constant 0 : index
    %163 = memref.load %arg6[%c7, %c0_53] : memref<8x28xf32, #tpu.memory_space<smem>>
    %164 = vector.extract_strided_slice %1 {offsets = [0, 0, 0], sizes = [1, 8, 128], strides = [1, 1, 1]} : vector<4x8x128xf32> to vector<1x8x128xf32>
    %165 = vector.shape_cast %164 : vector<1x8x128xf32> to vector<8x128xf32>
    %166 = vector.broadcast %163 : f32 to vector<8x128xf32>
    %167 = arith.mulf %166, %165 : vector<8x128xf32>
    %c7_54 = arith.constant 7 : index
    %c1_55 = arith.constant 1 : index
    %168 = memref.load %arg6[%c7_54, %c1_55] : memref<8x28xf32, #tpu.memory_space<smem>>
    %169 = vector.extract_strided_slice %1 {offsets = [1, 0, 0], sizes = [1, 8, 128], strides = [1, 1, 1]} : vector<4x8x128xf32> to vector<1x8x128xf32>
    %170 = vector.shape_cast %169 : vector<1x8x128xf32> to vector<8x128xf32>
    %171 = vector.broadcast %168 : f32 to vector<8x128xf32>
    %172 = arith.mulf %171, %170 : vector<8x128xf32>
    %173 = arith.addf %167, %172 : vector<8x128xf32>
    %c7_56 = arith.constant 7 : index
    %c2_57 = arith.constant 2 : index
    %174 = memref.load %arg6[%c7_56, %c2_57] : memref<8x28xf32, #tpu.memory_space<smem>>
    %175 = vector.extract_strided_slice %1 {offsets = [2, 0, 0], sizes = [1, 8, 128], strides = [1, 1, 1]} : vector<4x8x128xf32> to vector<1x8x128xf32>
    %176 = vector.shape_cast %175 : vector<1x8x128xf32> to vector<8x128xf32>
    %177 = vector.broadcast %174 : f32 to vector<8x128xf32>
    %178 = arith.mulf %177, %176 : vector<8x128xf32>
    %179 = arith.addf %173, %178 : vector<8x128xf32>
    %c7_58 = arith.constant 7 : index
    %c3_59 = arith.constant 3 : index
    %180 = memref.load %arg6[%c7_58, %c3_59] : memref<8x28xf32, #tpu.memory_space<smem>>
    %181 = vector.extract_strided_slice %1 {offsets = [3, 0, 0], sizes = [1, 8, 128], strides = [1, 1, 1]} : vector<4x8x128xf32> to vector<1x8x128xf32>
    %182 = vector.shape_cast %181 : vector<1x8x128xf32> to vector<8x128xf32>
    %183 = vector.broadcast %180 : f32 to vector<8x128xf32>
    %184 = arith.mulf %183, %182 : vector<8x128xf32>
    %185 = arith.addf %179, %184 : vector<8x128xf32>
    %c0_60 = arith.constant 0 : index
    %c0_61 = arith.constant 0 : index
    %c0_62 = arith.constant 0 : index
    %c0_63 = arith.constant 0 : index
    %186 = vector.load %arg3[%c0_60, %c0_61, %c0_62, %c0_63] : memref<1x8x8x128xf32, #tpu.memory_space<vmem>>, vector<1x8x8x128xf32>
    %187 = vector.shape_cast %186 : vector<1x8x8x128xf32> to vector<8x8x128xf32>
    %188 = vector.extract_strided_slice %1 {offsets = [0, 0, 0], sizes = [4, 1, 128], strides = [1, 1, 1]} : vector<4x8x128xf32> to vector<4x1x128xf32>
    %189 = vector.extract_strided_slice %187 {offsets = [0, 0, 0], sizes = [1, 8, 128], strides = [1, 1, 1]} : vector<8x8x128xf32> to vector<1x8x128xf32>
    %190 = vector.broadcast %188 : vector<4x1x128xf32> to vector<4x8x128xf32>
    %191 = vector.broadcast %189 : vector<1x8x128xf32> to vector<4x8x128xf32>
    %192 = arith.mulf %190, %191 : vector<4x8x128xf32>
    %193 = vector.extract_strided_slice %1 {offsets = [0, 1, 0], sizes = [4, 1, 128], strides = [1, 1, 1]} : vector<4x8x128xf32> to vector<4x1x128xf32>
    %194 = vector.extract_strided_slice %187 {offsets = [1, 0, 0], sizes = [1, 8, 128], strides = [1, 1, 1]} : vector<8x8x128xf32> to vector<1x8x128xf32>
    %195 = vector.broadcast %193 : vector<4x1x128xf32> to vector<4x8x128xf32>
    %196 = vector.broadcast %194 : vector<1x8x128xf32> to vector<4x8x128xf32>
    %197 = arith.mulf %195, %196 : vector<4x8x128xf32>
    %198 = arith.addf %192, %197 : vector<4x8x128xf32>
    %199 = vector.extract_strided_slice %1 {offsets = [0, 2, 0], sizes = [4, 1, 128], strides = [1, 1, 1]} : vector<4x8x128xf32> to vector<4x1x128xf32>
    %200 = vector.extract_strided_slice %187 {offsets = [2, 0, 0], sizes = [1, 8, 128], strides = [1, 1, 1]} : vector<8x8x128xf32> to vector<1x8x128xf32>
    %201 = vector.broadcast %199 : vector<4x1x128xf32> to vector<4x8x128xf32>
    %202 = vector.broadcast %200 : vector<1x8x128xf32> to vector<4x8x128xf32>
    %203 = arith.mulf %201, %202 : vector<4x8x128xf32>
    %204 = arith.addf %198, %203 : vector<4x8x128xf32>
    %205 = vector.extract_strided_slice %1 {offsets = [0, 3, 0], sizes = [4, 1, 128], strides = [1, 1, 1]} : vector<4x8x128xf32> to vector<4x1x128xf32>
    %206 = vector.extract_strided_slice %187 {offsets = [3, 0, 0], sizes = [1, 8, 128], strides = [1, 1, 1]} : vector<8x8x128xf32> to vector<1x8x128xf32>
    %207 = vector.broadcast %205 : vector<4x1x128xf32> to vector<4x8x128xf32>
    %208 = vector.broadcast %206 : vector<1x8x128xf32> to vector<4x8x128xf32>
    %209 = arith.mulf %207, %208 : vector<4x8x128xf32>
    %210 = arith.addf %204, %209 : vector<4x8x128xf32>
    %211 = vector.extract_strided_slice %1 {offsets = [0, 4, 0], sizes = [4, 1, 128], strides = [1, 1, 1]} : vector<4x8x128xf32> to vector<4x1x128xf32>
    %212 = vector.extract_strided_slice %187 {offsets = [4, 0, 0], sizes = [1, 8, 128], strides = [1, 1, 1]} : vector<8x8x128xf32> to vector<1x8x128xf32>
    %213 = vector.broadcast %211 : vector<4x1x128xf32> to vector<4x8x128xf32>
    %214 = vector.broadcast %212 : vector<1x8x128xf32> to vector<4x8x128xf32>
    %215 = arith.mulf %213, %214 : vector<4x8x128xf32>
    %216 = arith.addf %210, %215 : vector<4x8x128xf32>
    %217 = vector.extract_strided_slice %1 {offsets = [0, 5, 0], sizes = [4, 1, 128], strides = [1, 1, 1]} : vector<4x8x128xf32> to vector<4x1x128xf32>
    %218 = vector.extract_strided_slice %187 {offsets = [5, 0, 0], sizes = [1, 8, 128], strides = [1, 1, 1]} : vector<8x8x128xf32> to vector<1x8x128xf32>
    %219 = vector.broadcast %217 : vector<4x1x128xf32> to vector<4x8x128xf32>
    %220 = vector.broadcast %218 : vector<1x8x128xf32> to vector<4x8x128xf32>
    %221 = arith.mulf %219, %220 : vector<4x8x128xf32>
    %222 = arith.addf %216, %221 : vector<4x8x128xf32>
    %223 = vector.extract_strided_slice %1 {offsets = [0, 6, 0], sizes = [4, 1, 128], strides = [1, 1, 1]} : vector<4x8x128xf32> to vector<4x1x128xf32>
    %224 = vector.extract_strided_slice %187 {offsets = [6, 0, 0], sizes = [1, 8, 128], strides = [1, 1, 1]} : vector<8x8x128xf32> to vector<1x8x128xf32>
    %225 = vector.broadcast %223 : vector<4x1x128xf32> to vector<4x8x128xf32>
    %226 = vector.broadcast %224 : vector<1x8x128xf32> to vector<4x8x128xf32>
    %227 = arith.mulf %225, %226 : vector<4x8x128xf32>
    %228 = arith.addf %222, %227 : vector<4x8x128xf32>
    %229 = vector.extract_strided_slice %1 {offsets = [0, 7, 0], sizes = [4, 1, 128], strides = [1, 1, 1]} : vector<4x8x128xf32> to vector<4x1x128xf32>
    %230 = vector.extract_strided_slice %187 {offsets = [7, 0, 0], sizes = [1, 8, 128], strides = [1, 1, 1]} : vector<8x8x128xf32> to vector<1x8x128xf32>
    %231 = vector.broadcast %229 : vector<4x1x128xf32> to vector<4x8x128xf32>
    %232 = vector.broadcast %230 : vector<1x8x128xf32> to vector<4x8x128xf32>
    %233 = arith.mulf %231, %232 : vector<4x8x128xf32>
    %234 = arith.addf %228, %233 : vector<4x8x128xf32>
    %c0_64 = arith.constant 0 : index
    %c4_65 = arith.constant 4 : index
    %235 = memref.load %arg6[%c0_64, %c4_65] : memref<8x28xf32, #tpu.memory_space<smem>>
    %236 = vector.extract_strided_slice %234 {offsets = [0, 0, 0], sizes = [1, 8, 128], strides = [1, 1, 1]} : vector<4x8x128xf32> to vector<1x8x128xf32>
    %237 = vector.shape_cast %236 : vector<1x8x128xf32> to vector<8x128xf32>
    %238 = vector.broadcast %235 : f32 to vector<8x128xf32>
    %239 = arith.mulf %238, %237 : vector<8x128xf32>
    %240 = arith.addf %24, %239 : vector<8x128xf32>
    %c0_66 = arith.constant 0 : index
    %c5_67 = arith.constant 5 : index
    %241 = memref.load %arg6[%c0_66, %c5_67] : memref<8x28xf32, #tpu.memory_space<smem>>
    %242 = vector.extract_strided_slice %234 {offsets = [1, 0, 0], sizes = [1, 8, 128], strides = [1, 1, 1]} : vector<4x8x128xf32> to vector<1x8x128xf32>
    %243 = vector.shape_cast %242 : vector<1x8x128xf32> to vector<8x128xf32>
    %244 = vector.broadcast %241 : f32 to vector<8x128xf32>
    %245 = arith.mulf %244, %243 : vector<8x128xf32>
    %246 = arith.addf %240, %245 : vector<8x128xf32>
    %c0_68 = arith.constant 0 : index
    %c6_69 = arith.constant 6 : index
    %247 = memref.load %arg6[%c0_68, %c6_69] : memref<8x28xf32, #tpu.memory_space<smem>>
    %248 = vector.extract_strided_slice %234 {offsets = [2, 0, 0], sizes = [1, 8, 128], strides = [1, 1, 1]} : vector<4x8x128xf32> to vector<1x8x128xf32>
    %249 = vector.shape_cast %248 : vector<1x8x128xf32> to vector<8x128xf32>
    %250 = vector.broadcast %247 : f32 to vector<8x128xf32>
    %251 = arith.mulf %250, %249 : vector<8x128xf32>
    %252 = arith.addf %246, %251 : vector<8x128xf32>
    %c0_70 = arith.constant 0 : index
    %c7_71 = arith.constant 7 : index
    %253 = memref.load %arg6[%c0_70, %c7_71] : memref<8x28xf32, #tpu.memory_space<smem>>
    %254 = vector.extract_strided_slice %234 {offsets = [3, 0, 0], sizes = [1, 8, 128], strides = [1, 1, 1]} : vector<4x8x128xf32> to vector<1x8x128xf32>
    %255 = vector.shape_cast %254 : vector<1x8x128xf32> to vector<8x128xf32>
    %256 = vector.broadcast %253 : f32 to vector<8x128xf32>
    %257 = arith.mulf %256, %255 : vector<8x128xf32>
    %258 = arith.addf %252, %257 : vector<8x128xf32>
    %c1_72 = arith.constant 1 : index
    %c4_73 = arith.constant 4 : index
    %259 = memref.load %arg6[%c1_72, %c4_73] : memref<8x28xf32, #tpu.memory_space<smem>>
    %260 = vector.extract_strided_slice %234 {offsets = [0, 0, 0], sizes = [1, 8, 128], strides = [1, 1, 1]} : vector<4x8x128xf32> to vector<1x8x128xf32>
    %261 = vector.shape_cast %260 : vector<1x8x128xf32> to vector<8x128xf32>
    %262 = vector.broadcast %259 : f32 to vector<8x128xf32>
    %263 = arith.mulf %262, %261 : vector<8x128xf32>
    %264 = arith.addf %47, %263 : vector<8x128xf32>
    %c1_74 = arith.constant 1 : index
    %c5_75 = arith.constant 5 : index
    %265 = memref.load %arg6[%c1_74, %c5_75] : memref<8x28xf32, #tpu.memory_space<smem>>
    %266 = vector.extract_strided_slice %234 {offsets = [1, 0, 0], sizes = [1, 8, 128], strides = [1, 1, 1]} : vector<4x8x128xf32> to vector<1x8x128xf32>
    %267 = vector.shape_cast %266 : vector<1x8x128xf32> to vector<8x128xf32>
    %268 = vector.broadcast %265 : f32 to vector<8x128xf32>
    %269 = arith.mulf %268, %267 : vector<8x128xf32>
    %270 = arith.addf %264, %269 : vector<8x128xf32>
    %c1_76 = arith.constant 1 : index
    %c6_77 = arith.constant 6 : index
    %271 = memref.load %arg6[%c1_76, %c6_77] : memref<8x28xf32, #tpu.memory_space<smem>>
    %272 = vector.extract_strided_slice %234 {offsets = [2, 0, 0], sizes = [1, 8, 128], strides = [1, 1, 1]} : vector<4x8x128xf32> to vector<1x8x128xf32>
    %273 = vector.shape_cast %272 : vector<1x8x128xf32> to vector<8x128xf32>
    %274 = vector.broadcast %271 : f32 to vector<8x128xf32>
    %275 = arith.mulf %274, %273 : vector<8x128xf32>
    %276 = arith.addf %270, %275 : vector<8x128xf32>
    %c1_78 = arith.constant 1 : index
    %c7_79 = arith.constant 7 : index
    %277 = memref.load %arg6[%c1_78, %c7_79] : memref<8x28xf32, #tpu.memory_space<smem>>
    %278 = vector.extract_strided_slice %234 {offsets = [3, 0, 0], sizes = [1, 8, 128], strides = [1, 1, 1]} : vector<4x8x128xf32> to vector<1x8x128xf32>
    %279 = vector.shape_cast %278 : vector<1x8x128xf32> to vector<8x128xf32>
    %280 = vector.broadcast %277 : f32 to vector<8x128xf32>
    %281 = arith.mulf %280, %279 : vector<8x128xf32>
    %282 = arith.addf %276, %281 : vector<8x128xf32>
    %c2_80 = arith.constant 2 : index
    %c4_81 = arith.constant 4 : index
    %283 = memref.load %arg6[%c2_80, %c4_81] : memref<8x28xf32, #tpu.memory_space<smem>>
    %284 = vector.extract_strided_slice %234 {offsets = [0, 0, 0], sizes = [1, 8, 128], strides = [1, 1, 1]} : vector<4x8x128xf32> to vector<1x8x128xf32>
    %285 = vector.shape_cast %284 : vector<1x8x128xf32> to vector<8x128xf32>
    %286 = vector.broadcast %283 : f32 to vector<8x128xf32>
    %287 = arith.mulf %286, %285 : vector<8x128xf32>
    %288 = arith.addf %70, %287 : vector<8x128xf32>
    %c2_82 = arith.constant 2 : index
    %c5_83 = arith.constant 5 : index
    %289 = memref.load %arg6[%c2_82, %c5_83] : memref<8x28xf32, #tpu.memory_space<smem>>
    %290 = vector.extract_strided_slice %234 {offsets = [1, 0, 0], sizes = [1, 8, 128], strides = [1, 1, 1]} : vector<4x8x128xf32> to vector<1x8x128xf32>
    %291 = vector.shape_cast %290 : vector<1x8x128xf32> to vector<8x128xf32>
    %292 = vector.broadcast %289 : f32 to vector<8x128xf32>
    %293 = arith.mulf %292, %291 : vector<8x128xf32>
    %294 = arith.addf %288, %293 : vector<8x128xf32>
    %c2_84 = arith.constant 2 : index
    %c6_85 = arith.constant 6 : index
    %295 = memref.load %arg6[%c2_84, %c6_85] : memref<8x28xf32, #tpu.memory_space<smem>>
    %296 = vector.extract_strided_slice %234 {offsets = [2, 0, 0], sizes = [1, 8, 128], strides = [1, 1, 1]} : vector<4x8x128xf32> to vector<1x8x128xf32>
    %297 = vector.shape_cast %296 : vector<1x8x128xf32> to vector<8x128xf32>
    %298 = vector.broadcast %295 : f32 to vector<8x128xf32>
    %299 = arith.mulf %298, %297 : vector<8x128xf32>
    %300 = arith.addf %294, %299 : vector<8x128xf32>
    %c2_86 = arith.constant 2 : index
    %c7_87 = arith.constant 7 : index
    %301 = memref.load %arg6[%c2_86, %c7_87] : memref<8x28xf32, #tpu.memory_space<smem>>
    %302 = vector.extract_strided_slice %234 {offsets = [3, 0, 0], sizes = [1, 8, 128], strides = [1, 1, 1]} : vector<4x8x128xf32> to vector<1x8x128xf32>
    %303 = vector.shape_cast %302 : vector<1x8x128xf32> to vector<8x128xf32>
    %304 = vector.broadcast %301 : f32 to vector<8x128xf32>
    %305 = arith.mulf %304, %303 : vector<8x128xf32>
    %306 = arith.addf %300, %305 : vector<8x128xf32>
    %c3_88 = arith.constant 3 : index
    %c4_89 = arith.constant 4 : index
    %307 = memref.load %arg6[%c3_88, %c4_89] : memref<8x28xf32, #tpu.memory_space<smem>>
    %308 = vector.extract_strided_slice %234 {offsets = [0, 0, 0], sizes = [1, 8, 128], strides = [1, 1, 1]} : vector<4x8x128xf32> to vector<1x8x128xf32>
    %309 = vector.shape_cast %308 : vector<1x8x128xf32> to vector<8x128xf32>
    %310 = vector.broadcast %307 : f32 to vector<8x128xf32>
    %311 = arith.mulf %310, %309 : vector<8x128xf32>
    %312 = arith.addf %93, %311 : vector<8x128xf32>
    %c3_90 = arith.constant 3 : index
    %c5_91 = arith.constant 5 : index
    %313 = memref.load %arg6[%c3_90, %c5_91] : memref<8x28xf32, #tpu.memory_space<smem>>
    %314 = vector.extract_strided_slice %234 {offsets = [1, 0, 0], sizes = [1, 8, 128], strides = [1, 1, 1]} : vector<4x8x128xf32> to vector<1x8x128xf32>
    %315 = vector.shape_cast %314 : vector<1x8x128xf32> to vector<8x128xf32>
    %316 = vector.broadcast %313 : f32 to vector<8x128xf32>
    %317 = arith.mulf %316, %315 : vector<8x128xf32>
    %318 = arith.addf %312, %317 : vector<8x128xf32>
    %c3_92 = arith.constant 3 : index
    %c6_93 = arith.constant 6 : index
    %319 = memref.load %arg6[%c3_92, %c6_93] : memref<8x28xf32, #tpu.memory_space<smem>>
    %320 = vector.extract_strided_slice %234 {offsets = [2, 0, 0], sizes = [1, 8, 128], strides = [1, 1, 1]} : vector<4x8x128xf32> to vector<1x8x128xf32>
    %321 = vector.shape_cast %320 : vector<1x8x128xf32> to vector<8x128xf32>
    %322 = vector.broadcast %319 : f32 to vector<8x128xf32>
    %323 = arith.mulf %322, %321 : vector<8x128xf32>
    %324 = arith.addf %318, %323 : vector<8x128xf32>
    %c3_94 = arith.constant 3 : index
    %c7_95 = arith.constant 7 : index
    %325 = memref.load %arg6[%c3_94, %c7_95] : memref<8x28xf32, #tpu.memory_space<smem>>
    %326 = vector.extract_strided_slice %234 {offsets = [3, 0, 0], sizes = [1, 8, 128], strides = [1, 1, 1]} : vector<4x8x128xf32> to vector<1x8x128xf32>
    %327 = vector.shape_cast %326 : vector<1x8x128xf32> to vector<8x128xf32>
    %328 = vector.broadcast %325 : f32 to vector<8x128xf32>
    %329 = arith.mulf %328, %327 : vector<8x128xf32>
    %330 = arith.addf %324, %329 : vector<8x128xf32>
    %c4_96 = arith.constant 4 : index
    %c4_97 = arith.constant 4 : index
    %331 = memref.load %arg6[%c4_96, %c4_97] : memref<8x28xf32, #tpu.memory_space<smem>>
    %332 = vector.extract_strided_slice %234 {offsets = [0, 0, 0], sizes = [1, 8, 128], strides = [1, 1, 1]} : vector<4x8x128xf32> to vector<1x8x128xf32>
    %333 = vector.shape_cast %332 : vector<1x8x128xf32> to vector<8x128xf32>
    %334 = vector.broadcast %331 : f32 to vector<8x128xf32>
    %335 = arith.mulf %334, %333 : vector<8x128xf32>
    %336 = arith.addf %116, %335 : vector<8x128xf32>
    %c4_98 = arith.constant 4 : index
    %c5_99 = arith.constant 5 : index
    %337 = memref.load %arg6[%c4_98, %c5_99] : memref<8x28xf32, #tpu.memory_space<smem>>
    %338 = vector.extract_strided_slice %234 {offsets = [1, 0, 0], sizes = [1, 8, 128], strides = [1, 1, 1]} : vector<4x8x128xf32> to vector<1x8x128xf32>
    %339 = vector.shape_cast %338 : vector<1x8x128xf32> to vector<8x128xf32>
    %340 = vector.broadcast %337 : f32 to vector<8x128xf32>
    %341 = arith.mulf %340, %339 : vector<8x128xf32>
    %342 = arith.addf %336, %341 : vector<8x128xf32>
    %c4_100 = arith.constant 4 : index
    %c6_101 = arith.constant 6 : index
    %343 = memref.load %arg6[%c4_100, %c6_101] : memref<8x28xf32, #tpu.memory_space<smem>>
    %344 = vector.extract_strided_slice %234 {offsets = [2, 0, 0], sizes = [1, 8, 128], strides = [1, 1, 1]} : vector<4x8x128xf32> to vector<1x8x128xf32>
    %345 = vector.shape_cast %344 : vector<1x8x128xf32> to vector<8x128xf32>
    %346 = vector.broadcast %343 : f32 to vector<8x128xf32>
    %347 = arith.mulf %346, %345 : vector<8x128xf32>
    %348 = arith.addf %342, %347 : vector<8x128xf32>
    %c4_102 = arith.constant 4 : index
    %c7_103 = arith.constant 7 : index
    %349 = memref.load %arg6[%c4_102, %c7_103] : memref<8x28xf32, #tpu.memory_space<smem>>
    %350 = vector.extract_strided_slice %234 {offsets = [3, 0, 0], sizes = [1, 8, 128], strides = [1, 1, 1]} : vector<4x8x128xf32> to vector<1x8x128xf32>
    %351 = vector.shape_cast %350 : vector<1x8x128xf32> to vector<8x128xf32>
    %352 = vector.broadcast %349 : f32 to vector<8x128xf32>
    %353 = arith.mulf %352, %351 : vector<8x128xf32>
    %354 = arith.addf %348, %353 : vector<8x128xf32>
    %c5_104 = arith.constant 5 : index
    %c4_105 = arith.constant 4 : index
    %355 = memref.load %arg6[%c5_104, %c4_105] : memref<8x28xf32, #tpu.memory_space<smem>>
    %356 = vector.extract_strided_slice %234 {offsets = [0, 0, 0], sizes = [1, 8, 128], strides = [1, 1, 1]} : vector<4x8x128xf32> to vector<1x8x128xf32>
    %357 = vector.shape_cast %356 : vector<1x8x128xf32> to vector<8x128xf32>
    %358 = vector.broadcast %355 : f32 to vector<8x128xf32>
    %359 = arith.mulf %358, %357 : vector<8x128xf32>
    %360 = arith.addf %139, %359 : vector<8x128xf32>
    %c5_106 = arith.constant 5 : index
    %c5_107 = arith.constant 5 : index
    %361 = memref.load %arg6[%c5_106, %c5_107] : memref<8x28xf32, #tpu.memory_space<smem>>
    %362 = vector.extract_strided_slice %234 {offsets = [1, 0, 0], sizes = [1, 8, 128], strides = [1, 1, 1]} : vector<4x8x128xf32> to vector<1x8x128xf32>
    %363 = vector.shape_cast %362 : vector<1x8x128xf32> to vector<8x128xf32>
    %364 = vector.broadcast %361 : f32 to vector<8x128xf32>
    %365 = arith.mulf %364, %363 : vector<8x128xf32>
    %366 = arith.addf %360, %365 : vector<8x128xf32>
    %c5_108 = arith.constant 5 : index
    %c6_109 = arith.constant 6 : index
    %367 = memref.load %arg6[%c5_108, %c6_109] : memref<8x28xf32, #tpu.memory_space<smem>>
    %368 = vector.extract_strided_slice %234 {offsets = [2, 0, 0], sizes = [1, 8, 128], strides = [1, 1, 1]} : vector<4x8x128xf32> to vector<1x8x128xf32>
    %369 = vector.shape_cast %368 : vector<1x8x128xf32> to vector<8x128xf32>
    %370 = vector.broadcast %367 : f32 to vector<8x128xf32>
    %371 = arith.mulf %370, %369 : vector<8x128xf32>
    %372 = arith.addf %366, %371 : vector<8x128xf32>
    %c5_110 = arith.constant 5 : index
    %c7_111 = arith.constant 7 : index
    %373 = memref.load %arg6[%c5_110, %c7_111] : memref<8x28xf32, #tpu.memory_space<smem>>
    %374 = vector.extract_strided_slice %234 {offsets = [3, 0, 0], sizes = [1, 8, 128], strides = [1, 1, 1]} : vector<4x8x128xf32> to vector<1x8x128xf32>
    %375 = vector.shape_cast %374 : vector<1x8x128xf32> to vector<8x128xf32>
    %376 = vector.broadcast %373 : f32 to vector<8x128xf32>
    %377 = arith.mulf %376, %375 : vector<8x128xf32>
    %378 = arith.addf %372, %377 : vector<8x128xf32>
    %c6_112 = arith.constant 6 : index
    %c4_113 = arith.constant 4 : index
    %379 = memref.load %arg6[%c6_112, %c4_113] : memref<8x28xf32, #tpu.memory_space<smem>>
    %380 = vector.extract_strided_slice %234 {offsets = [0, 0, 0], sizes = [1, 8, 128], strides = [1, 1, 1]} : vector<4x8x128xf32> to vector<1x8x128xf32>
    %381 = vector.shape_cast %380 : vector<1x8x128xf32> to vector<8x128xf32>
    %382 = vector.broadcast %379 : f32 to vector<8x128xf32>
    %383 = arith.mulf %382, %381 : vector<8x128xf32>
    %384 = arith.addf %162, %383 : vector<8x128xf32>
    %c6_114 = arith.constant 6 : index
    %c5_115 = arith.constant 5 : index
    %385 = memref.load %arg6[%c6_114, %c5_115] : memref<8x28xf32, #tpu.memory_space<smem>>
    %386 = vector.extract_strided_slice %234 {offsets = [1, 0, 0], sizes = [1, 8, 128], strides = [1, 1, 1]} : vector<4x8x128xf32> to vector<1x8x128xf32>
    %387 = vector.shape_cast %386 : vector<1x8x128xf32> to vector<8x128xf32>
    %388 = vector.broadcast %385 : f32 to vector<8x128xf32>
    %389 = arith.mulf %388, %387 : vector<8x128xf32>
    %390 = arith.addf %384, %389 : vector<8x128xf32>
    %c6_116 = arith.constant 6 : index
    %c6_117 = arith.constant 6 : index
    %391 = memref.load %arg6[%c6_116, %c6_117] : memref<8x28xf32, #tpu.memory_space<smem>>
    %392 = vector.extract_strided_slice %234 {offsets = [2, 0, 0], sizes = [1, 8, 128], strides = [1, 1, 1]} : vector<4x8x128xf32> to vector<1x8x128xf32>
    %393 = vector.shape_cast %392 : vector<1x8x128xf32> to vector<8x128xf32>
    %394 = vector.broadcast %391 : f32 to vector<8x128xf32>
    %395 = arith.mulf %394, %393 : vector<8x128xf32>
    %396 = arith.addf %390, %395 : vector<8x128xf32>
    %c6_118 = arith.constant 6 : index
    %c7_119 = arith.constant 7 : index
    %397 = memref.load %arg6[%c6_118, %c7_119] : memref<8x28xf32, #tpu.memory_space<smem>>
    %398 = vector.extract_strided_slice %234 {offsets = [3, 0, 0], sizes = [1, 8, 128], strides = [1, 1, 1]} : vector<4x8x128xf32> to vector<1x8x128xf32>
    %399 = vector.shape_cast %398 : vector<1x8x128xf32> to vector<8x128xf32>
    %400 = vector.broadcast %397 : f32 to vector<8x128xf32>
    %401 = arith.mulf %400, %399 : vector<8x128xf32>
    %402 = arith.addf %396, %401 : vector<8x128xf32>
    %c7_120 = arith.constant 7 : index
    %c4_121 = arith.constant 4 : index
    %403 = memref.load %arg6[%c7_120, %c4_121] : memref<8x28xf32, #tpu.memory_space<smem>>
    %404 = vector.extract_strided_slice %234 {offsets = [0, 0, 0], sizes = [1, 8, 128], strides = [1, 1, 1]} : vector<4x8x128xf32> to vector<1x8x128xf32>
    %405 = vector.shape_cast %404 : vector<1x8x128xf32> to vector<8x128xf32>
    %406 = vector.broadcast %403 : f32 to vector<8x128xf32>
    %407 = arith.mulf %406, %405 : vector<8x128xf32>
    %408 = arith.addf %185, %407 : vector<8x128xf32>
    %c7_122 = arith.constant 7 : index
    %c5_123 = arith.constant 5 : index
    %409 = memref.load %arg6[%c7_122, %c5_123] : memref<8x28xf32, #tpu.memory_space<smem>>
    %410 = vector.extract_strided_slice %234 {offsets = [1, 0, 0], sizes = [1, 8, 128], strides = [1, 1, 1]} : vector<4x8x128xf32> to vector<1x8x128xf32>
    %411 = vector.shape_cast %410 : vector<1x8x128xf32> to vector<8x128xf32>
    %412 = vector.broadcast %409 : f32 to vector<8x128xf32>
    %413 = arith.mulf %412, %411 : vector<8x128xf32>
    %414 = arith.addf %408, %413 : vector<8x128xf32>
    %c7_124 = arith.constant 7 : index
    %c6_125 = arith.constant 6 : index
    %415 = memref.load %arg6[%c7_124, %c6_125] : memref<8x28xf32, #tpu.memory_space<smem>>
    %416 = vector.extract_strided_slice %234 {offsets = [2, 0, 0], sizes = [1, 8, 128], strides = [1, 1, 1]} : vector<4x8x128xf32> to vector<1x8x128xf32>
    %417 = vector.shape_cast %416 : vector<1x8x128xf32> to vector<8x128xf32>
    %418 = vector.broadcast %415 : f32 to vector<8x128xf32>
    %419 = arith.mulf %418, %417 : vector<8x128xf32>
    %420 = arith.addf %414, %419 : vector<8x128xf32>
    %c7_126 = arith.constant 7 : index
    %c7_127 = arith.constant 7 : index
    %421 = memref.load %arg6[%c7_126, %c7_127] : memref<8x28xf32, #tpu.memory_space<smem>>
    %422 = vector.extract_strided_slice %234 {offsets = [3, 0, 0], sizes = [1, 8, 128], strides = [1, 1, 1]} : vector<4x8x128xf32> to vector<1x8x128xf32>
    %423 = vector.shape_cast %422 : vector<1x8x128xf32> to vector<8x128xf32>
    %424 = vector.broadcast %421 : f32 to vector<8x128xf32>
    %425 = arith.mulf %424, %423 : vector<8x128xf32>
    %426 = arith.addf %420, %425 : vector<8x128xf32>
    %427 = vector.extract_strided_slice %234 {offsets = [0, 0, 0], sizes = [4, 1, 128], strides = [1, 1, 1]} : vector<4x8x128xf32> to vector<4x1x128xf32>
    %428 = vector.extract_strided_slice %187 {offsets = [0, 0, 0], sizes = [1, 8, 128], strides = [1, 1, 1]} : vector<8x8x128xf32> to vector<1x8x128xf32>
    %429 = vector.broadcast %427 : vector<4x1x128xf32> to vector<4x8x128xf32>
    %430 = vector.broadcast %428 : vector<1x8x128xf32> to vector<4x8x128xf32>
    %431 = arith.mulf %429, %430 : vector<4x8x128xf32>
    %432 = vector.extract_strided_slice %234 {offsets = [0, 1, 0], sizes = [4, 1, 128], strides = [1, 1, 1]} : vector<4x8x128xf32> to vector<4x1x128xf32>
    %433 = vector.extract_strided_slice %187 {offsets = [1, 0, 0], sizes = [1, 8, 128], strides = [1, 1, 1]} : vector<8x8x128xf32> to vector<1x8x128xf32>
    %434 = vector.broadcast %432 : vector<4x1x128xf32> to vector<4x8x128xf32>
    %435 = vector.broadcast %433 : vector<1x8x128xf32> to vector<4x8x128xf32>
    %436 = arith.mulf %434, %435 : vector<4x8x128xf32>
    %437 = arith.addf %431, %436 : vector<4x8x128xf32>
    %438 = vector.extract_strided_slice %234 {offsets = [0, 2, 0], sizes = [4, 1, 128], strides = [1, 1, 1]} : vector<4x8x128xf32> to vector<4x1x128xf32>
    %439 = vector.extract_strided_slice %187 {offsets = [2, 0, 0], sizes = [1, 8, 128], strides = [1, 1, 1]} : vector<8x8x128xf32> to vector<1x8x128xf32>
    %440 = vector.broadcast %438 : vector<4x1x128xf32> to vector<4x8x128xf32>
    %441 = vector.broadcast %439 : vector<1x8x128xf32> to vector<4x8x128xf32>
    %442 = arith.mulf %440, %441 : vector<4x8x128xf32>
    %443 = arith.addf %437, %442 : vector<4x8x128xf32>
    %444 = vector.extract_strided_slice %234 {offsets = [0, 3, 0], sizes = [4, 1, 128], strides = [1, 1, 1]} : vector<4x8x128xf32> to vector<4x1x128xf32>
    %445 = vector.extract_strided_slice %187 {offsets = [3, 0, 0], sizes = [1, 8, 128], strides = [1, 1, 1]} : vector<8x8x128xf32> to vector<1x8x128xf32>
    %446 = vector.broadcast %444 : vector<4x1x128xf32> to vector<4x8x128xf32>
    %447 = vector.broadcast %445 : vector<1x8x128xf32> to vector<4x8x128xf32>
    %448 = arith.mulf %446, %447 : vector<4x8x128xf32>
    %449 = arith.addf %443, %448 : vector<4x8x128xf32>
    %450 = vector.extract_strided_slice %234 {offsets = [0, 4, 0], sizes = [4, 1, 128], strides = [1, 1, 1]} : vector<4x8x128xf32> to vector<4x1x128xf32>
    %451 = vector.extract_strided_slice %187 {offsets = [4, 0, 0], sizes = [1, 8, 128], strides = [1, 1, 1]} : vector<8x8x128xf32> to vector<1x8x128xf32>
    %452 = vector.broadcast %450 : vector<4x1x128xf32> to vector<4x8x128xf32>
    %453 = vector.broadcast %451 : vector<1x8x128xf32> to vector<4x8x128xf32>
    %454 = arith.mulf %452, %453 : vector<4x8x128xf32>
    %455 = arith.addf %449, %454 : vector<4x8x128xf32>
    %456 = vector.extract_strided_slice %234 {offsets = [0, 5, 0], sizes = [4, 1, 128], strides = [1, 1, 1]} : vector<4x8x128xf32> to vector<4x1x128xf32>
    %457 = vector.extract_strided_slice %187 {offsets = [5, 0, 0], sizes = [1, 8, 128], strides = [1, 1, 1]} : vector<8x8x128xf32> to vector<1x8x128xf32>
    %458 = vector.broadcast %456 : vector<4x1x128xf32> to vector<4x8x128xf32>
    %459 = vector.broadcast %457 : vector<1x8x128xf32> to vector<4x8x128xf32>
    %460 = arith.mulf %458, %459 : vector<4x8x128xf32>
    %461 = arith.addf %455, %460 : vector<4x8x128xf32>
    %462 = vector.extract_strided_slice %234 {offsets = [0, 6, 0], sizes = [4, 1, 128], strides = [1, 1, 1]} : vector<4x8x128xf32> to vector<4x1x128xf32>
    %463 = vector.extract_strided_slice %187 {offsets = [6, 0, 0], sizes = [1, 8, 128], strides = [1, 1, 1]} : vector<8x8x128xf32> to vector<1x8x128xf32>
    %464 = vector.broadcast %462 : vector<4x1x128xf32> to vector<4x8x128xf32>
    %465 = vector.broadcast %463 : vector<1x8x128xf32> to vector<4x8x128xf32>
    %466 = arith.mulf %464, %465 : vector<4x8x128xf32>
    %467 = arith.addf %461, %466 : vector<4x8x128xf32>
    %468 = vector.extract_strided_slice %234 {offsets = [0, 7, 0], sizes = [4, 1, 128], strides = [1, 1, 1]} : vector<4x8x128xf32> to vector<4x1x128xf32>
    %469 = vector.extract_strided_slice %187 {offsets = [7, 0, 0], sizes = [1, 8, 128], strides = [1, 1, 1]} : vector<8x8x128xf32> to vector<1x8x128xf32>
    %470 = vector.broadcast %468 : vector<4x1x128xf32> to vector<4x8x128xf32>
    %471 = vector.broadcast %469 : vector<1x8x128xf32> to vector<4x8x128xf32>
    %472 = arith.mulf %470, %471 : vector<4x8x128xf32>
    %473 = arith.addf %467, %472 : vector<4x8x128xf32>
    %c0_128 = arith.constant 0 : index
    %c8 = arith.constant 8 : index
    %474 = memref.load %arg6[%c0_128, %c8] : memref<8x28xf32, #tpu.memory_space<smem>>
    %475 = vector.extract_strided_slice %473 {offsets = [0, 0, 0], sizes = [1, 8, 128], strides = [1, 1, 1]} : vector<4x8x128xf32> to vector<1x8x128xf32>
    %476 = vector.shape_cast %475 : vector<1x8x128xf32> to vector<8x128xf32>
    %477 = vector.broadcast %474 : f32 to vector<8x128xf32>
    %478 = arith.mulf %477, %476 : vector<8x128xf32>
    %479 = arith.addf %258, %478 : vector<8x128xf32>
    %c0_129 = arith.constant 0 : index
    %c9 = arith.constant 9 : index
    %480 = memref.load %arg6[%c0_129, %c9] : memref<8x28xf32, #tpu.memory_space<smem>>
    %481 = vector.extract_strided_slice %473 {offsets = [1, 0, 0], sizes = [1, 8, 128], strides = [1, 1, 1]} : vector<4x8x128xf32> to vector<1x8x128xf32>
    %482 = vector.shape_cast %481 : vector<1x8x128xf32> to vector<8x128xf32>
    %483 = vector.broadcast %480 : f32 to vector<8x128xf32>
    %484 = arith.mulf %483, %482 : vector<8x128xf32>
    %485 = arith.addf %479, %484 : vector<8x128xf32>
    %c0_130 = arith.constant 0 : index
    %c10 = arith.constant 10 : index
    %486 = memref.load %arg6[%c0_130, %c10] : memref<8x28xf32, #tpu.memory_space<smem>>
    %487 = vector.extract_strided_slice %473 {offsets = [2, 0, 0], sizes = [1, 8, 128], strides = [1, 1, 1]} : vector<4x8x128xf32> to vector<1x8x128xf32>
    %488 = vector.shape_cast %487 : vector<1x8x128xf32> to vector<8x128xf32>
    %489 = vector.broadcast %486 : f32 to vector<8x128xf32>
    %490 = arith.mulf %489, %488 : vector<8x128xf32>
    %491 = arith.addf %485, %490 : vector<8x128xf32>
    %c0_131 = arith.constant 0 : index
    %c11 = arith.constant 11 : index
    %492 = memref.load %arg6[%c0_131, %c11] : memref<8x28xf32, #tpu.memory_space<smem>>
    %493 = vector.extract_strided_slice %473 {offsets = [3, 0, 0], sizes = [1, 8, 128], strides = [1, 1, 1]} : vector<4x8x128xf32> to vector<1x8x128xf32>
    %494 = vector.shape_cast %493 : vector<1x8x128xf32> to vector<8x128xf32>
    %495 = vector.broadcast %492 : f32 to vector<8x128xf32>
    %496 = arith.mulf %495, %494 : vector<8x128xf32>
    %497 = arith.addf %491, %496 : vector<8x128xf32>
    %c1_132 = arith.constant 1 : index
    %c8_133 = arith.constant 8 : index
    %498 = memref.load %arg6[%c1_132, %c8_133] : memref<8x28xf32, #tpu.memory_space<smem>>
    %499 = vector.extract_strided_slice %473 {offsets = [0, 0, 0], sizes = [1, 8, 128], strides = [1, 1, 1]} : vector<4x8x128xf32> to vector<1x8x128xf32>
    %500 = vector.shape_cast %499 : vector<1x8x128xf32> to vector<8x128xf32>
    %501 = vector.broadcast %498 : f32 to vector<8x128xf32>
    %502 = arith.mulf %501, %500 : vector<8x128xf32>
    %503 = arith.addf %282, %502 : vector<8x128xf32>
    %c1_134 = arith.constant 1 : index
    %c9_135 = arith.constant 9 : index
    %504 = memref.load %arg6[%c1_134, %c9_135] : memref<8x28xf32, #tpu.memory_space<smem>>
    %505 = vector.extract_strided_slice %473 {offsets = [1, 0, 0], sizes = [1, 8, 128], strides = [1, 1, 1]} : vector<4x8x128xf32> to vector<1x8x128xf32>
    %506 = vector.shape_cast %505 : vector<1x8x128xf32> to vector<8x128xf32>
    %507 = vector.broadcast %504 : f32 to vector<8x128xf32>
    %508 = arith.mulf %507, %506 : vector<8x128xf32>
    %509 = arith.addf %503, %508 : vector<8x128xf32>
    %c1_136 = arith.constant 1 : index
    %c10_137 = arith.constant 10 : index
    %510 = memref.load %arg6[%c1_136, %c10_137] : memref<8x28xf32, #tpu.memory_space<smem>>
    %511 = vector.extract_strided_slice %473 {offsets = [2, 0, 0], sizes = [1, 8, 128], strides = [1, 1, 1]} : vector<4x8x128xf32> to vector<1x8x128xf32>
    %512 = vector.shape_cast %511 : vector<1x8x128xf32> to vector<8x128xf32>
    %513 = vector.broadcast %510 : f32 to vector<8x128xf32>
    %514 = arith.mulf %513, %512 : vector<8x128xf32>
    %515 = arith.addf %509, %514 : vector<8x128xf32>
    %c1_138 = arith.constant 1 : index
    %c11_139 = arith.constant 11 : index
    %516 = memref.load %arg6[%c1_138, %c11_139] : memref<8x28xf32, #tpu.memory_space<smem>>
    %517 = vector.extract_strided_slice %473 {offsets = [3, 0, 0], sizes = [1, 8, 128], strides = [1, 1, 1]} : vector<4x8x128xf32> to vector<1x8x128xf32>
    %518 = vector.shape_cast %517 : vector<1x8x128xf32> to vector<8x128xf32>
    %519 = vector.broadcast %516 : f32 to vector<8x128xf32>
    %520 = arith.mulf %519, %518 : vector<8x128xf32>
    %521 = arith.addf %515, %520 : vector<8x128xf32>
    %c2_140 = arith.constant 2 : index
    %c8_141 = arith.constant 8 : index
    %522 = memref.load %arg6[%c2_140, %c8_141] : memref<8x28xf32, #tpu.memory_space<smem>>
    %523 = vector.extract_strided_slice %473 {offsets = [0, 0, 0], sizes = [1, 8, 128], strides = [1, 1, 1]} : vector<4x8x128xf32> to vector<1x8x128xf32>
    %524 = vector.shape_cast %523 : vector<1x8x128xf32> to vector<8x128xf32>
    %525 = vector.broadcast %522 : f32 to vector<8x128xf32>
    %526 = arith.mulf %525, %524 : vector<8x128xf32>
    %527 = arith.addf %306, %526 : vector<8x128xf32>
    %c2_142 = arith.constant 2 : index
    %c9_143 = arith.constant 9 : index
    %528 = memref.load %arg6[%c2_142, %c9_143] : memref<8x28xf32, #tpu.memory_space<smem>>
    %529 = vector.extract_strided_slice %473 {offsets = [1, 0, 0], sizes = [1, 8, 128], strides = [1, 1, 1]} : vector<4x8x128xf32> to vector<1x8x128xf32>
    %530 = vector.shape_cast %529 : vector<1x8x128xf32> to vector<8x128xf32>
    %531 = vector.broadcast %528 : f32 to vector<8x128xf32>
    %532 = arith.mulf %531, %530 : vector<8x128xf32>
    %533 = arith.addf %527, %532 : vector<8x128xf32>
    %c2_144 = arith.constant 2 : index
    %c10_145 = arith.constant 10 : index
    %534 = memref.load %arg6[%c2_144, %c10_145] : memref<8x28xf32, #tpu.memory_space<smem>>
    %535 = vector.extract_strided_slice %473 {offsets = [2, 0, 0], sizes = [1, 8, 128], strides = [1, 1, 1]} : vector<4x8x128xf32> to vector<1x8x128xf32>
    %536 = vector.shape_cast %535 : vector<1x8x128xf32> to vector<8x128xf32>
    %537 = vector.broadcast %534 : f32 to vector<8x128xf32>
    %538 = arith.mulf %537, %536 : vector<8x128xf32>
    %539 = arith.addf %533, %538 : vector<8x128xf32>
    %c2_146 = arith.constant 2 : index
    %c11_147 = arith.constant 11 : index
    %540 = memref.load %arg6[%c2_146, %c11_147] : memref<8x28xf32, #tpu.memory_space<smem>>
    %541 = vector.extract_strided_slice %473 {offsets = [3, 0, 0], sizes = [1, 8, 128], strides = [1, 1, 1]} : vector<4x8x128xf32> to vector<1x8x128xf32>
    %542 = vector.shape_cast %541 : vector<1x8x128xf32> to vector<8x128xf32>
    %543 = vector.broadcast %540 : f32 to vector<8x128xf32>
    %544 = arith.mulf %543, %542 : vector<8x128xf32>
    %545 = arith.addf %539, %544 : vector<8x128xf32>
    %c3_148 = arith.constant 3 : index
    %c8_149 = arith.constant 8 : index
    %546 = memref.load %arg6[%c3_148, %c8_149] : memref<8x28xf32, #tpu.memory_space<smem>>
    %547 = vector.extract_strided_slice %473 {offsets = [0, 0, 0], sizes = [1, 8, 128], strides = [1, 1, 1]} : vector<4x8x128xf32> to vector<1x8x128xf32>
    %548 = vector.shape_cast %547 : vector<1x8x128xf32> to vector<8x128xf32>
    %549 = vector.broadcast %546 : f32 to vector<8x128xf32>
    %550 = arith.mulf %549, %548 : vector<8x128xf32>
    %551 = arith.addf %330, %550 : vector<8x128xf32>
    %c3_150 = arith.constant 3 : index
    %c9_151 = arith.constant 9 : index
    %552 = memref.load %arg6[%c3_150, %c9_151] : memref<8x28xf32, #tpu.memory_space<smem>>
    %553 = vector.extract_strided_slice %473 {offsets = [1, 0, 0], sizes = [1, 8, 128], strides = [1, 1, 1]} : vector<4x8x128xf32> to vector<1x8x128xf32>
    %554 = vector.shape_cast %553 : vector<1x8x128xf32> to vector<8x128xf32>
    %555 = vector.broadcast %552 : f32 to vector<8x128xf32>
    %556 = arith.mulf %555, %554 : vector<8x128xf32>
    %557 = arith.addf %551, %556 : vector<8x128xf32>
    %c3_152 = arith.constant 3 : index
    %c10_153 = arith.constant 10 : index
    %558 = memref.load %arg6[%c3_152, %c10_153] : memref<8x28xf32, #tpu.memory_space<smem>>
    %559 = vector.extract_strided_slice %473 {offsets = [2, 0, 0], sizes = [1, 8, 128], strides = [1, 1, 1]} : vector<4x8x128xf32> to vector<1x8x128xf32>
    %560 = vector.shape_cast %559 : vector<1x8x128xf32> to vector<8x128xf32>
    %561 = vector.broadcast %558 : f32 to vector<8x128xf32>
    %562 = arith.mulf %561, %560 : vector<8x128xf32>
    %563 = arith.addf %557, %562 : vector<8x128xf32>
    %c3_154 = arith.constant 3 : index
    %c11_155 = arith.constant 11 : index
    %564 = memref.load %arg6[%c3_154, %c11_155] : memref<8x28xf32, #tpu.memory_space<smem>>
    %565 = vector.extract_strided_slice %473 {offsets = [3, 0, 0], sizes = [1, 8, 128], strides = [1, 1, 1]} : vector<4x8x128xf32> to vector<1x8x128xf32>
    %566 = vector.shape_cast %565 : vector<1x8x128xf32> to vector<8x128xf32>
    %567 = vector.broadcast %564 : f32 to vector<8x128xf32>
    %568 = arith.mulf %567, %566 : vector<8x128xf32>
    %569 = arith.addf %563, %568 : vector<8x128xf32>
    %c4_156 = arith.constant 4 : index
    %c8_157 = arith.constant 8 : index
    %570 = memref.load %arg6[%c4_156, %c8_157] : memref<8x28xf32, #tpu.memory_space<smem>>
    %571 = vector.extract_strided_slice %473 {offsets = [0, 0, 0], sizes = [1, 8, 128], strides = [1, 1, 1]} : vector<4x8x128xf32> to vector<1x8x128xf32>
    %572 = vector.shape_cast %571 : vector<1x8x128xf32> to vector<8x128xf32>
    %573 = vector.broadcast %570 : f32 to vector<8x128xf32>
    %574 = arith.mulf %573, %572 : vector<8x128xf32>
    %575 = arith.addf %354, %574 : vector<8x128xf32>
    %c4_158 = arith.constant 4 : index
    %c9_159 = arith.constant 9 : index
    %576 = memref.load %arg6[%c4_158, %c9_159] : memref<8x28xf32, #tpu.memory_space<smem>>
    %577 = vector.extract_strided_slice %473 {offsets = [1, 0, 0], sizes = [1, 8, 128], strides = [1, 1, 1]} : vector<4x8x128xf32> to vector<1x8x128xf32>
    %578 = vector.shape_cast %577 : vector<1x8x128xf32> to vector<8x128xf32>
    %579 = vector.broadcast %576 : f32 to vector<8x128xf32>
    %580 = arith.mulf %579, %578 : vector<8x128xf32>
    %581 = arith.addf %575, %580 : vector<8x128xf32>
    %c4_160 = arith.constant 4 : index
    %c10_161 = arith.constant 10 : index
    %582 = memref.load %arg6[%c4_160, %c10_161] : memref<8x28xf32, #tpu.memory_space<smem>>
    %583 = vector.extract_strided_slice %473 {offsets = [2, 0, 0], sizes = [1, 8, 128], strides = [1, 1, 1]} : vector<4x8x128xf32> to vector<1x8x128xf32>
    %584 = vector.shape_cast %583 : vector<1x8x128xf32> to vector<8x128xf32>
    %585 = vector.broadcast %582 : f32 to vector<8x128xf32>
    %586 = arith.mulf %585, %584 : vector<8x128xf32>
    %587 = arith.addf %581, %586 : vector<8x128xf32>
    %c4_162 = arith.constant 4 : index
    %c11_163 = arith.constant 11 : index
    %588 = memref.load %arg6[%c4_162, %c11_163] : memref<8x28xf32, #tpu.memory_space<smem>>
    %589 = vector.extract_strided_slice %473 {offsets = [3, 0, 0], sizes = [1, 8, 128], strides = [1, 1, 1]} : vector<4x8x128xf32> to vector<1x8x128xf32>
    %590 = vector.shape_cast %589 : vector<1x8x128xf32> to vector<8x128xf32>
    %591 = vector.broadcast %588 : f32 to vector<8x128xf32>
    %592 = arith.mulf %591, %590 : vector<8x128xf32>
    %593 = arith.addf %587, %592 : vector<8x128xf32>
    %c5_164 = arith.constant 5 : index
    %c8_165 = arith.constant 8 : index
    %594 = memref.load %arg6[%c5_164, %c8_165] : memref<8x28xf32, #tpu.memory_space<smem>>
    %595 = vector.extract_strided_slice %473 {offsets = [0, 0, 0], sizes = [1, 8, 128], strides = [1, 1, 1]} : vector<4x8x128xf32> to vector<1x8x128xf32>
    %596 = vector.shape_cast %595 : vector<1x8x128xf32> to vector<8x128xf32>
    %597 = vector.broadcast %594 : f32 to vector<8x128xf32>
    %598 = arith.mulf %597, %596 : vector<8x128xf32>
    %599 = arith.addf %378, %598 : vector<8x128xf32>
    %c5_166 = arith.constant 5 : index
    %c9_167 = arith.constant 9 : index
    %600 = memref.load %arg6[%c5_166, %c9_167] : memref<8x28xf32, #tpu.memory_space<smem>>
    %601 = vector.extract_strided_slice %473 {offsets = [1, 0, 0], sizes = [1, 8, 128], strides = [1, 1, 1]} : vector<4x8x128xf32> to vector<1x8x128xf32>
    %602 = vector.shape_cast %601 : vector<1x8x128xf32> to vector<8x128xf32>
    %603 = vector.broadcast %600 : f32 to vector<8x128xf32>
    %604 = arith.mulf %603, %602 : vector<8x128xf32>
    %605 = arith.addf %599, %604 : vector<8x128xf32>
    %c5_168 = arith.constant 5 : index
    %c10_169 = arith.constant 10 : index
    %606 = memref.load %arg6[%c5_168, %c10_169] : memref<8x28xf32, #tpu.memory_space<smem>>
    %607 = vector.extract_strided_slice %473 {offsets = [2, 0, 0], sizes = [1, 8, 128], strides = [1, 1, 1]} : vector<4x8x128xf32> to vector<1x8x128xf32>
    %608 = vector.shape_cast %607 : vector<1x8x128xf32> to vector<8x128xf32>
    %609 = vector.broadcast %606 : f32 to vector<8x128xf32>
    %610 = arith.mulf %609, %608 : vector<8x128xf32>
    %611 = arith.addf %605, %610 : vector<8x128xf32>
    %c5_170 = arith.constant 5 : index
    %c11_171 = arith.constant 11 : index
    %612 = memref.load %arg6[%c5_170, %c11_171] : memref<8x28xf32, #tpu.memory_space<smem>>
    %613 = vector.extract_strided_slice %473 {offsets = [3, 0, 0], sizes = [1, 8, 128], strides = [1, 1, 1]} : vector<4x8x128xf32> to vector<1x8x128xf32>
    %614 = vector.shape_cast %613 : vector<1x8x128xf32> to vector<8x128xf32>
    %615 = vector.broadcast %612 : f32 to vector<8x128xf32>
    %616 = arith.mulf %615, %614 : vector<8x128xf32>
    %617 = arith.addf %611, %616 : vector<8x128xf32>
    %c6_172 = arith.constant 6 : index
    %c8_173 = arith.constant 8 : index
    %618 = memref.load %arg6[%c6_172, %c8_173] : memref<8x28xf32, #tpu.memory_space<smem>>
    %619 = vector.extract_strided_slice %473 {offsets = [0, 0, 0], sizes = [1, 8, 128], strides = [1, 1, 1]} : vector<4x8x128xf32> to vector<1x8x128xf32>
    %620 = vector.shape_cast %619 : vector<1x8x128xf32> to vector<8x128xf32>
    %621 = vector.broadcast %618 : f32 to vector<8x128xf32>
    %622 = arith.mulf %621, %620 : vector<8x128xf32>
    %623 = arith.addf %402, %622 : vector<8x128xf32>
    %c6_174 = arith.constant 6 : index
    %c9_175 = arith.constant 9 : index
    %624 = memref.load %arg6[%c6_174, %c9_175] : memref<8x28xf32, #tpu.memory_space<smem>>
    %625 = vector.extract_strided_slice %473 {offsets = [1, 0, 0], sizes = [1, 8, 128], strides = [1, 1, 1]} : vector<4x8x128xf32> to vector<1x8x128xf32>
    %626 = vector.shape_cast %625 : vector<1x8x128xf32> to vector<8x128xf32>
    %627 = vector.broadcast %624 : f32 to vector<8x128xf32>
    %628 = arith.mulf %627, %626 : vector<8x128xf32>
    %629 = arith.addf %623, %628 : vector<8x128xf32>
    %c6_176 = arith.constant 6 : index
    %c10_177 = arith.constant 10 : index
    %630 = memref.load %arg6[%c6_176, %c10_177] : memref<8x28xf32, #tpu.memory_space<smem>>
    %631 = vector.extract_strided_slice %473 {offsets = [2, 0, 0], sizes = [1, 8, 128], strides = [1, 1, 1]} : vector<4x8x128xf32> to vector<1x8x128xf32>
    %632 = vector.shape_cast %631 : vector<1x8x128xf32> to vector<8x128xf32>
    %633 = vector.broadcast %630 : f32 to vector<8x128xf32>
    %634 = arith.mulf %633, %632 : vector<8x128xf32>
    %635 = arith.addf %629, %634 : vector<8x128xf32>
    %c6_178 = arith.constant 6 : index
    %c11_179 = arith.constant 11 : index
    %636 = memref.load %arg6[%c6_178, %c11_179] : memref<8x28xf32, #tpu.memory_space<smem>>
    %637 = vector.extract_strided_slice %473 {offsets = [3, 0, 0], sizes = [1, 8, 128], strides = [1, 1, 1]} : vector<4x8x128xf32> to vector<1x8x128xf32>
    %638 = vector.shape_cast %637 : vector<1x8x128xf32> to vector<8x128xf32>
    %639 = vector.broadcast %636 : f32 to vector<8x128xf32>
    %640 = arith.mulf %639, %638 : vector<8x128xf32>
    %641 = arith.addf %635, %640 : vector<8x128xf32>
    %c7_180 = arith.constant 7 : index
    %c8_181 = arith.constant 8 : index
    %642 = memref.load %arg6[%c7_180, %c8_181] : memref<8x28xf32, #tpu.memory_space<smem>>
    %643 = vector.extract_strided_slice %473 {offsets = [0, 0, 0], sizes = [1, 8, 128], strides = [1, 1, 1]} : vector<4x8x128xf32> to vector<1x8x128xf32>
    %644 = vector.shape_cast %643 : vector<1x8x128xf32> to vector<8x128xf32>
    %645 = vector.broadcast %642 : f32 to vector<8x128xf32>
    %646 = arith.mulf %645, %644 : vector<8x128xf32>
    %647 = arith.addf %426, %646 : vector<8x128xf32>
    %c7_182 = arith.constant 7 : index
    %c9_183 = arith.constant 9 : index
    %648 = memref.load %arg6[%c7_182, %c9_183] : memref<8x28xf32, #tpu.memory_space<smem>>
    %649 = vector.extract_strided_slice %473 {offsets = [1, 0, 0], sizes = [1, 8, 128], strides = [1, 1, 1]} : vector<4x8x128xf32> to vector<1x8x128xf32>
    %650 = vector.shape_cast %649 : vector<1x8x128xf32> to vector<8x128xf32>
    %651 = vector.broadcast %648 : f32 to vector<8x128xf32>
    %652 = arith.mulf %651, %650 : vector<8x128xf32>
    %653 = arith.addf %647, %652 : vector<8x128xf32>
    %c7_184 = arith.constant 7 : index
    %c10_185 = arith.constant 10 : index
    %654 = memref.load %arg6[%c7_184, %c10_185] : memref<8x28xf32, #tpu.memory_space<smem>>
    %655 = vector.extract_strided_slice %473 {offsets = [2, 0, 0], sizes = [1, 8, 128], strides = [1, 1, 1]} : vector<4x8x128xf32> to vector<1x8x128xf32>
    %656 = vector.shape_cast %655 : vector<1x8x128xf32> to vector<8x128xf32>
    %657 = vector.broadcast %654 : f32 to vector<8x128xf32>
    %658 = arith.mulf %657, %656 : vector<8x128xf32>
    %659 = arith.addf %653, %658 : vector<8x128xf32>
    %c7_186 = arith.constant 7 : index
    %c11_187 = arith.constant 11 : index
    %660 = memref.load %arg6[%c7_186, %c11_187] : memref<8x28xf32, #tpu.memory_space<smem>>
    %661 = vector.extract_strided_slice %473 {offsets = [3, 0, 0], sizes = [1, 8, 128], strides = [1, 1, 1]} : vector<4x8x128xf32> to vector<1x8x128xf32>
    %662 = vector.shape_cast %661 : vector<1x8x128xf32> to vector<8x128xf32>
    %663 = vector.broadcast %660 : f32 to vector<8x128xf32>
    %664 = arith.mulf %663, %662 : vector<8x128xf32>
    %665 = arith.addf %659, %664 : vector<8x128xf32>
    %c0_188 = arith.constant 0 : index
    %c0_189 = arith.constant 0 : index
    %c0_190 = arith.constant 0 : index
    %c0_191 = arith.constant 0 : index
    %666 = vector.load %arg4[%c0_188, %c0_189, %c0_190, %c0_191] : memref<1x8x8x128xf32, #tpu.memory_space<vmem>>, vector<1x8x8x128xf32>
    %667 = vector.shape_cast %666 : vector<1x8x8x128xf32> to vector<8x8x128xf32>
    %668 = vector.extract_strided_slice %1 {offsets = [0, 0, 0], sizes = [4, 1, 128], strides = [1, 1, 1]} : vector<4x8x128xf32> to vector<4x1x128xf32>
    %669 = vector.extract_strided_slice %667 {offsets = [0, 0, 0], sizes = [1, 8, 128], strides = [1, 1, 1]} : vector<8x8x128xf32> to vector<1x8x128xf32>
    %670 = vector.broadcast %668 : vector<4x1x128xf32> to vector<4x8x128xf32>
    %671 = vector.broadcast %669 : vector<1x8x128xf32> to vector<4x8x128xf32>
    %672 = arith.mulf %670, %671 : vector<4x8x128xf32>
    %673 = vector.extract_strided_slice %1 {offsets = [0, 1, 0], sizes = [4, 1, 128], strides = [1, 1, 1]} : vector<4x8x128xf32> to vector<4x1x128xf32>
    %674 = vector.extract_strided_slice %667 {offsets = [1, 0, 0], sizes = [1, 8, 128], strides = [1, 1, 1]} : vector<8x8x128xf32> to vector<1x8x128xf32>
    %675 = vector.broadcast %673 : vector<4x1x128xf32> to vector<4x8x128xf32>
    %676 = vector.broadcast %674 : vector<1x8x128xf32> to vector<4x8x128xf32>
    %677 = arith.mulf %675, %676 : vector<4x8x128xf32>
    %678 = arith.addf %672, %677 : vector<4x8x128xf32>
    %679 = vector.extract_strided_slice %1 {offsets = [0, 2, 0], sizes = [4, 1, 128], strides = [1, 1, 1]} : vector<4x8x128xf32> to vector<4x1x128xf32>
    %680 = vector.extract_strided_slice %667 {offsets = [2, 0, 0], sizes = [1, 8, 128], strides = [1, 1, 1]} : vector<8x8x128xf32> to vector<1x8x128xf32>
    %681 = vector.broadcast %679 : vector<4x1x128xf32> to vector<4x8x128xf32>
    %682 = vector.broadcast %680 : vector<1x8x128xf32> to vector<4x8x128xf32>
    %683 = arith.mulf %681, %682 : vector<4x8x128xf32>
    %684 = arith.addf %678, %683 : vector<4x8x128xf32>
    %685 = vector.extract_strided_slice %1 {offsets = [0, 3, 0], sizes = [4, 1, 128], strides = [1, 1, 1]} : vector<4x8x128xf32> to vector<4x1x128xf32>
    %686 = vector.extract_strided_slice %667 {offsets = [3, 0, 0], sizes = [1, 8, 128], strides = [1, 1, 1]} : vector<8x8x128xf32> to vector<1x8x128xf32>
    %687 = vector.broadcast %685 : vector<4x1x128xf32> to vector<4x8x128xf32>
    %688 = vector.broadcast %686 : vector<1x8x128xf32> to vector<4x8x128xf32>
    %689 = arith.mulf %687, %688 : vector<4x8x128xf32>
    %690 = arith.addf %684, %689 : vector<4x8x128xf32>
    %691 = vector.extract_strided_slice %1 {offsets = [0, 4, 0], sizes = [4, 1, 128], strides = [1, 1, 1]} : vector<4x8x128xf32> to vector<4x1x128xf32>
    %692 = vector.extract_strided_slice %667 {offsets = [4, 0, 0], sizes = [1, 8, 128], strides = [1, 1, 1]} : vector<8x8x128xf32> to vector<1x8x128xf32>
    %693 = vector.broadcast %691 : vector<4x1x128xf32> to vector<4x8x128xf32>
    %694 = vector.broadcast %692 : vector<1x8x128xf32> to vector<4x8x128xf32>
    %695 = arith.mulf %693, %694 : vector<4x8x128xf32>
    %696 = arith.addf %690, %695 : vector<4x8x128xf32>
    %697 = vector.extract_strided_slice %1 {offsets = [0, 5, 0], sizes = [4, 1, 128], strides = [1, 1, 1]} : vector<4x8x128xf32> to vector<4x1x128xf32>
    %698 = vector.extract_strided_slice %667 {offsets = [5, 0, 0], sizes = [1, 8, 128], strides = [1, 1, 1]} : vector<8x8x128xf32> to vector<1x8x128xf32>
    %699 = vector.broadcast %697 : vector<4x1x128xf32> to vector<4x8x128xf32>
    %700 = vector.broadcast %698 : vector<1x8x128xf32> to vector<4x8x128xf32>
    %701 = arith.mulf %699, %700 : vector<4x8x128xf32>
    %702 = arith.addf %696, %701 : vector<4x8x128xf32>
    %703 = vector.extract_strided_slice %1 {offsets = [0, 6, 0], sizes = [4, 1, 128], strides = [1, 1, 1]} : vector<4x8x128xf32> to vector<4x1x128xf32>
    %704 = vector.extract_strided_slice %667 {offsets = [6, 0, 0], sizes = [1, 8, 128], strides = [1, 1, 1]} : vector<8x8x128xf32> to vector<1x8x128xf32>
    %705 = vector.broadcast %703 : vector<4x1x128xf32> to vector<4x8x128xf32>
    %706 = vector.broadcast %704 : vector<1x8x128xf32> to vector<4x8x128xf32>
    %707 = arith.mulf %705, %706 : vector<4x8x128xf32>
    %708 = arith.addf %702, %707 : vector<4x8x128xf32>
    %709 = vector.extract_strided_slice %1 {offsets = [0, 7, 0], sizes = [4, 1, 128], strides = [1, 1, 1]} : vector<4x8x128xf32> to vector<4x1x128xf32>
    %710 = vector.extract_strided_slice %667 {offsets = [7, 0, 0], sizes = [1, 8, 128], strides = [1, 1, 1]} : vector<8x8x128xf32> to vector<1x8x128xf32>
    %711 = vector.broadcast %709 : vector<4x1x128xf32> to vector<4x8x128xf32>
    %712 = vector.broadcast %710 : vector<1x8x128xf32> to vector<4x8x128xf32>
    %713 = arith.mulf %711, %712 : vector<4x8x128xf32>
    %714 = arith.addf %708, %713 : vector<4x8x128xf32>
    %c0_192 = arith.constant 0 : index
    %c12 = arith.constant 12 : index
    %715 = memref.load %arg6[%c0_192, %c12] : memref<8x28xf32, #tpu.memory_space<smem>>
    %716 = vector.extract_strided_slice %714 {offsets = [0, 0, 0], sizes = [1, 8, 128], strides = [1, 1, 1]} : vector<4x8x128xf32> to vector<1x8x128xf32>
    %717 = vector.shape_cast %716 : vector<1x8x128xf32> to vector<8x128xf32>
    %718 = vector.broadcast %715 : f32 to vector<8x128xf32>
    %719 = arith.mulf %718, %717 : vector<8x128xf32>
    %720 = arith.addf %497, %719 : vector<8x128xf32>
    %c0_193 = arith.constant 0 : index
    %c13 = arith.constant 13 : index
    %721 = memref.load %arg6[%c0_193, %c13] : memref<8x28xf32, #tpu.memory_space<smem>>
    %722 = vector.extract_strided_slice %714 {offsets = [1, 0, 0], sizes = [1, 8, 128], strides = [1, 1, 1]} : vector<4x8x128xf32> to vector<1x8x128xf32>
    %723 = vector.shape_cast %722 : vector<1x8x128xf32> to vector<8x128xf32>
    %724 = vector.broadcast %721 : f32 to vector<8x128xf32>
    %725 = arith.mulf %724, %723 : vector<8x128xf32>
    %726 = arith.addf %720, %725 : vector<8x128xf32>
    %c0_194 = arith.constant 0 : index
    %c14 = arith.constant 14 : index
    %727 = memref.load %arg6[%c0_194, %c14] : memref<8x28xf32, #tpu.memory_space<smem>>
    %728 = vector.extract_strided_slice %714 {offsets = [2, 0, 0], sizes = [1, 8, 128], strides = [1, 1, 1]} : vector<4x8x128xf32> to vector<1x8x128xf32>
    %729 = vector.shape_cast %728 : vector<1x8x128xf32> to vector<8x128xf32>
    %730 = vector.broadcast %727 : f32 to vector<8x128xf32>
    %731 = arith.mulf %730, %729 : vector<8x128xf32>
    %732 = arith.addf %726, %731 : vector<8x128xf32>
    %c0_195 = arith.constant 0 : index
    %c15 = arith.constant 15 : index
    %733 = memref.load %arg6[%c0_195, %c15] : memref<8x28xf32, #tpu.memory_space<smem>>
    %734 = vector.extract_strided_slice %714 {offsets = [3, 0, 0], sizes = [1, 8, 128], strides = [1, 1, 1]} : vector<4x8x128xf32> to vector<1x8x128xf32>
    %735 = vector.shape_cast %734 : vector<1x8x128xf32> to vector<8x128xf32>
    %736 = vector.broadcast %733 : f32 to vector<8x128xf32>
    %737 = arith.mulf %736, %735 : vector<8x128xf32>
    %738 = arith.addf %732, %737 : vector<8x128xf32>
    %c1_196 = arith.constant 1 : index
    %c12_197 = arith.constant 12 : index
    %739 = memref.load %arg6[%c1_196, %c12_197] : memref<8x28xf32, #tpu.memory_space<smem>>
    %740 = vector.extract_strided_slice %714 {offsets = [0, 0, 0], sizes = [1, 8, 128], strides = [1, 1, 1]} : vector<4x8x128xf32> to vector<1x8x128xf32>
    %741 = vector.shape_cast %740 : vector<1x8x128xf32> to vector<8x128xf32>
    %742 = vector.broadcast %739 : f32 to vector<8x128xf32>
    %743 = arith.mulf %742, %741 : vector<8x128xf32>
    %744 = arith.addf %521, %743 : vector<8x128xf32>
    %c1_198 = arith.constant 1 : index
    %c13_199 = arith.constant 13 : index
    %745 = memref.load %arg6[%c1_198, %c13_199] : memref<8x28xf32, #tpu.memory_space<smem>>
    %746 = vector.extract_strided_slice %714 {offsets = [1, 0, 0], sizes = [1, 8, 128], strides = [1, 1, 1]} : vector<4x8x128xf32> to vector<1x8x128xf32>
    %747 = vector.shape_cast %746 : vector<1x8x128xf32> to vector<8x128xf32>
    %748 = vector.broadcast %745 : f32 to vector<8x128xf32>
    %749 = arith.mulf %748, %747 : vector<8x128xf32>
    %750 = arith.addf %744, %749 : vector<8x128xf32>
    %c1_200 = arith.constant 1 : index
    %c14_201 = arith.constant 14 : index
    %751 = memref.load %arg6[%c1_200, %c14_201] : memref<8x28xf32, #tpu.memory_space<smem>>
    %752 = vector.extract_strided_slice %714 {offsets = [2, 0, 0], sizes = [1, 8, 128], strides = [1, 1, 1]} : vector<4x8x128xf32> to vector<1x8x128xf32>
    %753 = vector.shape_cast %752 : vector<1x8x128xf32> to vector<8x128xf32>
    %754 = vector.broadcast %751 : f32 to vector<8x128xf32>
    %755 = arith.mulf %754, %753 : vector<8x128xf32>
    %756 = arith.addf %750, %755 : vector<8x128xf32>
    %c1_202 = arith.constant 1 : index
    %c15_203 = arith.constant 15 : index
    %757 = memref.load %arg6[%c1_202, %c15_203] : memref<8x28xf32, #tpu.memory_space<smem>>
    %758 = vector.extract_strided_slice %714 {offsets = [3, 0, 0], sizes = [1, 8, 128], strides = [1, 1, 1]} : vector<4x8x128xf32> to vector<1x8x128xf32>
    %759 = vector.shape_cast %758 : vector<1x8x128xf32> to vector<8x128xf32>
    %760 = vector.broadcast %757 : f32 to vector<8x128xf32>
    %761 = arith.mulf %760, %759 : vector<8x128xf32>
    %762 = arith.addf %756, %761 : vector<8x128xf32>
    %c2_204 = arith.constant 2 : index
    %c12_205 = arith.constant 12 : index
    %763 = memref.load %arg6[%c2_204, %c12_205] : memref<8x28xf32, #tpu.memory_space<smem>>
    %764 = vector.extract_strided_slice %714 {offsets = [0, 0, 0], sizes = [1, 8, 128], strides = [1, 1, 1]} : vector<4x8x128xf32> to vector<1x8x128xf32>
    %765 = vector.shape_cast %764 : vector<1x8x128xf32> to vector<8x128xf32>
    %766 = vector.broadcast %763 : f32 to vector<8x128xf32>
    %767 = arith.mulf %766, %765 : vector<8x128xf32>
    %768 = arith.addf %545, %767 : vector<8x128xf32>
    %c2_206 = arith.constant 2 : index
    %c13_207 = arith.constant 13 : index
    %769 = memref.load %arg6[%c2_206, %c13_207] : memref<8x28xf32, #tpu.memory_space<smem>>
    %770 = vector.extract_strided_slice %714 {offsets = [1, 0, 0], sizes = [1, 8, 128], strides = [1, 1, 1]} : vector<4x8x128xf32> to vector<1x8x128xf32>
    %771 = vector.shape_cast %770 : vector<1x8x128xf32> to vector<8x128xf32>
    %772 = vector.broadcast %769 : f32 to vector<8x128xf32>
    %773 = arith.mulf %772, %771 : vector<8x128xf32>
    %774 = arith.addf %768, %773 : vector<8x128xf32>
    %c2_208 = arith.constant 2 : index
    %c14_209 = arith.constant 14 : index
    %775 = memref.load %arg6[%c2_208, %c14_209] : memref<8x28xf32, #tpu.memory_space<smem>>
    %776 = vector.extract_strided_slice %714 {offsets = [2, 0, 0], sizes = [1, 8, 128], strides = [1, 1, 1]} : vector<4x8x128xf32> to vector<1x8x128xf32>
    %777 = vector.shape_cast %776 : vector<1x8x128xf32> to vector<8x128xf32>
    %778 = vector.broadcast %775 : f32 to vector<8x128xf32>
    %779 = arith.mulf %778, %777 : vector<8x128xf32>
    %780 = arith.addf %774, %779 : vector<8x128xf32>
    %c2_210 = arith.constant 2 : index
    %c15_211 = arith.constant 15 : index
    %781 = memref.load %arg6[%c2_210, %c15_211] : memref<8x28xf32, #tpu.memory_space<smem>>
    %782 = vector.extract_strided_slice %714 {offsets = [3, 0, 0], sizes = [1, 8, 128], strides = [1, 1, 1]} : vector<4x8x128xf32> to vector<1x8x128xf32>
    %783 = vector.shape_cast %782 : vector<1x8x128xf32> to vector<8x128xf32>
    %784 = vector.broadcast %781 : f32 to vector<8x128xf32>
    %785 = arith.mulf %784, %783 : vector<8x128xf32>
    %786 = arith.addf %780, %785 : vector<8x128xf32>
    %c3_212 = arith.constant 3 : index
    %c12_213 = arith.constant 12 : index
    %787 = memref.load %arg6[%c3_212, %c12_213] : memref<8x28xf32, #tpu.memory_space<smem>>
    %788 = vector.extract_strided_slice %714 {offsets = [0, 0, 0], sizes = [1, 8, 128], strides = [1, 1, 1]} : vector<4x8x128xf32> to vector<1x8x128xf32>
    %789 = vector.shape_cast %788 : vector<1x8x128xf32> to vector<8x128xf32>
    %790 = vector.broadcast %787 : f32 to vector<8x128xf32>
    %791 = arith.mulf %790, %789 : vector<8x128xf32>
    %792 = arith.addf %569, %791 : vector<8x128xf32>
    %c3_214 = arith.constant 3 : index
    %c13_215 = arith.constant 13 : index
    %793 = memref.load %arg6[%c3_214, %c13_215] : memref<8x28xf32, #tpu.memory_space<smem>>
    %794 = vector.extract_strided_slice %714 {offsets = [1, 0, 0], sizes = [1, 8, 128], strides = [1, 1, 1]} : vector<4x8x128xf32> to vector<1x8x128xf32>
    %795 = vector.shape_cast %794 : vector<1x8x128xf32> to vector<8x128xf32>
    %796 = vector.broadcast %793 : f32 to vector<8x128xf32>
    %797 = arith.mulf %796, %795 : vector<8x128xf32>
    %798 = arith.addf %792, %797 : vector<8x128xf32>
    %c3_216 = arith.constant 3 : index
    %c14_217 = arith.constant 14 : index
    %799 = memref.load %arg6[%c3_216, %c14_217] : memref<8x28xf32, #tpu.memory_space<smem>>
    %800 = vector.extract_strided_slice %714 {offsets = [2, 0, 0], sizes = [1, 8, 128], strides = [1, 1, 1]} : vector<4x8x128xf32> to vector<1x8x128xf32>
    %801 = vector.shape_cast %800 : vector<1x8x128xf32> to vector<8x128xf32>
    %802 = vector.broadcast %799 : f32 to vector<8x128xf32>
    %803 = arith.mulf %802, %801 : vector<8x128xf32>
    %804 = arith.addf %798, %803 : vector<8x128xf32>
    %c3_218 = arith.constant 3 : index
    %c15_219 = arith.constant 15 : index
    %805 = memref.load %arg6[%c3_218, %c15_219] : memref<8x28xf32, #tpu.memory_space<smem>>
    %806 = vector.extract_strided_slice %714 {offsets = [3, 0, 0], sizes = [1, 8, 128], strides = [1, 1, 1]} : vector<4x8x128xf32> to vector<1x8x128xf32>
    %807 = vector.shape_cast %806 : vector<1x8x128xf32> to vector<8x128xf32>
    %808 = vector.broadcast %805 : f32 to vector<8x128xf32>
    %809 = arith.mulf %808, %807 : vector<8x128xf32>
    %810 = arith.addf %804, %809 : vector<8x128xf32>
    %c4_220 = arith.constant 4 : index
    %c12_221 = arith.constant 12 : index
    %811 = memref.load %arg6[%c4_220, %c12_221] : memref<8x28xf32, #tpu.memory_space<smem>>
    %812 = vector.extract_strided_slice %714 {offsets = [0, 0, 0], sizes = [1, 8, 128], strides = [1, 1, 1]} : vector<4x8x128xf32> to vector<1x8x128xf32>
    %813 = vector.shape_cast %812 : vector<1x8x128xf32> to vector<8x128xf32>
    %814 = vector.broadcast %811 : f32 to vector<8x128xf32>
    %815 = arith.mulf %814, %813 : vector<8x128xf32>
    %816 = arith.addf %593, %815 : vector<8x128xf32>
    %c4_222 = arith.constant 4 : index
    %c13_223 = arith.constant 13 : index
    %817 = memref.load %arg6[%c4_222, %c13_223] : memref<8x28xf32, #tpu.memory_space<smem>>
    %818 = vector.extract_strided_slice %714 {offsets = [1, 0, 0], sizes = [1, 8, 128], strides = [1, 1, 1]} : vector<4x8x128xf32> to vector<1x8x128xf32>
    %819 = vector.shape_cast %818 : vector<1x8x128xf32> to vector<8x128xf32>
    %820 = vector.broadcast %817 : f32 to vector<8x128xf32>
    %821 = arith.mulf %820, %819 : vector<8x128xf32>
    %822 = arith.addf %816, %821 : vector<8x128xf32>
    %c4_224 = arith.constant 4 : index
    %c14_225 = arith.constant 14 : index
    %823 = memref.load %arg6[%c4_224, %c14_225] : memref<8x28xf32, #tpu.memory_space<smem>>
    %824 = vector.extract_strided_slice %714 {offsets = [2, 0, 0], sizes = [1, 8, 128], strides = [1, 1, 1]} : vector<4x8x128xf32> to vector<1x8x128xf32>
    %825 = vector.shape_cast %824 : vector<1x8x128xf32> to vector<8x128xf32>
    %826 = vector.broadcast %823 : f32 to vector<8x128xf32>
    %827 = arith.mulf %826, %825 : vector<8x128xf32>
    %828 = arith.addf %822, %827 : vector<8x128xf32>
    %c4_226 = arith.constant 4 : index
    %c15_227 = arith.constant 15 : index
    %829 = memref.load %arg6[%c4_226, %c15_227] : memref<8x28xf32, #tpu.memory_space<smem>>
    %830 = vector.extract_strided_slice %714 {offsets = [3, 0, 0], sizes = [1, 8, 128], strides = [1, 1, 1]} : vector<4x8x128xf32> to vector<1x8x128xf32>
    %831 = vector.shape_cast %830 : vector<1x8x128xf32> to vector<8x128xf32>
    %832 = vector.broadcast %829 : f32 to vector<8x128xf32>
    %833 = arith.mulf %832, %831 : vector<8x128xf32>
    %834 = arith.addf %828, %833 : vector<8x128xf32>
    %c5_228 = arith.constant 5 : index
    %c12_229 = arith.constant 12 : index
    %835 = memref.load %arg6[%c5_228, %c12_229] : memref<8x28xf32, #tpu.memory_space<smem>>
    %836 = vector.extract_strided_slice %714 {offsets = [0, 0, 0], sizes = [1, 8, 128], strides = [1, 1, 1]} : vector<4x8x128xf32> to vector<1x8x128xf32>
    %837 = vector.shape_cast %836 : vector<1x8x128xf32> to vector<8x128xf32>
    %838 = vector.broadcast %835 : f32 to vector<8x128xf32>
    %839 = arith.mulf %838, %837 : vector<8x128xf32>
    %840 = arith.addf %617, %839 : vector<8x128xf32>
    %c5_230 = arith.constant 5 : index
    %c13_231 = arith.constant 13 : index
    %841 = memref.load %arg6[%c5_230, %c13_231] : memref<8x28xf32, #tpu.memory_space<smem>>
    %842 = vector.extract_strided_slice %714 {offsets = [1, 0, 0], sizes = [1, 8, 128], strides = [1, 1, 1]} : vector<4x8x128xf32> to vector<1x8x128xf32>
    %843 = vector.shape_cast %842 : vector<1x8x128xf32> to vector<8x128xf32>
    %844 = vector.broadcast %841 : f32 to vector<8x128xf32>
    %845 = arith.mulf %844, %843 : vector<8x128xf32>
    %846 = arith.addf %840, %845 : vector<8x128xf32>
    %c5_232 = arith.constant 5 : index
    %c14_233 = arith.constant 14 : index
    %847 = memref.load %arg6[%c5_232, %c14_233] : memref<8x28xf32, #tpu.memory_space<smem>>
    %848 = vector.extract_strided_slice %714 {offsets = [2, 0, 0], sizes = [1, 8, 128], strides = [1, 1, 1]} : vector<4x8x128xf32> to vector<1x8x128xf32>
    %849 = vector.shape_cast %848 : vector<1x8x128xf32> to vector<8x128xf32>
    %850 = vector.broadcast %847 : f32 to vector<8x128xf32>
    %851 = arith.mulf %850, %849 : vector<8x128xf32>
    %852 = arith.addf %846, %851 : vector<8x128xf32>
    %c5_234 = arith.constant 5 : index
    %c15_235 = arith.constant 15 : index
    %853 = memref.load %arg6[%c5_234, %c15_235] : memref<8x28xf32, #tpu.memory_space<smem>>
    %854 = vector.extract_strided_slice %714 {offsets = [3, 0, 0], sizes = [1, 8, 128], strides = [1, 1, 1]} : vector<4x8x128xf32> to vector<1x8x128xf32>
    %855 = vector.shape_cast %854 : vector<1x8x128xf32> to vector<8x128xf32>
    %856 = vector.broadcast %853 : f32 to vector<8x128xf32>
    %857 = arith.mulf %856, %855 : vector<8x128xf32>
    %858 = arith.addf %852, %857 : vector<8x128xf32>
    %c6_236 = arith.constant 6 : index
    %c12_237 = arith.constant 12 : index
    %859 = memref.load %arg6[%c6_236, %c12_237] : memref<8x28xf32, #tpu.memory_space<smem>>
    %860 = vector.extract_strided_slice %714 {offsets = [0, 0, 0], sizes = [1, 8, 128], strides = [1, 1, 1]} : vector<4x8x128xf32> to vector<1x8x128xf32>
    %861 = vector.shape_cast %860 : vector<1x8x128xf32> to vector<8x128xf32>
    %862 = vector.broadcast %859 : f32 to vector<8x128xf32>
    %863 = arith.mulf %862, %861 : vector<8x128xf32>
    %864 = arith.addf %641, %863 : vector<8x128xf32>
    %c6_238 = arith.constant 6 : index
    %c13_239 = arith.constant 13 : index
    %865 = memref.load %arg6[%c6_238, %c13_239] : memref<8x28xf32, #tpu.memory_space<smem>>
    %866 = vector.extract_strided_slice %714 {offsets = [1, 0, 0], sizes = [1, 8, 128], strides = [1, 1, 1]} : vector<4x8x128xf32> to vector<1x8x128xf32>
    %867 = vector.shape_cast %866 : vector<1x8x128xf32> to vector<8x128xf32>
    %868 = vector.broadcast %865 : f32 to vector<8x128xf32>
    %869 = arith.mulf %868, %867 : vector<8x128xf32>
    %870 = arith.addf %864, %869 : vector<8x128xf32>
    %c6_240 = arith.constant 6 : index
    %c14_241 = arith.constant 14 : index
    %871 = memref.load %arg6[%c6_240, %c14_241] : memref<8x28xf32, #tpu.memory_space<smem>>
    %872 = vector.extract_strided_slice %714 {offsets = [2, 0, 0], sizes = [1, 8, 128], strides = [1, 1, 1]} : vector<4x8x128xf32> to vector<1x8x128xf32>
    %873 = vector.shape_cast %872 : vector<1x8x128xf32> to vector<8x128xf32>
    %874 = vector.broadcast %871 : f32 to vector<8x128xf32>
    %875 = arith.mulf %874, %873 : vector<8x128xf32>
    %876 = arith.addf %870, %875 : vector<8x128xf32>
    %c6_242 = arith.constant 6 : index
    %c15_243 = arith.constant 15 : index
    %877 = memref.load %arg6[%c6_242, %c15_243] : memref<8x28xf32, #tpu.memory_space<smem>>
    %878 = vector.extract_strided_slice %714 {offsets = [3, 0, 0], sizes = [1, 8, 128], strides = [1, 1, 1]} : vector<4x8x128xf32> to vector<1x8x128xf32>
    %879 = vector.shape_cast %878 : vector<1x8x128xf32> to vector<8x128xf32>
    %880 = vector.broadcast %877 : f32 to vector<8x128xf32>
    %881 = arith.mulf %880, %879 : vector<8x128xf32>
    %882 = arith.addf %876, %881 : vector<8x128xf32>
    %c7_244 = arith.constant 7 : index
    %c12_245 = arith.constant 12 : index
    %883 = memref.load %arg6[%c7_244, %c12_245] : memref<8x28xf32, #tpu.memory_space<smem>>
    %884 = vector.extract_strided_slice %714 {offsets = [0, 0, 0], sizes = [1, 8, 128], strides = [1, 1, 1]} : vector<4x8x128xf32> to vector<1x8x128xf32>
    %885 = vector.shape_cast %884 : vector<1x8x128xf32> to vector<8x128xf32>
    %886 = vector.broadcast %883 : f32 to vector<8x128xf32>
    %887 = arith.mulf %886, %885 : vector<8x128xf32>
    %888 = arith.addf %665, %887 : vector<8x128xf32>
    %c7_246 = arith.constant 7 : index
    %c13_247 = arith.constant 13 : index
    %889 = memref.load %arg6[%c7_246, %c13_247] : memref<8x28xf32, #tpu.memory_space<smem>>
    %890 = vector.extract_strided_slice %714 {offsets = [1, 0, 0], sizes = [1, 8, 128], strides = [1, 1, 1]} : vector<4x8x128xf32> to vector<1x8x128xf32>
    %891 = vector.shape_cast %890 : vector<1x8x128xf32> to vector<8x128xf32>
    %892 = vector.broadcast %889 : f32 to vector<8x128xf32>
    %893 = arith.mulf %892, %891 : vector<8x128xf32>
    %894 = arith.addf %888, %893 : vector<8x128xf32>
    %c7_248 = arith.constant 7 : index
    %c14_249 = arith.constant 14 : index
    %895 = memref.load %arg6[%c7_248, %c14_249] : memref<8x28xf32, #tpu.memory_space<smem>>
    %896 = vector.extract_strided_slice %714 {offsets = [2, 0, 0], sizes = [1, 8, 128], strides = [1, 1, 1]} : vector<4x8x128xf32> to vector<1x8x128xf32>
    %897 = vector.shape_cast %896 : vector<1x8x128xf32> to vector<8x128xf32>
    %898 = vector.broadcast %895 : f32 to vector<8x128xf32>
    %899 = arith.mulf %898, %897 : vector<8x128xf32>
    %900 = arith.addf %894, %899 : vector<8x128xf32>
    %c7_250 = arith.constant 7 : index
    %c15_251 = arith.constant 15 : index
    %901 = memref.load %arg6[%c7_250, %c15_251] : memref<8x28xf32, #tpu.memory_space<smem>>
    %902 = vector.extract_strided_slice %714 {offsets = [3, 0, 0], sizes = [1, 8, 128], strides = [1, 1, 1]} : vector<4x8x128xf32> to vector<1x8x128xf32>
    %903 = vector.shape_cast %902 : vector<1x8x128xf32> to vector<8x128xf32>
    %904 = vector.broadcast %901 : f32 to vector<8x128xf32>
    %905 = arith.mulf %904, %903 : vector<8x128xf32>
    %906 = arith.addf %900, %905 : vector<8x128xf32>
    %907 = vector.extract_strided_slice %714 {offsets = [0, 0, 0], sizes = [4, 1, 128], strides = [1, 1, 1]} : vector<4x8x128xf32> to vector<4x1x128xf32>
    %908 = vector.extract_strided_slice %667 {offsets = [0, 0, 0], sizes = [1, 8, 128], strides = [1, 1, 1]} : vector<8x8x128xf32> to vector<1x8x128xf32>
    %909 = vector.broadcast %907 : vector<4x1x128xf32> to vector<4x8x128xf32>
    %910 = vector.broadcast %908 : vector<1x8x128xf32> to vector<4x8x128xf32>
    %911 = arith.mulf %909, %910 : vector<4x8x128xf32>
    %912 = vector.extract_strided_slice %714 {offsets = [0, 1, 0], sizes = [4, 1, 128], strides = [1, 1, 1]} : vector<4x8x128xf32> to vector<4x1x128xf32>
    %913 = vector.extract_strided_slice %667 {offsets = [1, 0, 0], sizes = [1, 8, 128], strides = [1, 1, 1]} : vector<8x8x128xf32> to vector<1x8x128xf32>
    %914 = vector.broadcast %912 : vector<4x1x128xf32> to vector<4x8x128xf32>
    %915 = vector.broadcast %913 : vector<1x8x128xf32> to vector<4x8x128xf32>
    %916 = arith.mulf %914, %915 : vector<4x8x128xf32>
    %917 = arith.addf %911, %916 : vector<4x8x128xf32>
    %918 = vector.extract_strided_slice %714 {offsets = [0, 2, 0], sizes = [4, 1, 128], strides = [1, 1, 1]} : vector<4x8x128xf32> to vector<4x1x128xf32>
    %919 = vector.extract_strided_slice %667 {offsets = [2, 0, 0], sizes = [1, 8, 128], strides = [1, 1, 1]} : vector<8x8x128xf32> to vector<1x8x128xf32>
    %920 = vector.broadcast %918 : vector<4x1x128xf32> to vector<4x8x128xf32>
    %921 = vector.broadcast %919 : vector<1x8x128xf32> to vector<4x8x128xf32>
    %922 = arith.mulf %920, %921 : vector<4x8x128xf32>
    %923 = arith.addf %917, %922 : vector<4x8x128xf32>
    %924 = vector.extract_strided_slice %714 {offsets = [0, 3, 0], sizes = [4, 1, 128], strides = [1, 1, 1]} : vector<4x8x128xf32> to vector<4x1x128xf32>
    %925 = vector.extract_strided_slice %667 {offsets = [3, 0, 0], sizes = [1, 8, 128], strides = [1, 1, 1]} : vector<8x8x128xf32> to vector<1x8x128xf32>
    %926 = vector.broadcast %924 : vector<4x1x128xf32> to vector<4x8x128xf32>
    %927 = vector.broadcast %925 : vector<1x8x128xf32> to vector<4x8x128xf32>
    %928 = arith.mulf %926, %927 : vector<4x8x128xf32>
    %929 = arith.addf %923, %928 : vector<4x8x128xf32>
    %930 = vector.extract_strided_slice %714 {offsets = [0, 4, 0], sizes = [4, 1, 128], strides = [1, 1, 1]} : vector<4x8x128xf32> to vector<4x1x128xf32>
    %931 = vector.extract_strided_slice %667 {offsets = [4, 0, 0], sizes = [1, 8, 128], strides = [1, 1, 1]} : vector<8x8x128xf32> to vector<1x8x128xf32>
    %932 = vector.broadcast %930 : vector<4x1x128xf32> to vector<4x8x128xf32>
    %933 = vector.broadcast %931 : vector<1x8x128xf32> to vector<4x8x128xf32>
    %934 = arith.mulf %932, %933 : vector<4x8x128xf32>
    %935 = arith.addf %929, %934 : vector<4x8x128xf32>
    %936 = vector.extract_strided_slice %714 {offsets = [0, 5, 0], sizes = [4, 1, 128], strides = [1, 1, 1]} : vector<4x8x128xf32> to vector<4x1x128xf32>
    %937 = vector.extract_strided_slice %667 {offsets = [5, 0, 0], sizes = [1, 8, 128], strides = [1, 1, 1]} : vector<8x8x128xf32> to vector<1x8x128xf32>
    %938 = vector.broadcast %936 : vector<4x1x128xf32> to vector<4x8x128xf32>
    %939 = vector.broadcast %937 : vector<1x8x128xf32> to vector<4x8x128xf32>
    %940 = arith.mulf %938, %939 : vector<4x8x128xf32>
    %941 = arith.addf %935, %940 : vector<4x8x128xf32>
    %942 = vector.extract_strided_slice %714 {offsets = [0, 6, 0], sizes = [4, 1, 128], strides = [1, 1, 1]} : vector<4x8x128xf32> to vector<4x1x128xf32>
    %943 = vector.extract_strided_slice %667 {offsets = [6, 0, 0], sizes = [1, 8, 128], strides = [1, 1, 1]} : vector<8x8x128xf32> to vector<1x8x128xf32>
    %944 = vector.broadcast %942 : vector<4x1x128xf32> to vector<4x8x128xf32>
    %945 = vector.broadcast %943 : vector<1x8x128xf32> to vector<4x8x128xf32>
    %946 = arith.mulf %944, %945 : vector<4x8x128xf32>
    %947 = arith.addf %941, %946 : vector<4x8x128xf32>
    %948 = vector.extract_strided_slice %714 {offsets = [0, 7, 0], sizes = [4, 1, 128], strides = [1, 1, 1]} : vector<4x8x128xf32> to vector<4x1x128xf32>
    %949 = vector.extract_strided_slice %667 {offsets = [7, 0, 0], sizes = [1, 8, 128], strides = [1, 1, 1]} : vector<8x8x128xf32> to vector<1x8x128xf32>
    %950 = vector.broadcast %948 : vector<4x1x128xf32> to vector<4x8x128xf32>
    %951 = vector.broadcast %949 : vector<1x8x128xf32> to vector<4x8x128xf32>
    %952 = arith.mulf %950, %951 : vector<4x8x128xf32>
    %953 = arith.addf %947, %952 : vector<4x8x128xf32>
    %c0_252 = arith.constant 0 : index
    %c16 = arith.constant 16 : index
    %954 = memref.load %arg6[%c0_252, %c16] : memref<8x28xf32, #tpu.memory_space<smem>>
    %955 = vector.extract_strided_slice %953 {offsets = [0, 0, 0], sizes = [1, 8, 128], strides = [1, 1, 1]} : vector<4x8x128xf32> to vector<1x8x128xf32>
    %956 = vector.shape_cast %955 : vector<1x8x128xf32> to vector<8x128xf32>
    %957 = vector.broadcast %954 : f32 to vector<8x128xf32>
    %958 = arith.mulf %957, %956 : vector<8x128xf32>
    %959 = arith.addf %738, %958 : vector<8x128xf32>
    %c0_253 = arith.constant 0 : index
    %c17 = arith.constant 17 : index
    %960 = memref.load %arg6[%c0_253, %c17] : memref<8x28xf32, #tpu.memory_space<smem>>
    %961 = vector.extract_strided_slice %953 {offsets = [1, 0, 0], sizes = [1, 8, 128], strides = [1, 1, 1]} : vector<4x8x128xf32> to vector<1x8x128xf32>
    %962 = vector.shape_cast %961 : vector<1x8x128xf32> to vector<8x128xf32>
    %963 = vector.broadcast %960 : f32 to vector<8x128xf32>
    %964 = arith.mulf %963, %962 : vector<8x128xf32>
    %965 = arith.addf %959, %964 : vector<8x128xf32>
    %c0_254 = arith.constant 0 : index
    %c18 = arith.constant 18 : index
    %966 = memref.load %arg6[%c0_254, %c18] : memref<8x28xf32, #tpu.memory_space<smem>>
    %967 = vector.extract_strided_slice %953 {offsets = [2, 0, 0], sizes = [1, 8, 128], strides = [1, 1, 1]} : vector<4x8x128xf32> to vector<1x8x128xf32>
    %968 = vector.shape_cast %967 : vector<1x8x128xf32> to vector<8x128xf32>
    %969 = vector.broadcast %966 : f32 to vector<8x128xf32>
    %970 = arith.mulf %969, %968 : vector<8x128xf32>
    %971 = arith.addf %965, %970 : vector<8x128xf32>
    %c0_255 = arith.constant 0 : index
    %c19 = arith.constant 19 : index
    %972 = memref.load %arg6[%c0_255, %c19] : memref<8x28xf32, #tpu.memory_space<smem>>
    %973 = vector.extract_strided_slice %953 {offsets = [3, 0, 0], sizes = [1, 8, 128], strides = [1, 1, 1]} : vector<4x8x128xf32> to vector<1x8x128xf32>
    %974 = vector.shape_cast %973 : vector<1x8x128xf32> to vector<8x128xf32>
    %975 = vector.broadcast %972 : f32 to vector<8x128xf32>
    %976 = arith.mulf %975, %974 : vector<8x128xf32>
    %977 = arith.addf %971, %976 : vector<8x128xf32>
    %c1_256 = arith.constant 1 : index
    %c16_257 = arith.constant 16 : index
    %978 = memref.load %arg6[%c1_256, %c16_257] : memref<8x28xf32, #tpu.memory_space<smem>>
    %979 = vector.extract_strided_slice %953 {offsets = [0, 0, 0], sizes = [1, 8, 128], strides = [1, 1, 1]} : vector<4x8x128xf32> to vector<1x8x128xf32>
    %980 = vector.shape_cast %979 : vector<1x8x128xf32> to vector<8x128xf32>
    %981 = vector.broadcast %978 : f32 to vector<8x128xf32>
    %982 = arith.mulf %981, %980 : vector<8x128xf32>
    %983 = arith.addf %762, %982 : vector<8x128xf32>
    %c1_258 = arith.constant 1 : index
    %c17_259 = arith.constant 17 : index
    %984 = memref.load %arg6[%c1_258, %c17_259] : memref<8x28xf32, #tpu.memory_space<smem>>
    %985 = vector.extract_strided_slice %953 {offsets = [1, 0, 0], sizes = [1, 8, 128], strides = [1, 1, 1]} : vector<4x8x128xf32> to vector<1x8x128xf32>
    %986 = vector.shape_cast %985 : vector<1x8x128xf32> to vector<8x128xf32>
    %987 = vector.broadcast %984 : f32 to vector<8x128xf32>
    %988 = arith.mulf %987, %986 : vector<8x128xf32>
    %989 = arith.addf %983, %988 : vector<8x128xf32>
    %c1_260 = arith.constant 1 : index
    %c18_261 = arith.constant 18 : index
    %990 = memref.load %arg6[%c1_260, %c18_261] : memref<8x28xf32, #tpu.memory_space<smem>>
    %991 = vector.extract_strided_slice %953 {offsets = [2, 0, 0], sizes = [1, 8, 128], strides = [1, 1, 1]} : vector<4x8x128xf32> to vector<1x8x128xf32>
    %992 = vector.shape_cast %991 : vector<1x8x128xf32> to vector<8x128xf32>
    %993 = vector.broadcast %990 : f32 to vector<8x128xf32>
    %994 = arith.mulf %993, %992 : vector<8x128xf32>
    %995 = arith.addf %989, %994 : vector<8x128xf32>
    %c1_262 = arith.constant 1 : index
    %c19_263 = arith.constant 19 : index
    %996 = memref.load %arg6[%c1_262, %c19_263] : memref<8x28xf32, #tpu.memory_space<smem>>
    %997 = vector.extract_strided_slice %953 {offsets = [3, 0, 0], sizes = [1, 8, 128], strides = [1, 1, 1]} : vector<4x8x128xf32> to vector<1x8x128xf32>
    %998 = vector.shape_cast %997 : vector<1x8x128xf32> to vector<8x128xf32>
    %999 = vector.broadcast %996 : f32 to vector<8x128xf32>
    %1000 = arith.mulf %999, %998 : vector<8x128xf32>
    %1001 = arith.addf %995, %1000 : vector<8x128xf32>
    %c2_264 = arith.constant 2 : index
    %c16_265 = arith.constant 16 : index
    %1002 = memref.load %arg6[%c2_264, %c16_265] : memref<8x28xf32, #tpu.memory_space<smem>>
    %1003 = vector.extract_strided_slice %953 {offsets = [0, 0, 0], sizes = [1, 8, 128], strides = [1, 1, 1]} : vector<4x8x128xf32> to vector<1x8x128xf32>
    %1004 = vector.shape_cast %1003 : vector<1x8x128xf32> to vector<8x128xf32>
    %1005 = vector.broadcast %1002 : f32 to vector<8x128xf32>
    %1006 = arith.mulf %1005, %1004 : vector<8x128xf32>
    %1007 = arith.addf %786, %1006 : vector<8x128xf32>
    %c2_266 = arith.constant 2 : index
    %c17_267 = arith.constant 17 : index
    %1008 = memref.load %arg6[%c2_266, %c17_267] : memref<8x28xf32, #tpu.memory_space<smem>>
    %1009 = vector.extract_strided_slice %953 {offsets = [1, 0, 0], sizes = [1, 8, 128], strides = [1, 1, 1]} : vector<4x8x128xf32> to vector<1x8x128xf32>
    %1010 = vector.shape_cast %1009 : vector<1x8x128xf32> to vector<8x128xf32>
    %1011 = vector.broadcast %1008 : f32 to vector<8x128xf32>
    %1012 = arith.mulf %1011, %1010 : vector<8x128xf32>
    %1013 = arith.addf %1007, %1012 : vector<8x128xf32>
    %c2_268 = arith.constant 2 : index
    %c18_269 = arith.constant 18 : index
    %1014 = memref.load %arg6[%c2_268, %c18_269] : memref<8x28xf32, #tpu.memory_space<smem>>
    %1015 = vector.extract_strided_slice %953 {offsets = [2, 0, 0], sizes = [1, 8, 128], strides = [1, 1, 1]} : vector<4x8x128xf32> to vector<1x8x128xf32>
    %1016 = vector.shape_cast %1015 : vector<1x8x128xf32> to vector<8x128xf32>
    %1017 = vector.broadcast %1014 : f32 to vector<8x128xf32>
    %1018 = arith.mulf %1017, %1016 : vector<8x128xf32>
    %1019 = arith.addf %1013, %1018 : vector<8x128xf32>
    %c2_270 = arith.constant 2 : index
    %c19_271 = arith.constant 19 : index
    %1020 = memref.load %arg6[%c2_270, %c19_271] : memref<8x28xf32, #tpu.memory_space<smem>>
    %1021 = vector.extract_strided_slice %953 {offsets = [3, 0, 0], sizes = [1, 8, 128], strides = [1, 1, 1]} : vector<4x8x128xf32> to vector<1x8x128xf32>
    %1022 = vector.shape_cast %1021 : vector<1x8x128xf32> to vector<8x128xf32>
    %1023 = vector.broadcast %1020 : f32 to vector<8x128xf32>
    %1024 = arith.mulf %1023, %1022 : vector<8x128xf32>
    %1025 = arith.addf %1019, %1024 : vector<8x128xf32>
    %c3_272 = arith.constant 3 : index
    %c16_273 = arith.constant 16 : index
    %1026 = memref.load %arg6[%c3_272, %c16_273] : memref<8x28xf32, #tpu.memory_space<smem>>
    %1027 = vector.extract_strided_slice %953 {offsets = [0, 0, 0], sizes = [1, 8, 128], strides = [1, 1, 1]} : vector<4x8x128xf32> to vector<1x8x128xf32>
    %1028 = vector.shape_cast %1027 : vector<1x8x128xf32> to vector<8x128xf32>
    %1029 = vector.broadcast %1026 : f32 to vector<8x128xf32>
    %1030 = arith.mulf %1029, %1028 : vector<8x128xf32>
    %1031 = arith.addf %810, %1030 : vector<8x128xf32>
    %c3_274 = arith.constant 3 : index
    %c17_275 = arith.constant 17 : index
    %1032 = memref.load %arg6[%c3_274, %c17_275] : memref<8x28xf32, #tpu.memory_space<smem>>
    %1033 = vector.extract_strided_slice %953 {offsets = [1, 0, 0], sizes = [1, 8, 128], strides = [1, 1, 1]} : vector<4x8x128xf32> to vector<1x8x128xf32>
    %1034 = vector.shape_cast %1033 : vector<1x8x128xf32> to vector<8x128xf32>
    %1035 = vector.broadcast %1032 : f32 to vector<8x128xf32>
    %1036 = arith.mulf %1035, %1034 : vector<8x128xf32>
    %1037 = arith.addf %1031, %1036 : vector<8x128xf32>
    %c3_276 = arith.constant 3 : index
    %c18_277 = arith.constant 18 : index
    %1038 = memref.load %arg6[%c3_276, %c18_277] : memref<8x28xf32, #tpu.memory_space<smem>>
    %1039 = vector.extract_strided_slice %953 {offsets = [2, 0, 0], sizes = [1, 8, 128], strides = [1, 1, 1]} : vector<4x8x128xf32> to vector<1x8x128xf32>
    %1040 = vector.shape_cast %1039 : vector<1x8x128xf32> to vector<8x128xf32>
    %1041 = vector.broadcast %1038 : f32 to vector<8x128xf32>
    %1042 = arith.mulf %1041, %1040 : vector<8x128xf32>
    %1043 = arith.addf %1037, %1042 : vector<8x128xf32>
    %c3_278 = arith.constant 3 : index
    %c19_279 = arith.constant 19 : index
    %1044 = memref.load %arg6[%c3_278, %c19_279] : memref<8x28xf32, #tpu.memory_space<smem>>
    %1045 = vector.extract_strided_slice %953 {offsets = [3, 0, 0], sizes = [1, 8, 128], strides = [1, 1, 1]} : vector<4x8x128xf32> to vector<1x8x128xf32>
    %1046 = vector.shape_cast %1045 : vector<1x8x128xf32> to vector<8x128xf32>
    %1047 = vector.broadcast %1044 : f32 to vector<8x128xf32>
    %1048 = arith.mulf %1047, %1046 : vector<8x128xf32>
    %1049 = arith.addf %1043, %1048 : vector<8x128xf32>
    %c4_280 = arith.constant 4 : index
    %c16_281 = arith.constant 16 : index
    %1050 = memref.load %arg6[%c4_280, %c16_281] : memref<8x28xf32, #tpu.memory_space<smem>>
    %1051 = vector.extract_strided_slice %953 {offsets = [0, 0, 0], sizes = [1, 8, 128], strides = [1, 1, 1]} : vector<4x8x128xf32> to vector<1x8x128xf32>
    %1052 = vector.shape_cast %1051 : vector<1x8x128xf32> to vector<8x128xf32>
    %1053 = vector.broadcast %1050 : f32 to vector<8x128xf32>
    %1054 = arith.mulf %1053, %1052 : vector<8x128xf32>
    %1055 = arith.addf %834, %1054 : vector<8x128xf32>
    %c4_282 = arith.constant 4 : index
    %c17_283 = arith.constant 17 : index
    %1056 = memref.load %arg6[%c4_282, %c17_283] : memref<8x28xf32, #tpu.memory_space<smem>>
    %1057 = vector.extract_strided_slice %953 {offsets = [1, 0, 0], sizes = [1, 8, 128], strides = [1, 1, 1]} : vector<4x8x128xf32> to vector<1x8x128xf32>
    %1058 = vector.shape_cast %1057 : vector<1x8x128xf32> to vector<8x128xf32>
    %1059 = vector.broadcast %1056 : f32 to vector<8x128xf32>
    %1060 = arith.mulf %1059, %1058 : vector<8x128xf32>
    %1061 = arith.addf %1055, %1060 : vector<8x128xf32>
    %c4_284 = arith.constant 4 : index
    %c18_285 = arith.constant 18 : index
    %1062 = memref.load %arg6[%c4_284, %c18_285] : memref<8x28xf32, #tpu.memory_space<smem>>
    %1063 = vector.extract_strided_slice %953 {offsets = [2, 0, 0], sizes = [1, 8, 128], strides = [1, 1, 1]} : vector<4x8x128xf32> to vector<1x8x128xf32>
    %1064 = vector.shape_cast %1063 : vector<1x8x128xf32> to vector<8x128xf32>
    %1065 = vector.broadcast %1062 : f32 to vector<8x128xf32>
    %1066 = arith.mulf %1065, %1064 : vector<8x128xf32>
    %1067 = arith.addf %1061, %1066 : vector<8x128xf32>
    %c4_286 = arith.constant 4 : index
    %c19_287 = arith.constant 19 : index
    %1068 = memref.load %arg6[%c4_286, %c19_287] : memref<8x28xf32, #tpu.memory_space<smem>>
    %1069 = vector.extract_strided_slice %953 {offsets = [3, 0, 0], sizes = [1, 8, 128], strides = [1, 1, 1]} : vector<4x8x128xf32> to vector<1x8x128xf32>
    %1070 = vector.shape_cast %1069 : vector<1x8x128xf32> to vector<8x128xf32>
    %1071 = vector.broadcast %1068 : f32 to vector<8x128xf32>
    %1072 = arith.mulf %1071, %1070 : vector<8x128xf32>
    %1073 = arith.addf %1067, %1072 : vector<8x128xf32>
    %c5_288 = arith.constant 5 : index
    %c16_289 = arith.constant 16 : index
    %1074 = memref.load %arg6[%c5_288, %c16_289] : memref<8x28xf32, #tpu.memory_space<smem>>
    %1075 = vector.extract_strided_slice %953 {offsets = [0, 0, 0], sizes = [1, 8, 128], strides = [1, 1, 1]} : vector<4x8x128xf32> to vector<1x8x128xf32>
    %1076 = vector.shape_cast %1075 : vector<1x8x128xf32> to vector<8x128xf32>
    %1077 = vector.broadcast %1074 : f32 to vector<8x128xf32>
    %1078 = arith.mulf %1077, %1076 : vector<8x128xf32>
    %1079 = arith.addf %858, %1078 : vector<8x128xf32>
    %c5_290 = arith.constant 5 : index
    %c17_291 = arith.constant 17 : index
    %1080 = memref.load %arg6[%c5_290, %c17_291] : memref<8x28xf32, #tpu.memory_space<smem>>
    %1081 = vector.extract_strided_slice %953 {offsets = [1, 0, 0], sizes = [1, 8, 128], strides = [1, 1, 1]} : vector<4x8x128xf32> to vector<1x8x128xf32>
    %1082 = vector.shape_cast %1081 : vector<1x8x128xf32> to vector<8x128xf32>
    %1083 = vector.broadcast %1080 : f32 to vector<8x128xf32>
    %1084 = arith.mulf %1083, %1082 : vector<8x128xf32>
    %1085 = arith.addf %1079, %1084 : vector<8x128xf32>
    %c5_292 = arith.constant 5 : index
    %c18_293 = arith.constant 18 : index
    %1086 = memref.load %arg6[%c5_292, %c18_293] : memref<8x28xf32, #tpu.memory_space<smem>>
    %1087 = vector.extract_strided_slice %953 {offsets = [2, 0, 0], sizes = [1, 8, 128], strides = [1, 1, 1]} : vector<4x8x128xf32> to vector<1x8x128xf32>
    %1088 = vector.shape_cast %1087 : vector<1x8x128xf32> to vector<8x128xf32>
    %1089 = vector.broadcast %1086 : f32 to vector<8x128xf32>
    %1090 = arith.mulf %1089, %1088 : vector<8x128xf32>
    %1091 = arith.addf %1085, %1090 : vector<8x128xf32>
    %c5_294 = arith.constant 5 : index
    %c19_295 = arith.constant 19 : index
    %1092 = memref.load %arg6[%c5_294, %c19_295] : memref<8x28xf32, #tpu.memory_space<smem>>
    %1093 = vector.extract_strided_slice %953 {offsets = [3, 0, 0], sizes = [1, 8, 128], strides = [1, 1, 1]} : vector<4x8x128xf32> to vector<1x8x128xf32>
    %1094 = vector.shape_cast %1093 : vector<1x8x128xf32> to vector<8x128xf32>
    %1095 = vector.broadcast %1092 : f32 to vector<8x128xf32>
    %1096 = arith.mulf %1095, %1094 : vector<8x128xf32>
    %1097 = arith.addf %1091, %1096 : vector<8x128xf32>
    %c6_296 = arith.constant 6 : index
    %c16_297 = arith.constant 16 : index
    %1098 = memref.load %arg6[%c6_296, %c16_297] : memref<8x28xf32, #tpu.memory_space<smem>>
    %1099 = vector.extract_strided_slice %953 {offsets = [0, 0, 0], sizes = [1, 8, 128], strides = [1, 1, 1]} : vector<4x8x128xf32> to vector<1x8x128xf32>
    %1100 = vector.shape_cast %1099 : vector<1x8x128xf32> to vector<8x128xf32>
    %1101 = vector.broadcast %1098 : f32 to vector<8x128xf32>
    %1102 = arith.mulf %1101, %1100 : vector<8x128xf32>
    %1103 = arith.addf %882, %1102 : vector<8x128xf32>
    %c6_298 = arith.constant 6 : index
    %c17_299 = arith.constant 17 : index
    %1104 = memref.load %arg6[%c6_298, %c17_299] : memref<8x28xf32, #tpu.memory_space<smem>>
    %1105 = vector.extract_strided_slice %953 {offsets = [1, 0, 0], sizes = [1, 8, 128], strides = [1, 1, 1]} : vector<4x8x128xf32> to vector<1x8x128xf32>
    %1106 = vector.shape_cast %1105 : vector<1x8x128xf32> to vector<8x128xf32>
    %1107 = vector.broadcast %1104 : f32 to vector<8x128xf32>
    %1108 = arith.mulf %1107, %1106 : vector<8x128xf32>
    %1109 = arith.addf %1103, %1108 : vector<8x128xf32>
    %c6_300 = arith.constant 6 : index
    %c18_301 = arith.constant 18 : index
    %1110 = memref.load %arg6[%c6_300, %c18_301] : memref<8x28xf32, #tpu.memory_space<smem>>
    %1111 = vector.extract_strided_slice %953 {offsets = [2, 0, 0], sizes = [1, 8, 128], strides = [1, 1, 1]} : vector<4x8x128xf32> to vector<1x8x128xf32>
    %1112 = vector.shape_cast %1111 : vector<1x8x128xf32> to vector<8x128xf32>
    %1113 = vector.broadcast %1110 : f32 to vector<8x128xf32>
    %1114 = arith.mulf %1113, %1112 : vector<8x128xf32>
    %1115 = arith.addf %1109, %1114 : vector<8x128xf32>
    %c6_302 = arith.constant 6 : index
    %c19_303 = arith.constant 19 : index
    %1116 = memref.load %arg6[%c6_302, %c19_303] : memref<8x28xf32, #tpu.memory_space<smem>>
    %1117 = vector.extract_strided_slice %953 {offsets = [3, 0, 0], sizes = [1, 8, 128], strides = [1, 1, 1]} : vector<4x8x128xf32> to vector<1x8x128xf32>
    %1118 = vector.shape_cast %1117 : vector<1x8x128xf32> to vector<8x128xf32>
    %1119 = vector.broadcast %1116 : f32 to vector<8x128xf32>
    %1120 = arith.mulf %1119, %1118 : vector<8x128xf32>
    %1121 = arith.addf %1115, %1120 : vector<8x128xf32>
    %c7_304 = arith.constant 7 : index
    %c16_305 = arith.constant 16 : index
    %1122 = memref.load %arg6[%c7_304, %c16_305] : memref<8x28xf32, #tpu.memory_space<smem>>
    %1123 = vector.extract_strided_slice %953 {offsets = [0, 0, 0], sizes = [1, 8, 128], strides = [1, 1, 1]} : vector<4x8x128xf32> to vector<1x8x128xf32>
    %1124 = vector.shape_cast %1123 : vector<1x8x128xf32> to vector<8x128xf32>
    %1125 = vector.broadcast %1122 : f32 to vector<8x128xf32>
    %1126 = arith.mulf %1125, %1124 : vector<8x128xf32>
    %1127 = arith.addf %906, %1126 : vector<8x128xf32>
    %c7_306 = arith.constant 7 : index
    %c17_307 = arith.constant 17 : index
    %1128 = memref.load %arg6[%c7_306, %c17_307] : memref<8x28xf32, #tpu.memory_space<smem>>
    %1129 = vector.extract_strided_slice %953 {offsets = [1, 0, 0], sizes = [1, 8, 128], strides = [1, 1, 1]} : vector<4x8x128xf32> to vector<1x8x128xf32>
    %1130 = vector.shape_cast %1129 : vector<1x8x128xf32> to vector<8x128xf32>
    %1131 = vector.broadcast %1128 : f32 to vector<8x128xf32>
    %1132 = arith.mulf %1131, %1130 : vector<8x128xf32>
    %1133 = arith.addf %1127, %1132 : vector<8x128xf32>
    %c7_308 = arith.constant 7 : index
    %c18_309 = arith.constant 18 : index
    %1134 = memref.load %arg6[%c7_308, %c18_309] : memref<8x28xf32, #tpu.memory_space<smem>>
    %1135 = vector.extract_strided_slice %953 {offsets = [2, 0, 0], sizes = [1, 8, 128], strides = [1, 1, 1]} : vector<4x8x128xf32> to vector<1x8x128xf32>
    %1136 = vector.shape_cast %1135 : vector<1x8x128xf32> to vector<8x128xf32>
    %1137 = vector.broadcast %1134 : f32 to vector<8x128xf32>
    %1138 = arith.mulf %1137, %1136 : vector<8x128xf32>
    %1139 = arith.addf %1133, %1138 : vector<8x128xf32>
    %c7_310 = arith.constant 7 : index
    %c19_311 = arith.constant 19 : index
    %1140 = memref.load %arg6[%c7_310, %c19_311] : memref<8x28xf32, #tpu.memory_space<smem>>
    %1141 = vector.extract_strided_slice %953 {offsets = [3, 0, 0], sizes = [1, 8, 128], strides = [1, 1, 1]} : vector<4x8x128xf32> to vector<1x8x128xf32>
    %1142 = vector.shape_cast %1141 : vector<1x8x128xf32> to vector<8x128xf32>
    %1143 = vector.broadcast %1140 : f32 to vector<8x128xf32>
    %1144 = arith.mulf %1143, %1142 : vector<8x128xf32>
    %1145 = arith.addf %1139, %1144 : vector<8x128xf32>
    %c0_312 = arith.constant 0 : index
    %c0_313 = arith.constant 0 : index
    %c0_314 = arith.constant 0 : index
    %c0_315 = arith.constant 0 : index
    %1146 = vector.load %arg5[%c0_312, %c0_313, %c0_314, %c0_315] : memref<1x8x8x128xf32, #tpu.memory_space<vmem>>, vector<1x8x8x128xf32>
    %1147 = vector.shape_cast %1146 : vector<1x8x8x128xf32> to vector<8x8x128xf32>
    %1148 = vector.extract_strided_slice %1 {offsets = [0, 0, 0], sizes = [4, 1, 128], strides = [1, 1, 1]} : vector<4x8x128xf32> to vector<4x1x128xf32>
    %1149 = vector.extract_strided_slice %1147 {offsets = [0, 0, 0], sizes = [1, 8, 128], strides = [1, 1, 1]} : vector<8x8x128xf32> to vector<1x8x128xf32>
    %1150 = vector.broadcast %1148 : vector<4x1x128xf32> to vector<4x8x128xf32>
    %1151 = vector.broadcast %1149 : vector<1x8x128xf32> to vector<4x8x128xf32>
    %1152 = arith.mulf %1150, %1151 : vector<4x8x128xf32>
    %1153 = vector.extract_strided_slice %1 {offsets = [0, 1, 0], sizes = [4, 1, 128], strides = [1, 1, 1]} : vector<4x8x128xf32> to vector<4x1x128xf32>
    %1154 = vector.extract_strided_slice %1147 {offsets = [1, 0, 0], sizes = [1, 8, 128], strides = [1, 1, 1]} : vector<8x8x128xf32> to vector<1x8x128xf32>
    %1155 = vector.broadcast %1153 : vector<4x1x128xf32> to vector<4x8x128xf32>
    %1156 = vector.broadcast %1154 : vector<1x8x128xf32> to vector<4x8x128xf32>
    %1157 = arith.mulf %1155, %1156 : vector<4x8x128xf32>
    %1158 = arith.addf %1152, %1157 : vector<4x8x128xf32>
    %1159 = vector.extract_strided_slice %1 {offsets = [0, 2, 0], sizes = [4, 1, 128], strides = [1, 1, 1]} : vector<4x8x128xf32> to vector<4x1x128xf32>
    %1160 = vector.extract_strided_slice %1147 {offsets = [2, 0, 0], sizes = [1, 8, 128], strides = [1, 1, 1]} : vector<8x8x128xf32> to vector<1x8x128xf32>
    %1161 = vector.broadcast %1159 : vector<4x1x128xf32> to vector<4x8x128xf32>
    %1162 = vector.broadcast %1160 : vector<1x8x128xf32> to vector<4x8x128xf32>
    %1163 = arith.mulf %1161, %1162 : vector<4x8x128xf32>
    %1164 = arith.addf %1158, %1163 : vector<4x8x128xf32>
    %1165 = vector.extract_strided_slice %1 {offsets = [0, 3, 0], sizes = [4, 1, 128], strides = [1, 1, 1]} : vector<4x8x128xf32> to vector<4x1x128xf32>
    %1166 = vector.extract_strided_slice %1147 {offsets = [3, 0, 0], sizes = [1, 8, 128], strides = [1, 1, 1]} : vector<8x8x128xf32> to vector<1x8x128xf32>
    %1167 = vector.broadcast %1165 : vector<4x1x128xf32> to vector<4x8x128xf32>
    %1168 = vector.broadcast %1166 : vector<1x8x128xf32> to vector<4x8x128xf32>
    %1169 = arith.mulf %1167, %1168 : vector<4x8x128xf32>
    %1170 = arith.addf %1164, %1169 : vector<4x8x128xf32>
    %1171 = vector.extract_strided_slice %1 {offsets = [0, 4, 0], sizes = [4, 1, 128], strides = [1, 1, 1]} : vector<4x8x128xf32> to vector<4x1x128xf32>
    %1172 = vector.extract_strided_slice %1147 {offsets = [4, 0, 0], sizes = [1, 8, 128], strides = [1, 1, 1]} : vector<8x8x128xf32> to vector<1x8x128xf32>
    %1173 = vector.broadcast %1171 : vector<4x1x128xf32> to vector<4x8x128xf32>
    %1174 = vector.broadcast %1172 : vector<1x8x128xf32> to vector<4x8x128xf32>
    %1175 = arith.mulf %1173, %1174 : vector<4x8x128xf32>
    %1176 = arith.addf %1170, %1175 : vector<4x8x128xf32>
    %1177 = vector.extract_strided_slice %1 {offsets = [0, 5, 0], sizes = [4, 1, 128], strides = [1, 1, 1]} : vector<4x8x128xf32> to vector<4x1x128xf32>
    %1178 = vector.extract_strided_slice %1147 {offsets = [5, 0, 0], sizes = [1, 8, 128], strides = [1, 1, 1]} : vector<8x8x128xf32> to vector<1x8x128xf32>
    %1179 = vector.broadcast %1177 : vector<4x1x128xf32> to vector<4x8x128xf32>
    %1180 = vector.broadcast %1178 : vector<1x8x128xf32> to vector<4x8x128xf32>
    %1181 = arith.mulf %1179, %1180 : vector<4x8x128xf32>
    %1182 = arith.addf %1176, %1181 : vector<4x8x128xf32>
    %1183 = vector.extract_strided_slice %1 {offsets = [0, 6, 0], sizes = [4, 1, 128], strides = [1, 1, 1]} : vector<4x8x128xf32> to vector<4x1x128xf32>
    %1184 = vector.extract_strided_slice %1147 {offsets = [6, 0, 0], sizes = [1, 8, 128], strides = [1, 1, 1]} : vector<8x8x128xf32> to vector<1x8x128xf32>
    %1185 = vector.broadcast %1183 : vector<4x1x128xf32> to vector<4x8x128xf32>
    %1186 = vector.broadcast %1184 : vector<1x8x128xf32> to vector<4x8x128xf32>
    %1187 = arith.mulf %1185, %1186 : vector<4x8x128xf32>
    %1188 = arith.addf %1182, %1187 : vector<4x8x128xf32>
    %1189 = vector.extract_strided_slice %1 {offsets = [0, 7, 0], sizes = [4, 1, 128], strides = [1, 1, 1]} : vector<4x8x128xf32> to vector<4x1x128xf32>
    %1190 = vector.extract_strided_slice %1147 {offsets = [7, 0, 0], sizes = [1, 8, 128], strides = [1, 1, 1]} : vector<8x8x128xf32> to vector<1x8x128xf32>
    %1191 = vector.broadcast %1189 : vector<4x1x128xf32> to vector<4x8x128xf32>
    %1192 = vector.broadcast %1190 : vector<1x8x128xf32> to vector<4x8x128xf32>
    %1193 = arith.mulf %1191, %1192 : vector<4x8x128xf32>
    %1194 = arith.addf %1188, %1193 : vector<4x8x128xf32>
    %c0_316 = arith.constant 0 : index
    %c20 = arith.constant 20 : index
    %1195 = memref.load %arg6[%c0_316, %c20] : memref<8x28xf32, #tpu.memory_space<smem>>
    %1196 = vector.extract_strided_slice %1194 {offsets = [0, 0, 0], sizes = [1, 8, 128], strides = [1, 1, 1]} : vector<4x8x128xf32> to vector<1x8x128xf32>
    %1197 = vector.shape_cast %1196 : vector<1x8x128xf32> to vector<8x128xf32>
    %1198 = vector.broadcast %1195 : f32 to vector<8x128xf32>
    %1199 = arith.mulf %1198, %1197 : vector<8x128xf32>
    %1200 = arith.addf %977, %1199 : vector<8x128xf32>
    %c0_317 = arith.constant 0 : index
    %c21 = arith.constant 21 : index
    %1201 = memref.load %arg6[%c0_317, %c21] : memref<8x28xf32, #tpu.memory_space<smem>>
    %1202 = vector.extract_strided_slice %1194 {offsets = [1, 0, 0], sizes = [1, 8, 128], strides = [1, 1, 1]} : vector<4x8x128xf32> to vector<1x8x128xf32>
    %1203 = vector.shape_cast %1202 : vector<1x8x128xf32> to vector<8x128xf32>
    %1204 = vector.broadcast %1201 : f32 to vector<8x128xf32>
    %1205 = arith.mulf %1204, %1203 : vector<8x128xf32>
    %1206 = arith.addf %1200, %1205 : vector<8x128xf32>
    %c0_318 = arith.constant 0 : index
    %c22 = arith.constant 22 : index
    %1207 = memref.load %arg6[%c0_318, %c22] : memref<8x28xf32, #tpu.memory_space<smem>>
    %1208 = vector.extract_strided_slice %1194 {offsets = [2, 0, 0], sizes = [1, 8, 128], strides = [1, 1, 1]} : vector<4x8x128xf32> to vector<1x8x128xf32>
    %1209 = vector.shape_cast %1208 : vector<1x8x128xf32> to vector<8x128xf32>
    %1210 = vector.broadcast %1207 : f32 to vector<8x128xf32>
    %1211 = arith.mulf %1210, %1209 : vector<8x128xf32>
    %1212 = arith.addf %1206, %1211 : vector<8x128xf32>
    %c0_319 = arith.constant 0 : index
    %c23 = arith.constant 23 : index
    %1213 = memref.load %arg6[%c0_319, %c23] : memref<8x28xf32, #tpu.memory_space<smem>>
    %1214 = vector.extract_strided_slice %1194 {offsets = [3, 0, 0], sizes = [1, 8, 128], strides = [1, 1, 1]} : vector<4x8x128xf32> to vector<1x8x128xf32>
    %1215 = vector.shape_cast %1214 : vector<1x8x128xf32> to vector<8x128xf32>
    %1216 = vector.broadcast %1213 : f32 to vector<8x128xf32>
    %1217 = arith.mulf %1216, %1215 : vector<8x128xf32>
    %1218 = arith.addf %1212, %1217 : vector<8x128xf32>
    %c1_320 = arith.constant 1 : index
    %c20_321 = arith.constant 20 : index
    %1219 = memref.load %arg6[%c1_320, %c20_321] : memref<8x28xf32, #tpu.memory_space<smem>>
    %1220 = vector.extract_strided_slice %1194 {offsets = [0, 0, 0], sizes = [1, 8, 128], strides = [1, 1, 1]} : vector<4x8x128xf32> to vector<1x8x128xf32>
    %1221 = vector.shape_cast %1220 : vector<1x8x128xf32> to vector<8x128xf32>
    %1222 = vector.broadcast %1219 : f32 to vector<8x128xf32>
    %1223 = arith.mulf %1222, %1221 : vector<8x128xf32>
    %1224 = arith.addf %1001, %1223 : vector<8x128xf32>
    %c1_322 = arith.constant 1 : index
    %c21_323 = arith.constant 21 : index
    %1225 = memref.load %arg6[%c1_322, %c21_323] : memref<8x28xf32, #tpu.memory_space<smem>>
    %1226 = vector.extract_strided_slice %1194 {offsets = [1, 0, 0], sizes = [1, 8, 128], strides = [1, 1, 1]} : vector<4x8x128xf32> to vector<1x8x128xf32>
    %1227 = vector.shape_cast %1226 : vector<1x8x128xf32> to vector<8x128xf32>
    %1228 = vector.broadcast %1225 : f32 to vector<8x128xf32>
    %1229 = arith.mulf %1228, %1227 : vector<8x128xf32>
    %1230 = arith.addf %1224, %1229 : vector<8x128xf32>
    %c1_324 = arith.constant 1 : index
    %c22_325 = arith.constant 22 : index
    %1231 = memref.load %arg6[%c1_324, %c22_325] : memref<8x28xf32, #tpu.memory_space<smem>>
    %1232 = vector.extract_strided_slice %1194 {offsets = [2, 0, 0], sizes = [1, 8, 128], strides = [1, 1, 1]} : vector<4x8x128xf32> to vector<1x8x128xf32>
    %1233 = vector.shape_cast %1232 : vector<1x8x128xf32> to vector<8x128xf32>
    %1234 = vector.broadcast %1231 : f32 to vector<8x128xf32>
    %1235 = arith.mulf %1234, %1233 : vector<8x128xf32>
    %1236 = arith.addf %1230, %1235 : vector<8x128xf32>
    %c1_326 = arith.constant 1 : index
    %c23_327 = arith.constant 23 : index
    %1237 = memref.load %arg6[%c1_326, %c23_327] : memref<8x28xf32, #tpu.memory_space<smem>>
    %1238 = vector.extract_strided_slice %1194 {offsets = [3, 0, 0], sizes = [1, 8, 128], strides = [1, 1, 1]} : vector<4x8x128xf32> to vector<1x8x128xf32>
    %1239 = vector.shape_cast %1238 : vector<1x8x128xf32> to vector<8x128xf32>
    %1240 = vector.broadcast %1237 : f32 to vector<8x128xf32>
    %1241 = arith.mulf %1240, %1239 : vector<8x128xf32>
    %1242 = arith.addf %1236, %1241 : vector<8x128xf32>
    %c2_328 = arith.constant 2 : index
    %c20_329 = arith.constant 20 : index
    %1243 = memref.load %arg6[%c2_328, %c20_329] : memref<8x28xf32, #tpu.memory_space<smem>>
    %1244 = vector.extract_strided_slice %1194 {offsets = [0, 0, 0], sizes = [1, 8, 128], strides = [1, 1, 1]} : vector<4x8x128xf32> to vector<1x8x128xf32>
    %1245 = vector.shape_cast %1244 : vector<1x8x128xf32> to vector<8x128xf32>
    %1246 = vector.broadcast %1243 : f32 to vector<8x128xf32>
    %1247 = arith.mulf %1246, %1245 : vector<8x128xf32>
    %1248 = arith.addf %1025, %1247 : vector<8x128xf32>
    %c2_330 = arith.constant 2 : index
    %c21_331 = arith.constant 21 : index
    %1249 = memref.load %arg6[%c2_330, %c21_331] : memref<8x28xf32, #tpu.memory_space<smem>>
    %1250 = vector.extract_strided_slice %1194 {offsets = [1, 0, 0], sizes = [1, 8, 128], strides = [1, 1, 1]} : vector<4x8x128xf32> to vector<1x8x128xf32>
    %1251 = vector.shape_cast %1250 : vector<1x8x128xf32> to vector<8x128xf32>
    %1252 = vector.broadcast %1249 : f32 to vector<8x128xf32>
    %1253 = arith.mulf %1252, %1251 : vector<8x128xf32>
    %1254 = arith.addf %1248, %1253 : vector<8x128xf32>
    %c2_332 = arith.constant 2 : index
    %c22_333 = arith.constant 22 : index
    %1255 = memref.load %arg6[%c2_332, %c22_333] : memref<8x28xf32, #tpu.memory_space<smem>>
    %1256 = vector.extract_strided_slice %1194 {offsets = [2, 0, 0], sizes = [1, 8, 128], strides = [1, 1, 1]} : vector<4x8x128xf32> to vector<1x8x128xf32>
    %1257 = vector.shape_cast %1256 : vector<1x8x128xf32> to vector<8x128xf32>
    %1258 = vector.broadcast %1255 : f32 to vector<8x128xf32>
    %1259 = arith.mulf %1258, %1257 : vector<8x128xf32>
    %1260 = arith.addf %1254, %1259 : vector<8x128xf32>
    %c2_334 = arith.constant 2 : index
    %c23_335 = arith.constant 23 : index
    %1261 = memref.load %arg6[%c2_334, %c23_335] : memref<8x28xf32, #tpu.memory_space<smem>>
    %1262 = vector.extract_strided_slice %1194 {offsets = [3, 0, 0], sizes = [1, 8, 128], strides = [1, 1, 1]} : vector<4x8x128xf32> to vector<1x8x128xf32>
    %1263 = vector.shape_cast %1262 : vector<1x8x128xf32> to vector<8x128xf32>
    %1264 = vector.broadcast %1261 : f32 to vector<8x128xf32>
    %1265 = arith.mulf %1264, %1263 : vector<8x128xf32>
    %1266 = arith.addf %1260, %1265 : vector<8x128xf32>
    %c3_336 = arith.constant 3 : index
    %c20_337 = arith.constant 20 : index
    %1267 = memref.load %arg6[%c3_336, %c20_337] : memref<8x28xf32, #tpu.memory_space<smem>>
    %1268 = vector.extract_strided_slice %1194 {offsets = [0, 0, 0], sizes = [1, 8, 128], strides = [1, 1, 1]} : vector<4x8x128xf32> to vector<1x8x128xf32>
    %1269 = vector.shape_cast %1268 : vector<1x8x128xf32> to vector<8x128xf32>
    %1270 = vector.broadcast %1267 : f32 to vector<8x128xf32>
    %1271 = arith.mulf %1270, %1269 : vector<8x128xf32>
    %1272 = arith.addf %1049, %1271 : vector<8x128xf32>
    %c3_338 = arith.constant 3 : index
    %c21_339 = arith.constant 21 : index
    %1273 = memref.load %arg6[%c3_338, %c21_339] : memref<8x28xf32, #tpu.memory_space<smem>>
    %1274 = vector.extract_strided_slice %1194 {offsets = [1, 0, 0], sizes = [1, 8, 128], strides = [1, 1, 1]} : vector<4x8x128xf32> to vector<1x8x128xf32>
    %1275 = vector.shape_cast %1274 : vector<1x8x128xf32> to vector<8x128xf32>
    %1276 = vector.broadcast %1273 : f32 to vector<8x128xf32>
    %1277 = arith.mulf %1276, %1275 : vector<8x128xf32>
    %1278 = arith.addf %1272, %1277 : vector<8x128xf32>
    %c3_340 = arith.constant 3 : index
    %c22_341 = arith.constant 22 : index
    %1279 = memref.load %arg6[%c3_340, %c22_341] : memref<8x28xf32, #tpu.memory_space<smem>>
    %1280 = vector.extract_strided_slice %1194 {offsets = [2, 0, 0], sizes = [1, 8, 128], strides = [1, 1, 1]} : vector<4x8x128xf32> to vector<1x8x128xf32>
    %1281 = vector.shape_cast %1280 : vector<1x8x128xf32> to vector<8x128xf32>
    %1282 = vector.broadcast %1279 : f32 to vector<8x128xf32>
    %1283 = arith.mulf %1282, %1281 : vector<8x128xf32>
    %1284 = arith.addf %1278, %1283 : vector<8x128xf32>
    %c3_342 = arith.constant 3 : index
    %c23_343 = arith.constant 23 : index
    %1285 = memref.load %arg6[%c3_342, %c23_343] : memref<8x28xf32, #tpu.memory_space<smem>>
    %1286 = vector.extract_strided_slice %1194 {offsets = [3, 0, 0], sizes = [1, 8, 128], strides = [1, 1, 1]} : vector<4x8x128xf32> to vector<1x8x128xf32>
    %1287 = vector.shape_cast %1286 : vector<1x8x128xf32> to vector<8x128xf32>
    %1288 = vector.broadcast %1285 : f32 to vector<8x128xf32>
    %1289 = arith.mulf %1288, %1287 : vector<8x128xf32>
    %1290 = arith.addf %1284, %1289 : vector<8x128xf32>
    %c4_344 = arith.constant 4 : index
    %c20_345 = arith.constant 20 : index
    %1291 = memref.load %arg6[%c4_344, %c20_345] : memref<8x28xf32, #tpu.memory_space<smem>>
    %1292 = vector.extract_strided_slice %1194 {offsets = [0, 0, 0], sizes = [1, 8, 128], strides = [1, 1, 1]} : vector<4x8x128xf32> to vector<1x8x128xf32>
    %1293 = vector.shape_cast %1292 : vector<1x8x128xf32> to vector<8x128xf32>
    %1294 = vector.broadcast %1291 : f32 to vector<8x128xf32>
    %1295 = arith.mulf %1294, %1293 : vector<8x128xf32>
    %1296 = arith.addf %1073, %1295 : vector<8x128xf32>
    %c4_346 = arith.constant 4 : index
    %c21_347 = arith.constant 21 : index
    %1297 = memref.load %arg6[%c4_346, %c21_347] : memref<8x28xf32, #tpu.memory_space<smem>>
    %1298 = vector.extract_strided_slice %1194 {offsets = [1, 0, 0], sizes = [1, 8, 128], strides = [1, 1, 1]} : vector<4x8x128xf32> to vector<1x8x128xf32>
    %1299 = vector.shape_cast %1298 : vector<1x8x128xf32> to vector<8x128xf32>
    %1300 = vector.broadcast %1297 : f32 to vector<8x128xf32>
    %1301 = arith.mulf %1300, %1299 : vector<8x128xf32>
    %1302 = arith.addf %1296, %1301 : vector<8x128xf32>
    %c4_348 = arith.constant 4 : index
    %c22_349 = arith.constant 22 : index
    %1303 = memref.load %arg6[%c4_348, %c22_349] : memref<8x28xf32, #tpu.memory_space<smem>>
    %1304 = vector.extract_strided_slice %1194 {offsets = [2, 0, 0], sizes = [1, 8, 128], strides = [1, 1, 1]} : vector<4x8x128xf32> to vector<1x8x128xf32>
    %1305 = vector.shape_cast %1304 : vector<1x8x128xf32> to vector<8x128xf32>
    %1306 = vector.broadcast %1303 : f32 to vector<8x128xf32>
    %1307 = arith.mulf %1306, %1305 : vector<8x128xf32>
    %1308 = arith.addf %1302, %1307 : vector<8x128xf32>
    %c4_350 = arith.constant 4 : index
    %c23_351 = arith.constant 23 : index
    %1309 = memref.load %arg6[%c4_350, %c23_351] : memref<8x28xf32, #tpu.memory_space<smem>>
    %1310 = vector.extract_strided_slice %1194 {offsets = [3, 0, 0], sizes = [1, 8, 128], strides = [1, 1, 1]} : vector<4x8x128xf32> to vector<1x8x128xf32>
    %1311 = vector.shape_cast %1310 : vector<1x8x128xf32> to vector<8x128xf32>
    %1312 = vector.broadcast %1309 : f32 to vector<8x128xf32>
    %1313 = arith.mulf %1312, %1311 : vector<8x128xf32>
    %1314 = arith.addf %1308, %1313 : vector<8x128xf32>
    %c5_352 = arith.constant 5 : index
    %c20_353 = arith.constant 20 : index
    %1315 = memref.load %arg6[%c5_352, %c20_353] : memref<8x28xf32, #tpu.memory_space<smem>>
    %1316 = vector.extract_strided_slice %1194 {offsets = [0, 0, 0], sizes = [1, 8, 128], strides = [1, 1, 1]} : vector<4x8x128xf32> to vector<1x8x128xf32>
    %1317 = vector.shape_cast %1316 : vector<1x8x128xf32> to vector<8x128xf32>
    %1318 = vector.broadcast %1315 : f32 to vector<8x128xf32>
    %1319 = arith.mulf %1318, %1317 : vector<8x128xf32>
    %1320 = arith.addf %1097, %1319 : vector<8x128xf32>
    %c5_354 = arith.constant 5 : index
    %c21_355 = arith.constant 21 : index
    %1321 = memref.load %arg6[%c5_354, %c21_355] : memref<8x28xf32, #tpu.memory_space<smem>>
    %1322 = vector.extract_strided_slice %1194 {offsets = [1, 0, 0], sizes = [1, 8, 128], strides = [1, 1, 1]} : vector<4x8x128xf32> to vector<1x8x128xf32>
    %1323 = vector.shape_cast %1322 : vector<1x8x128xf32> to vector<8x128xf32>
    %1324 = vector.broadcast %1321 : f32 to vector<8x128xf32>
    %1325 = arith.mulf %1324, %1323 : vector<8x128xf32>
    %1326 = arith.addf %1320, %1325 : vector<8x128xf32>
    %c5_356 = arith.constant 5 : index
    %c22_357 = arith.constant 22 : index
    %1327 = memref.load %arg6[%c5_356, %c22_357] : memref<8x28xf32, #tpu.memory_space<smem>>
    %1328 = vector.extract_strided_slice %1194 {offsets = [2, 0, 0], sizes = [1, 8, 128], strides = [1, 1, 1]} : vector<4x8x128xf32> to vector<1x8x128xf32>
    %1329 = vector.shape_cast %1328 : vector<1x8x128xf32> to vector<8x128xf32>
    %1330 = vector.broadcast %1327 : f32 to vector<8x128xf32>
    %1331 = arith.mulf %1330, %1329 : vector<8x128xf32>
    %1332 = arith.addf %1326, %1331 : vector<8x128xf32>
    %c5_358 = arith.constant 5 : index
    %c23_359 = arith.constant 23 : index
    %1333 = memref.load %arg6[%c5_358, %c23_359] : memref<8x28xf32, #tpu.memory_space<smem>>
    %1334 = vector.extract_strided_slice %1194 {offsets = [3, 0, 0], sizes = [1, 8, 128], strides = [1, 1, 1]} : vector<4x8x128xf32> to vector<1x8x128xf32>
    %1335 = vector.shape_cast %1334 : vector<1x8x128xf32> to vector<8x128xf32>
    %1336 = vector.broadcast %1333 : f32 to vector<8x128xf32>
    %1337 = arith.mulf %1336, %1335 : vector<8x128xf32>
    %1338 = arith.addf %1332, %1337 : vector<8x128xf32>
    %c6_360 = arith.constant 6 : index
    %c20_361 = arith.constant 20 : index
    %1339 = memref.load %arg6[%c6_360, %c20_361] : memref<8x28xf32, #tpu.memory_space<smem>>
    %1340 = vector.extract_strided_slice %1194 {offsets = [0, 0, 0], sizes = [1, 8, 128], strides = [1, 1, 1]} : vector<4x8x128xf32> to vector<1x8x128xf32>
    %1341 = vector.shape_cast %1340 : vector<1x8x128xf32> to vector<8x128xf32>
    %1342 = vector.broadcast %1339 : f32 to vector<8x128xf32>
    %1343 = arith.mulf %1342, %1341 : vector<8x128xf32>
    %1344 = arith.addf %1121, %1343 : vector<8x128xf32>
    %c6_362 = arith.constant 6 : index
    %c21_363 = arith.constant 21 : index
    %1345 = memref.load %arg6[%c6_362, %c21_363] : memref<8x28xf32, #tpu.memory_space<smem>>
    %1346 = vector.extract_strided_slice %1194 {offsets = [1, 0, 0], sizes = [1, 8, 128], strides = [1, 1, 1]} : vector<4x8x128xf32> to vector<1x8x128xf32>
    %1347 = vector.shape_cast %1346 : vector<1x8x128xf32> to vector<8x128xf32>
    %1348 = vector.broadcast %1345 : f32 to vector<8x128xf32>
    %1349 = arith.mulf %1348, %1347 : vector<8x128xf32>
    %1350 = arith.addf %1344, %1349 : vector<8x128xf32>
    %c6_364 = arith.constant 6 : index
    %c22_365 = arith.constant 22 : index
    %1351 = memref.load %arg6[%c6_364, %c22_365] : memref<8x28xf32, #tpu.memory_space<smem>>
    %1352 = vector.extract_strided_slice %1194 {offsets = [2, 0, 0], sizes = [1, 8, 128], strides = [1, 1, 1]} : vector<4x8x128xf32> to vector<1x8x128xf32>
    %1353 = vector.shape_cast %1352 : vector<1x8x128xf32> to vector<8x128xf32>
    %1354 = vector.broadcast %1351 : f32 to vector<8x128xf32>
    %1355 = arith.mulf %1354, %1353 : vector<8x128xf32>
    %1356 = arith.addf %1350, %1355 : vector<8x128xf32>
    %c6_366 = arith.constant 6 : index
    %c23_367 = arith.constant 23 : index
    %1357 = memref.load %arg6[%c6_366, %c23_367] : memref<8x28xf32, #tpu.memory_space<smem>>
    %1358 = vector.extract_strided_slice %1194 {offsets = [3, 0, 0], sizes = [1, 8, 128], strides = [1, 1, 1]} : vector<4x8x128xf32> to vector<1x8x128xf32>
    %1359 = vector.shape_cast %1358 : vector<1x8x128xf32> to vector<8x128xf32>
    %1360 = vector.broadcast %1357 : f32 to vector<8x128xf32>
    %1361 = arith.mulf %1360, %1359 : vector<8x128xf32>
    %1362 = arith.addf %1356, %1361 : vector<8x128xf32>
    %c7_368 = arith.constant 7 : index
    %c20_369 = arith.constant 20 : index
    %1363 = memref.load %arg6[%c7_368, %c20_369] : memref<8x28xf32, #tpu.memory_space<smem>>
    %1364 = vector.extract_strided_slice %1194 {offsets = [0, 0, 0], sizes = [1, 8, 128], strides = [1, 1, 1]} : vector<4x8x128xf32> to vector<1x8x128xf32>
    %1365 = vector.shape_cast %1364 : vector<1x8x128xf32> to vector<8x128xf32>
    %1366 = vector.broadcast %1363 : f32 to vector<8x128xf32>
    %1367 = arith.mulf %1366, %1365 : vector<8x128xf32>
    %1368 = arith.addf %1145, %1367 : vector<8x128xf32>
    %c7_370 = arith.constant 7 : index
    %c21_371 = arith.constant 21 : index
    %1369 = memref.load %arg6[%c7_370, %c21_371] : memref<8x28xf32, #tpu.memory_space<smem>>
    %1370 = vector.extract_strided_slice %1194 {offsets = [1, 0, 0], sizes = [1, 8, 128], strides = [1, 1, 1]} : vector<4x8x128xf32> to vector<1x8x128xf32>
    %1371 = vector.shape_cast %1370 : vector<1x8x128xf32> to vector<8x128xf32>
    %1372 = vector.broadcast %1369 : f32 to vector<8x128xf32>
    %1373 = arith.mulf %1372, %1371 : vector<8x128xf32>
    %1374 = arith.addf %1368, %1373 : vector<8x128xf32>
    %c7_372 = arith.constant 7 : index
    %c22_373 = arith.constant 22 : index
    %1375 = memref.load %arg6[%c7_372, %c22_373] : memref<8x28xf32, #tpu.memory_space<smem>>
    %1376 = vector.extract_strided_slice %1194 {offsets = [2, 0, 0], sizes = [1, 8, 128], strides = [1, 1, 1]} : vector<4x8x128xf32> to vector<1x8x128xf32>
    %1377 = vector.shape_cast %1376 : vector<1x8x128xf32> to vector<8x128xf32>
    %1378 = vector.broadcast %1375 : f32 to vector<8x128xf32>
    %1379 = arith.mulf %1378, %1377 : vector<8x128xf32>
    %1380 = arith.addf %1374, %1379 : vector<8x128xf32>
    %c7_374 = arith.constant 7 : index
    %c23_375 = arith.constant 23 : index
    %1381 = memref.load %arg6[%c7_374, %c23_375] : memref<8x28xf32, #tpu.memory_space<smem>>
    %1382 = vector.extract_strided_slice %1194 {offsets = [3, 0, 0], sizes = [1, 8, 128], strides = [1, 1, 1]} : vector<4x8x128xf32> to vector<1x8x128xf32>
    %1383 = vector.shape_cast %1382 : vector<1x8x128xf32> to vector<8x128xf32>
    %1384 = vector.broadcast %1381 : f32 to vector<8x128xf32>
    %1385 = arith.mulf %1384, %1383 : vector<8x128xf32>
    %1386 = arith.addf %1380, %1385 : vector<8x128xf32>
    %1387 = vector.extract_strided_slice %1194 {offsets = [0, 0, 0], sizes = [4, 1, 128], strides = [1, 1, 1]} : vector<4x8x128xf32> to vector<4x1x128xf32>
    %1388 = vector.extract_strided_slice %1147 {offsets = [0, 0, 0], sizes = [1, 8, 128], strides = [1, 1, 1]} : vector<8x8x128xf32> to vector<1x8x128xf32>
    %1389 = vector.broadcast %1387 : vector<4x1x128xf32> to vector<4x8x128xf32>
    %1390 = vector.broadcast %1388 : vector<1x8x128xf32> to vector<4x8x128xf32>
    %1391 = arith.mulf %1389, %1390 : vector<4x8x128xf32>
    %1392 = vector.extract_strided_slice %1194 {offsets = [0, 1, 0], sizes = [4, 1, 128], strides = [1, 1, 1]} : vector<4x8x128xf32> to vector<4x1x128xf32>
    %1393 = vector.extract_strided_slice %1147 {offsets = [1, 0, 0], sizes = [1, 8, 128], strides = [1, 1, 1]} : vector<8x8x128xf32> to vector<1x8x128xf32>
    %1394 = vector.broadcast %1392 : vector<4x1x128xf32> to vector<4x8x128xf32>
    %1395 = vector.broadcast %1393 : vector<1x8x128xf32> to vector<4x8x128xf32>
    %1396 = arith.mulf %1394, %1395 : vector<4x8x128xf32>
    %1397 = arith.addf %1391, %1396 : vector<4x8x128xf32>
    %1398 = vector.extract_strided_slice %1194 {offsets = [0, 2, 0], sizes = [4, 1, 128], strides = [1, 1, 1]} : vector<4x8x128xf32> to vector<4x1x128xf32>
    %1399 = vector.extract_strided_slice %1147 {offsets = [2, 0, 0], sizes = [1, 8, 128], strides = [1, 1, 1]} : vector<8x8x128xf32> to vector<1x8x128xf32>
    %1400 = vector.broadcast %1398 : vector<4x1x128xf32> to vector<4x8x128xf32>
    %1401 = vector.broadcast %1399 : vector<1x8x128xf32> to vector<4x8x128xf32>
    %1402 = arith.mulf %1400, %1401 : vector<4x8x128xf32>
    %1403 = arith.addf %1397, %1402 : vector<4x8x128xf32>
    %1404 = vector.extract_strided_slice %1194 {offsets = [0, 3, 0], sizes = [4, 1, 128], strides = [1, 1, 1]} : vector<4x8x128xf32> to vector<4x1x128xf32>
    %1405 = vector.extract_strided_slice %1147 {offsets = [3, 0, 0], sizes = [1, 8, 128], strides = [1, 1, 1]} : vector<8x8x128xf32> to vector<1x8x128xf32>
    %1406 = vector.broadcast %1404 : vector<4x1x128xf32> to vector<4x8x128xf32>
    %1407 = vector.broadcast %1405 : vector<1x8x128xf32> to vector<4x8x128xf32>
    %1408 = arith.mulf %1406, %1407 : vector<4x8x128xf32>
    %1409 = arith.addf %1403, %1408 : vector<4x8x128xf32>
    %1410 = vector.extract_strided_slice %1194 {offsets = [0, 4, 0], sizes = [4, 1, 128], strides = [1, 1, 1]} : vector<4x8x128xf32> to vector<4x1x128xf32>
    %1411 = vector.extract_strided_slice %1147 {offsets = [4, 0, 0], sizes = [1, 8, 128], strides = [1, 1, 1]} : vector<8x8x128xf32> to vector<1x8x128xf32>
    %1412 = vector.broadcast %1410 : vector<4x1x128xf32> to vector<4x8x128xf32>
    %1413 = vector.broadcast %1411 : vector<1x8x128xf32> to vector<4x8x128xf32>
    %1414 = arith.mulf %1412, %1413 : vector<4x8x128xf32>
    %1415 = arith.addf %1409, %1414 : vector<4x8x128xf32>
    %1416 = vector.extract_strided_slice %1194 {offsets = [0, 5, 0], sizes = [4, 1, 128], strides = [1, 1, 1]} : vector<4x8x128xf32> to vector<4x1x128xf32>
    %1417 = vector.extract_strided_slice %1147 {offsets = [5, 0, 0], sizes = [1, 8, 128], strides = [1, 1, 1]} : vector<8x8x128xf32> to vector<1x8x128xf32>
    %1418 = vector.broadcast %1416 : vector<4x1x128xf32> to vector<4x8x128xf32>
    %1419 = vector.broadcast %1417 : vector<1x8x128xf32> to vector<4x8x128xf32>
    %1420 = arith.mulf %1418, %1419 : vector<4x8x128xf32>
    %1421 = arith.addf %1415, %1420 : vector<4x8x128xf32>
    %1422 = vector.extract_strided_slice %1194 {offsets = [0, 6, 0], sizes = [4, 1, 128], strides = [1, 1, 1]} : vector<4x8x128xf32> to vector<4x1x128xf32>
    %1423 = vector.extract_strided_slice %1147 {offsets = [6, 0, 0], sizes = [1, 8, 128], strides = [1, 1, 1]} : vector<8x8x128xf32> to vector<1x8x128xf32>
    %1424 = vector.broadcast %1422 : vector<4x1x128xf32> to vector<4x8x128xf32>
    %1425 = vector.broadcast %1423 : vector<1x8x128xf32> to vector<4x8x128xf32>
    %1426 = arith.mulf %1424, %1425 : vector<4x8x128xf32>
    %1427 = arith.addf %1421, %1426 : vector<4x8x128xf32>
    %1428 = vector.extract_strided_slice %1194 {offsets = [0, 7, 0], sizes = [4, 1, 128], strides = [1, 1, 1]} : vector<4x8x128xf32> to vector<4x1x128xf32>
    %1429 = vector.extract_strided_slice %1147 {offsets = [7, 0, 0], sizes = [1, 8, 128], strides = [1, 1, 1]} : vector<8x8x128xf32> to vector<1x8x128xf32>
    %1430 = vector.broadcast %1428 : vector<4x1x128xf32> to vector<4x8x128xf32>
    %1431 = vector.broadcast %1429 : vector<1x8x128xf32> to vector<4x8x128xf32>
    %1432 = arith.mulf %1430, %1431 : vector<4x8x128xf32>
    %1433 = arith.addf %1427, %1432 : vector<4x8x128xf32>
    %c0_376 = arith.constant 0 : index
    %c24 = arith.constant 24 : index
    %1434 = memref.load %arg6[%c0_376, %c24] : memref<8x28xf32, #tpu.memory_space<smem>>
    %1435 = vector.extract_strided_slice %1433 {offsets = [0, 0, 0], sizes = [1, 8, 128], strides = [1, 1, 1]} : vector<4x8x128xf32> to vector<1x8x128xf32>
    %1436 = vector.shape_cast %1435 : vector<1x8x128xf32> to vector<8x128xf32>
    %1437 = vector.broadcast %1434 : f32 to vector<8x128xf32>
    %1438 = arith.mulf %1437, %1436 : vector<8x128xf32>
    %1439 = arith.addf %1218, %1438 : vector<8x128xf32>
    %c0_377 = arith.constant 0 : index
    %c25 = arith.constant 25 : index
    %1440 = memref.load %arg6[%c0_377, %c25] : memref<8x28xf32, #tpu.memory_space<smem>>
    %1441 = vector.extract_strided_slice %1433 {offsets = [1, 0, 0], sizes = [1, 8, 128], strides = [1, 1, 1]} : vector<4x8x128xf32> to vector<1x8x128xf32>
    %1442 = vector.shape_cast %1441 : vector<1x8x128xf32> to vector<8x128xf32>
    %1443 = vector.broadcast %1440 : f32 to vector<8x128xf32>
    %1444 = arith.mulf %1443, %1442 : vector<8x128xf32>
    %1445 = arith.addf %1439, %1444 : vector<8x128xf32>
    %c0_378 = arith.constant 0 : index
    %c26 = arith.constant 26 : index
    %1446 = memref.load %arg6[%c0_378, %c26] : memref<8x28xf32, #tpu.memory_space<smem>>
    %1447 = vector.extract_strided_slice %1433 {offsets = [2, 0, 0], sizes = [1, 8, 128], strides = [1, 1, 1]} : vector<4x8x128xf32> to vector<1x8x128xf32>
    %1448 = vector.shape_cast %1447 : vector<1x8x128xf32> to vector<8x128xf32>
    %1449 = vector.broadcast %1446 : f32 to vector<8x128xf32>
    %1450 = arith.mulf %1449, %1448 : vector<8x128xf32>
    %1451 = arith.addf %1445, %1450 : vector<8x128xf32>
    %c0_379 = arith.constant 0 : index
    %c27 = arith.constant 27 : index
    %1452 = memref.load %arg6[%c0_379, %c27] : memref<8x28xf32, #tpu.memory_space<smem>>
    %1453 = vector.extract_strided_slice %1433 {offsets = [3, 0, 0], sizes = [1, 8, 128], strides = [1, 1, 1]} : vector<4x8x128xf32> to vector<1x8x128xf32>
    %1454 = vector.shape_cast %1453 : vector<1x8x128xf32> to vector<8x128xf32>
    %1455 = vector.broadcast %1452 : f32 to vector<8x128xf32>
    %1456 = arith.mulf %1455, %1454 : vector<8x128xf32>
    %1457 = arith.addf %1451, %1456 : vector<8x128xf32>
    %c1_380 = arith.constant 1 : index
    %c24_381 = arith.constant 24 : index
    %1458 = memref.load %arg6[%c1_380, %c24_381] : memref<8x28xf32, #tpu.memory_space<smem>>
    %1459 = vector.extract_strided_slice %1433 {offsets = [0, 0, 0], sizes = [1, 8, 128], strides = [1, 1, 1]} : vector<4x8x128xf32> to vector<1x8x128xf32>
    %1460 = vector.shape_cast %1459 : vector<1x8x128xf32> to vector<8x128xf32>
    %1461 = vector.broadcast %1458 : f32 to vector<8x128xf32>
    %1462 = arith.mulf %1461, %1460 : vector<8x128xf32>
    %1463 = arith.addf %1242, %1462 : vector<8x128xf32>
    %c1_382 = arith.constant 1 : index
    %c25_383 = arith.constant 25 : index
    %1464 = memref.load %arg6[%c1_382, %c25_383] : memref<8x28xf32, #tpu.memory_space<smem>>
    %1465 = vector.extract_strided_slice %1433 {offsets = [1, 0, 0], sizes = [1, 8, 128], strides = [1, 1, 1]} : vector<4x8x128xf32> to vector<1x8x128xf32>
    %1466 = vector.shape_cast %1465 : vector<1x8x128xf32> to vector<8x128xf32>
    %1467 = vector.broadcast %1464 : f32 to vector<8x128xf32>
    %1468 = arith.mulf %1467, %1466 : vector<8x128xf32>
    %1469 = arith.addf %1463, %1468 : vector<8x128xf32>
    %c1_384 = arith.constant 1 : index
    %c26_385 = arith.constant 26 : index
    %1470 = memref.load %arg6[%c1_384, %c26_385] : memref<8x28xf32, #tpu.memory_space<smem>>
    %1471 = vector.extract_strided_slice %1433 {offsets = [2, 0, 0], sizes = [1, 8, 128], strides = [1, 1, 1]} : vector<4x8x128xf32> to vector<1x8x128xf32>
    %1472 = vector.shape_cast %1471 : vector<1x8x128xf32> to vector<8x128xf32>
    %1473 = vector.broadcast %1470 : f32 to vector<8x128xf32>
    %1474 = arith.mulf %1473, %1472 : vector<8x128xf32>
    %1475 = arith.addf %1469, %1474 : vector<8x128xf32>
    %c1_386 = arith.constant 1 : index
    %c27_387 = arith.constant 27 : index
    %1476 = memref.load %arg6[%c1_386, %c27_387] : memref<8x28xf32, #tpu.memory_space<smem>>
    %1477 = vector.extract_strided_slice %1433 {offsets = [3, 0, 0], sizes = [1, 8, 128], strides = [1, 1, 1]} : vector<4x8x128xf32> to vector<1x8x128xf32>
    %1478 = vector.shape_cast %1477 : vector<1x8x128xf32> to vector<8x128xf32>
    %1479 = vector.broadcast %1476 : f32 to vector<8x128xf32>
    %1480 = arith.mulf %1479, %1478 : vector<8x128xf32>
    %1481 = arith.addf %1475, %1480 : vector<8x128xf32>
    %c2_388 = arith.constant 2 : index
    %c24_389 = arith.constant 24 : index
    %1482 = memref.load %arg6[%c2_388, %c24_389] : memref<8x28xf32, #tpu.memory_space<smem>>
    %1483 = vector.extract_strided_slice %1433 {offsets = [0, 0, 0], sizes = [1, 8, 128], strides = [1, 1, 1]} : vector<4x8x128xf32> to vector<1x8x128xf32>
    %1484 = vector.shape_cast %1483 : vector<1x8x128xf32> to vector<8x128xf32>
    %1485 = vector.broadcast %1482 : f32 to vector<8x128xf32>
    %1486 = arith.mulf %1485, %1484 : vector<8x128xf32>
    %1487 = arith.addf %1266, %1486 : vector<8x128xf32>
    %c2_390 = arith.constant 2 : index
    %c25_391 = arith.constant 25 : index
    %1488 = memref.load %arg6[%c2_390, %c25_391] : memref<8x28xf32, #tpu.memory_space<smem>>
    %1489 = vector.extract_strided_slice %1433 {offsets = [1, 0, 0], sizes = [1, 8, 128], strides = [1, 1, 1]} : vector<4x8x128xf32> to vector<1x8x128xf32>
    %1490 = vector.shape_cast %1489 : vector<1x8x128xf32> to vector<8x128xf32>
    %1491 = vector.broadcast %1488 : f32 to vector<8x128xf32>
    %1492 = arith.mulf %1491, %1490 : vector<8x128xf32>
    %1493 = arith.addf %1487, %1492 : vector<8x128xf32>
    %c2_392 = arith.constant 2 : index
    %c26_393 = arith.constant 26 : index
    %1494 = memref.load %arg6[%c2_392, %c26_393] : memref<8x28xf32, #tpu.memory_space<smem>>
    %1495 = vector.extract_strided_slice %1433 {offsets = [2, 0, 0], sizes = [1, 8, 128], strides = [1, 1, 1]} : vector<4x8x128xf32> to vector<1x8x128xf32>
    %1496 = vector.shape_cast %1495 : vector<1x8x128xf32> to vector<8x128xf32>
    %1497 = vector.broadcast %1494 : f32 to vector<8x128xf32>
    %1498 = arith.mulf %1497, %1496 : vector<8x128xf32>
    %1499 = arith.addf %1493, %1498 : vector<8x128xf32>
    %c2_394 = arith.constant 2 : index
    %c27_395 = arith.constant 27 : index
    %1500 = memref.load %arg6[%c2_394, %c27_395] : memref<8x28xf32, #tpu.memory_space<smem>>
    %1501 = vector.extract_strided_slice %1433 {offsets = [3, 0, 0], sizes = [1, 8, 128], strides = [1, 1, 1]} : vector<4x8x128xf32> to vector<1x8x128xf32>
    %1502 = vector.shape_cast %1501 : vector<1x8x128xf32> to vector<8x128xf32>
    %1503 = vector.broadcast %1500 : f32 to vector<8x128xf32>
    %1504 = arith.mulf %1503, %1502 : vector<8x128xf32>
    %1505 = arith.addf %1499, %1504 : vector<8x128xf32>
    %c3_396 = arith.constant 3 : index
    %c24_397 = arith.constant 24 : index
    %1506 = memref.load %arg6[%c3_396, %c24_397] : memref<8x28xf32, #tpu.memory_space<smem>>
    %1507 = vector.extract_strided_slice %1433 {offsets = [0, 0, 0], sizes = [1, 8, 128], strides = [1, 1, 1]} : vector<4x8x128xf32> to vector<1x8x128xf32>
    %1508 = vector.shape_cast %1507 : vector<1x8x128xf32> to vector<8x128xf32>
    %1509 = vector.broadcast %1506 : f32 to vector<8x128xf32>
    %1510 = arith.mulf %1509, %1508 : vector<8x128xf32>
    %1511 = arith.addf %1290, %1510 : vector<8x128xf32>
    %c3_398 = arith.constant 3 : index
    %c25_399 = arith.constant 25 : index
    %1512 = memref.load %arg6[%c3_398, %c25_399] : memref<8x28xf32, #tpu.memory_space<smem>>
    %1513 = vector.extract_strided_slice %1433 {offsets = [1, 0, 0], sizes = [1, 8, 128], strides = [1, 1, 1]} : vector<4x8x128xf32> to vector<1x8x128xf32>
    %1514 = vector.shape_cast %1513 : vector<1x8x128xf32> to vector<8x128xf32>
    %1515 = vector.broadcast %1512 : f32 to vector<8x128xf32>
    %1516 = arith.mulf %1515, %1514 : vector<8x128xf32>
    %1517 = arith.addf %1511, %1516 : vector<8x128xf32>
    %c3_400 = arith.constant 3 : index
    %c26_401 = arith.constant 26 : index
    %1518 = memref.load %arg6[%c3_400, %c26_401] : memref<8x28xf32, #tpu.memory_space<smem>>
    %1519 = vector.extract_strided_slice %1433 {offsets = [2, 0, 0], sizes = [1, 8, 128], strides = [1, 1, 1]} : vector<4x8x128xf32> to vector<1x8x128xf32>
    %1520 = vector.shape_cast %1519 : vector<1x8x128xf32> to vector<8x128xf32>
    %1521 = vector.broadcast %1518 : f32 to vector<8x128xf32>
    %1522 = arith.mulf %1521, %1520 : vector<8x128xf32>
    %1523 = arith.addf %1517, %1522 : vector<8x128xf32>
    %c3_402 = arith.constant 3 : index
    %c27_403 = arith.constant 27 : index
    %1524 = memref.load %arg6[%c3_402, %c27_403] : memref<8x28xf32, #tpu.memory_space<smem>>
    %1525 = vector.extract_strided_slice %1433 {offsets = [3, 0, 0], sizes = [1, 8, 128], strides = [1, 1, 1]} : vector<4x8x128xf32> to vector<1x8x128xf32>
    %1526 = vector.shape_cast %1525 : vector<1x8x128xf32> to vector<8x128xf32>
    %1527 = vector.broadcast %1524 : f32 to vector<8x128xf32>
    %1528 = arith.mulf %1527, %1526 : vector<8x128xf32>
    %1529 = arith.addf %1523, %1528 : vector<8x128xf32>
    %c4_404 = arith.constant 4 : index
    %c24_405 = arith.constant 24 : index
    %1530 = memref.load %arg6[%c4_404, %c24_405] : memref<8x28xf32, #tpu.memory_space<smem>>
    %1531 = vector.extract_strided_slice %1433 {offsets = [0, 0, 0], sizes = [1, 8, 128], strides = [1, 1, 1]} : vector<4x8x128xf32> to vector<1x8x128xf32>
    %1532 = vector.shape_cast %1531 : vector<1x8x128xf32> to vector<8x128xf32>
    %1533 = vector.broadcast %1530 : f32 to vector<8x128xf32>
    %1534 = arith.mulf %1533, %1532 : vector<8x128xf32>
    %1535 = arith.addf %1314, %1534 : vector<8x128xf32>
    %c4_406 = arith.constant 4 : index
    %c25_407 = arith.constant 25 : index
    %1536 = memref.load %arg6[%c4_406, %c25_407] : memref<8x28xf32, #tpu.memory_space<smem>>
    %1537 = vector.extract_strided_slice %1433 {offsets = [1, 0, 0], sizes = [1, 8, 128], strides = [1, 1, 1]} : vector<4x8x128xf32> to vector<1x8x128xf32>
    %1538 = vector.shape_cast %1537 : vector<1x8x128xf32> to vector<8x128xf32>
    %1539 = vector.broadcast %1536 : f32 to vector<8x128xf32>
    %1540 = arith.mulf %1539, %1538 : vector<8x128xf32>
    %1541 = arith.addf %1535, %1540 : vector<8x128xf32>
    %c4_408 = arith.constant 4 : index
    %c26_409 = arith.constant 26 : index
    %1542 = memref.load %arg6[%c4_408, %c26_409] : memref<8x28xf32, #tpu.memory_space<smem>>
    %1543 = vector.extract_strided_slice %1433 {offsets = [2, 0, 0], sizes = [1, 8, 128], strides = [1, 1, 1]} : vector<4x8x128xf32> to vector<1x8x128xf32>
    %1544 = vector.shape_cast %1543 : vector<1x8x128xf32> to vector<8x128xf32>
    %1545 = vector.broadcast %1542 : f32 to vector<8x128xf32>
    %1546 = arith.mulf %1545, %1544 : vector<8x128xf32>
    %1547 = arith.addf %1541, %1546 : vector<8x128xf32>
    %c4_410 = arith.constant 4 : index
    %c27_411 = arith.constant 27 : index
    %1548 = memref.load %arg6[%c4_410, %c27_411] : memref<8x28xf32, #tpu.memory_space<smem>>
    %1549 = vector.extract_strided_slice %1433 {offsets = [3, 0, 0], sizes = [1, 8, 128], strides = [1, 1, 1]} : vector<4x8x128xf32> to vector<1x8x128xf32>
    %1550 = vector.shape_cast %1549 : vector<1x8x128xf32> to vector<8x128xf32>
    %1551 = vector.broadcast %1548 : f32 to vector<8x128xf32>
    %1552 = arith.mulf %1551, %1550 : vector<8x128xf32>
    %1553 = arith.addf %1547, %1552 : vector<8x128xf32>
    %c5_412 = arith.constant 5 : index
    %c24_413 = arith.constant 24 : index
    %1554 = memref.load %arg6[%c5_412, %c24_413] : memref<8x28xf32, #tpu.memory_space<smem>>
    %1555 = vector.extract_strided_slice %1433 {offsets = [0, 0, 0], sizes = [1, 8, 128], strides = [1, 1, 1]} : vector<4x8x128xf32> to vector<1x8x128xf32>
    %1556 = vector.shape_cast %1555 : vector<1x8x128xf32> to vector<8x128xf32>
    %1557 = vector.broadcast %1554 : f32 to vector<8x128xf32>
    %1558 = arith.mulf %1557, %1556 : vector<8x128xf32>
    %1559 = arith.addf %1338, %1558 : vector<8x128xf32>
    %c5_414 = arith.constant 5 : index
    %c25_415 = arith.constant 25 : index
    %1560 = memref.load %arg6[%c5_414, %c25_415] : memref<8x28xf32, #tpu.memory_space<smem>>
    %1561 = vector.extract_strided_slice %1433 {offsets = [1, 0, 0], sizes = [1, 8, 128], strides = [1, 1, 1]} : vector<4x8x128xf32> to vector<1x8x128xf32>
    %1562 = vector.shape_cast %1561 : vector<1x8x128xf32> to vector<8x128xf32>
    %1563 = vector.broadcast %1560 : f32 to vector<8x128xf32>
    %1564 = arith.mulf %1563, %1562 : vector<8x128xf32>
    %1565 = arith.addf %1559, %1564 : vector<8x128xf32>
    %c5_416 = arith.constant 5 : index
    %c26_417 = arith.constant 26 : index
    %1566 = memref.load %arg6[%c5_416, %c26_417] : memref<8x28xf32, #tpu.memory_space<smem>>
    %1567 = vector.extract_strided_slice %1433 {offsets = [2, 0, 0], sizes = [1, 8, 128], strides = [1, 1, 1]} : vector<4x8x128xf32> to vector<1x8x128xf32>
    %1568 = vector.shape_cast %1567 : vector<1x8x128xf32> to vector<8x128xf32>
    %1569 = vector.broadcast %1566 : f32 to vector<8x128xf32>
    %1570 = arith.mulf %1569, %1568 : vector<8x128xf32>
    %1571 = arith.addf %1565, %1570 : vector<8x128xf32>
    %c5_418 = arith.constant 5 : index
    %c27_419 = arith.constant 27 : index
    %1572 = memref.load %arg6[%c5_418, %c27_419] : memref<8x28xf32, #tpu.memory_space<smem>>
    %1573 = vector.extract_strided_slice %1433 {offsets = [3, 0, 0], sizes = [1, 8, 128], strides = [1, 1, 1]} : vector<4x8x128xf32> to vector<1x8x128xf32>
    %1574 = vector.shape_cast %1573 : vector<1x8x128xf32> to vector<8x128xf32>
    %1575 = vector.broadcast %1572 : f32 to vector<8x128xf32>
    %1576 = arith.mulf %1575, %1574 : vector<8x128xf32>
    %1577 = arith.addf %1571, %1576 : vector<8x128xf32>
    %c6_420 = arith.constant 6 : index
    %c24_421 = arith.constant 24 : index
    %1578 = memref.load %arg6[%c6_420, %c24_421] : memref<8x28xf32, #tpu.memory_space<smem>>
    %1579 = vector.extract_strided_slice %1433 {offsets = [0, 0, 0], sizes = [1, 8, 128], strides = [1, 1, 1]} : vector<4x8x128xf32> to vector<1x8x128xf32>
    %1580 = vector.shape_cast %1579 : vector<1x8x128xf32> to vector<8x128xf32>
    %1581 = vector.broadcast %1578 : f32 to vector<8x128xf32>
    %1582 = arith.mulf %1581, %1580 : vector<8x128xf32>
    %1583 = arith.addf %1362, %1582 : vector<8x128xf32>
    %c6_422 = arith.constant 6 : index
    %c25_423 = arith.constant 25 : index
    %1584 = memref.load %arg6[%c6_422, %c25_423] : memref<8x28xf32, #tpu.memory_space<smem>>
    %1585 = vector.extract_strided_slice %1433 {offsets = [1, 0, 0], sizes = [1, 8, 128], strides = [1, 1, 1]} : vector<4x8x128xf32> to vector<1x8x128xf32>
    %1586 = vector.shape_cast %1585 : vector<1x8x128xf32> to vector<8x128xf32>
    %1587 = vector.broadcast %1584 : f32 to vector<8x128xf32>
    %1588 = arith.mulf %1587, %1586 : vector<8x128xf32>
    %1589 = arith.addf %1583, %1588 : vector<8x128xf32>
    %c6_424 = arith.constant 6 : index
    %c26_425 = arith.constant 26 : index
    %1590 = memref.load %arg6[%c6_424, %c26_425] : memref<8x28xf32, #tpu.memory_space<smem>>
    %1591 = vector.extract_strided_slice %1433 {offsets = [2, 0, 0], sizes = [1, 8, 128], strides = [1, 1, 1]} : vector<4x8x128xf32> to vector<1x8x128xf32>
    %1592 = vector.shape_cast %1591 : vector<1x8x128xf32> to vector<8x128xf32>
    %1593 = vector.broadcast %1590 : f32 to vector<8x128xf32>
    %1594 = arith.mulf %1593, %1592 : vector<8x128xf32>
    %1595 = arith.addf %1589, %1594 : vector<8x128xf32>
    %c6_426 = arith.constant 6 : index
    %c27_427 = arith.constant 27 : index
    %1596 = memref.load %arg6[%c6_426, %c27_427] : memref<8x28xf32, #tpu.memory_space<smem>>
    %1597 = vector.extract_strided_slice %1433 {offsets = [3, 0, 0], sizes = [1, 8, 128], strides = [1, 1, 1]} : vector<4x8x128xf32> to vector<1x8x128xf32>
    %1598 = vector.shape_cast %1597 : vector<1x8x128xf32> to vector<8x128xf32>
    %1599 = vector.broadcast %1596 : f32 to vector<8x128xf32>
    %1600 = arith.mulf %1599, %1598 : vector<8x128xf32>
    %1601 = arith.addf %1595, %1600 : vector<8x128xf32>
    %c7_428 = arith.constant 7 : index
    %c24_429 = arith.constant 24 : index
    %1602 = memref.load %arg6[%c7_428, %c24_429] : memref<8x28xf32, #tpu.memory_space<smem>>
    %1603 = vector.extract_strided_slice %1433 {offsets = [0, 0, 0], sizes = [1, 8, 128], strides = [1, 1, 1]} : vector<4x8x128xf32> to vector<1x8x128xf32>
    %1604 = vector.shape_cast %1603 : vector<1x8x128xf32> to vector<8x128xf32>
    %1605 = vector.broadcast %1602 : f32 to vector<8x128xf32>
    %1606 = arith.mulf %1605, %1604 : vector<8x128xf32>
    %1607 = arith.addf %1386, %1606 : vector<8x128xf32>
    %c7_430 = arith.constant 7 : index
    %c25_431 = arith.constant 25 : index
    %1608 = memref.load %arg6[%c7_430, %c25_431] : memref<8x28xf32, #tpu.memory_space<smem>>
    %1609 = vector.extract_strided_slice %1433 {offsets = [1, 0, 0], sizes = [1, 8, 128], strides = [1, 1, 1]} : vector<4x8x128xf32> to vector<1x8x128xf32>
    %1610 = vector.shape_cast %1609 : vector<1x8x128xf32> to vector<8x128xf32>
    %1611 = vector.broadcast %1608 : f32 to vector<8x128xf32>
    %1612 = arith.mulf %1611, %1610 : vector<8x128xf32>
    %1613 = arith.addf %1607, %1612 : vector<8x128xf32>
    %c7_432 = arith.constant 7 : index
    %c26_433 = arith.constant 26 : index
    %1614 = memref.load %arg6[%c7_432, %c26_433] : memref<8x28xf32, #tpu.memory_space<smem>>
    %1615 = vector.extract_strided_slice %1433 {offsets = [2, 0, 0], sizes = [1, 8, 128], strides = [1, 1, 1]} : vector<4x8x128xf32> to vector<1x8x128xf32>
    %1616 = vector.shape_cast %1615 : vector<1x8x128xf32> to vector<8x128xf32>
    %1617 = vector.broadcast %1614 : f32 to vector<8x128xf32>
    %1618 = arith.mulf %1617, %1616 : vector<8x128xf32>
    %1619 = arith.addf %1613, %1618 : vector<8x128xf32>
    %c7_434 = arith.constant 7 : index
    %c27_435 = arith.constant 27 : index
    %1620 = memref.load %arg6[%c7_434, %c27_435] : memref<8x28xf32, #tpu.memory_space<smem>>
    %1621 = vector.extract_strided_slice %1433 {offsets = [3, 0, 0], sizes = [1, 8, 128], strides = [1, 1, 1]} : vector<4x8x128xf32> to vector<1x8x128xf32>
    %1622 = vector.shape_cast %1621 : vector<1x8x128xf32> to vector<8x128xf32>
    %1623 = vector.broadcast %1620 : f32 to vector<8x128xf32>
    %1624 = arith.mulf %1623, %1622 : vector<8x128xf32>
    %1625 = arith.addf %1619, %1624 : vector<8x128xf32>
    %c0_436 = arith.constant 0 : index
    %1626 = memref.load %arg7[%c0_436] : memref<8xf32, #tpu.memory_space<smem>>
    %1627 = vector.broadcast %1626 : f32 to vector<8x128xf32>
    %1628 = arith.addf %1457, %1627 : vector<8x128xf32>
    %cst = arith.constant 0.000000e+00 : f32
    %1629 = vector.broadcast %cst : f32 to vector<8x128xf32>
    %1630 = arith.maximumf %1628, %1629 : vector<8x128xf32>
    %c0_437 = arith.constant 0 : index
    %c0_438 = arith.constant 0 : index
    %c0_439 = arith.constant 0 : index
    %c0_440 = arith.constant 0 : index
    %1631 = vector.load %arg8[%c0_437, %c0_438, %c0_439, %c0_440] : memref<1x8x8x128xf32, #tpu.memory_space<vmem>>, vector<1x1x8x128xf32>
    %1632 = vector.shape_cast %1631 : vector<1x1x8x128xf32> to vector<8x128xf32>
    %1633 = vector.shape_cast %1630 : vector<8x128xf32> to vector<1x1x8x128xf32>
    tpu.vector_store %arg8[%c0_437, %c0_438, %c0_439, %c0_440], %1633 {strides = array<i32>} : memref<1x8x8x128xf32, #tpu.memory_space<vmem>>, vector<1x1x8x128xf32>,
    %c1_441 = arith.constant 1 : index
    %1634 = memref.load %arg7[%c1_441] : memref<8xf32, #tpu.memory_space<smem>>
    %1635 = vector.broadcast %1634 : f32 to vector<8x128xf32>
    %1636 = arith.addf %1481, %1635 : vector<8x128xf32>
    %cst_442 = arith.constant 0.000000e+00 : f32
    %1637 = vector.broadcast %cst_442 : f32 to vector<8x128xf32>
    %1638 = arith.maximumf %1636, %1637 : vector<8x128xf32>
    %c0_443 = arith.constant 0 : index
    %c1_444 = arith.constant 1 : index
    %c0_445 = arith.constant 0 : index
    %c0_446 = arith.constant 0 : index
    %1639 = vector.load %arg8[%c0_443, %c1_444, %c0_445, %c0_446] : memref<1x8x8x128xf32, #tpu.memory_space<vmem>>, vector<1x1x8x128xf32>
    %1640 = vector.shape_cast %1639 : vector<1x1x8x128xf32> to vector<8x128xf32>
    %1641 = vector.shape_cast %1638 : vector<8x128xf32> to vector<1x1x8x128xf32>
    tpu.vector_store %arg8[%c0_443, %c1_444, %c0_445, %c0_446], %1641 {strides = array<i32>} : memref<1x8x8x128xf32, #tpu.memory_space<vmem>>, vector<1x1x8x128xf32>,
    %c2_447 = arith.constant 2 : index
    %1642 = memref.load %arg7[%c2_447] : memref<8xf32, #tpu.memory_space<smem>>
    %1643 = vector.broadcast %1642 : f32 to vector<8x128xf32>
    %1644 = arith.addf %1505, %1643 : vector<8x128xf32>
    %cst_448 = arith.constant 0.000000e+00 : f32
    %1645 = vector.broadcast %cst_448 : f32 to vector<8x128xf32>
    %1646 = arith.maximumf %1644, %1645 : vector<8x128xf32>
    %c0_449 = arith.constant 0 : index
    %c2_450 = arith.constant 2 : index
    %c0_451 = arith.constant 0 : index
    %c0_452 = arith.constant 0 : index
    %1647 = vector.load %arg8[%c0_449, %c2_450, %c0_451, %c0_452] : memref<1x8x8x128xf32, #tpu.memory_space<vmem>>, vector<1x1x8x128xf32>
    %1648 = vector.shape_cast %1647 : vector<1x1x8x128xf32> to vector<8x128xf32>
    %1649 = vector.shape_cast %1646 : vector<8x128xf32> to vector<1x1x8x128xf32>
    tpu.vector_store %arg8[%c0_449, %c2_450, %c0_451, %c0_452], %1649 {strides = array<i32>} : memref<1x8x8x128xf32, #tpu.memory_space<vmem>>, vector<1x1x8x128xf32>,
    %c3_453 = arith.constant 3 : index
    %1650 = memref.load %arg7[%c3_453] : memref<8xf32, #tpu.memory_space<smem>>
    %1651 = vector.broadcast %1650 : f32 to vector<8x128xf32>
    %1652 = arith.addf %1529, %1651 : vector<8x128xf32>
    %cst_454 = arith.constant 0.000000e+00 : f32
    %1653 = vector.broadcast %cst_454 : f32 to vector<8x128xf32>
    %1654 = arith.maximumf %1652, %1653 : vector<8x128xf32>
    %c0_455 = arith.constant 0 : index
    %c3_456 = arith.constant 3 : index
    %c0_457 = arith.constant 0 : index
    %c0_458 = arith.constant 0 : index
    %1655 = vector.load %arg8[%c0_455, %c3_456, %c0_457, %c0_458] : memref<1x8x8x128xf32, #tpu.memory_space<vmem>>, vector<1x1x8x128xf32>
    %1656 = vector.shape_cast %1655 : vector<1x1x8x128xf32> to vector<8x128xf32>
    %1657 = vector.shape_cast %1654 : vector<8x128xf32> to vector<1x1x8x128xf32>
    tpu.vector_store %arg8[%c0_455, %c3_456, %c0_457, %c0_458], %1657 {strides = array<i32>} : memref<1x8x8x128xf32, #tpu.memory_space<vmem>>, vector<1x1x8x128xf32>,
    %c4_459 = arith.constant 4 : index
    %1658 = memref.load %arg7[%c4_459] : memref<8xf32, #tpu.memory_space<smem>>
    %1659 = vector.broadcast %1658 : f32 to vector<8x128xf32>
    %1660 = arith.addf %1553, %1659 : vector<8x128xf32>
    %cst_460 = arith.constant 0.000000e+00 : f32
    %1661 = vector.broadcast %cst_460 : f32 to vector<8x128xf32>
    %1662 = arith.maximumf %1660, %1661 : vector<8x128xf32>
    %c0_461 = arith.constant 0 : index
    %c4_462 = arith.constant 4 : index
    %c0_463 = arith.constant 0 : index
    %c0_464 = arith.constant 0 : index
    %1663 = vector.load %arg8[%c0_461, %c4_462, %c0_463, %c0_464] : memref<1x8x8x128xf32, #tpu.memory_space<vmem>>, vector<1x1x8x128xf32>
    %1664 = vector.shape_cast %1663 : vector<1x1x8x128xf32> to vector<8x128xf32>
    %1665 = vector.shape_cast %1662 : vector<8x128xf32> to vector<1x1x8x128xf32>
    tpu.vector_store %arg8[%c0_461, %c4_462, %c0_463, %c0_464], %1665 {strides = array<i32>} : memref<1x8x8x128xf32, #tpu.memory_space<vmem>>, vector<1x1x8x128xf32>,
    %c5_465 = arith.constant 5 : index
    %1666 = memref.load %arg7[%c5_465] : memref<8xf32, #tpu.memory_space<smem>>
    %1667 = vector.broadcast %1666 : f32 to vector<8x128xf32>
    %1668 = arith.addf %1577, %1667 : vector<8x128xf32>
    %cst_466 = arith.constant 0.000000e+00 : f32
    %1669 = vector.broadcast %cst_466 : f32 to vector<8x128xf32>
    %1670 = arith.maximumf %1668, %1669 : vector<8x128xf32>
    %c0_467 = arith.constant 0 : index
    %c5_468 = arith.constant 5 : index
    %c0_469 = arith.constant 0 : index
    %c0_470 = arith.constant 0 : index
    %1671 = vector.load %arg8[%c0_467, %c5_468, %c0_469, %c0_470] : memref<1x8x8x128xf32, #tpu.memory_space<vmem>>, vector<1x1x8x128xf32>
    %1672 = vector.shape_cast %1671 : vector<1x1x8x128xf32> to vector<8x128xf32>
    %1673 = vector.shape_cast %1670 : vector<8x128xf32> to vector<1x1x8x128xf32>
    tpu.vector_store %arg8[%c0_467, %c5_468, %c0_469, %c0_470], %1673 {strides = array<i32>} : memref<1x8x8x128xf32, #tpu.memory_space<vmem>>, vector<1x1x8x128xf32>,
    %c6_471 = arith.constant 6 : index
    %1674 = memref.load %arg7[%c6_471] : memref<8xf32, #tpu.memory_space<smem>>
    %1675 = vector.broadcast %1674 : f32 to vector<8x128xf32>
    %1676 = arith.addf %1601, %1675 : vector<8x128xf32>
    %cst_472 = arith.constant 0.000000e+00 : f32
    %1677 = vector.broadcast %cst_472 : f32 to vector<8x128xf32>
    %1678 = arith.maximumf %1676, %1677 : vector<8x128xf32>
    %c0_473 = arith.constant 0 : index
    %c6_474 = arith.constant 6 : index
    %c0_475 = arith.constant 0 : index
    %c0_476 = arith.constant 0 : index
    %1679 = vector.load %arg8[%c0_473, %c6_474, %c0_475, %c0_476] : memref<1x8x8x128xf32, #tpu.memory_space<vmem>>, vector<1x1x8x128xf32>
    %1680 = vector.shape_cast %1679 : vector<1x1x8x128xf32> to vector<8x128xf32>
    %1681 = vector.shape_cast %1678 : vector<8x128xf32> to vector<1x1x8x128xf32>
    tpu.vector_store %arg8[%c0_473, %c6_474, %c0_475, %c0_476], %1681 {strides = array<i32>} : memref<1x8x8x128xf32, #tpu.memory_space<vmem>>, vector<1x1x8x128xf32>,
    %c7_477 = arith.constant 7 : index
    %1682 = memref.load %arg7[%c7_477] : memref<8xf32, #tpu.memory_space<smem>>
    %1683 = vector.broadcast %1682 : f32 to vector<8x128xf32>
    %1684 = arith.addf %1625, %1683 : vector<8x128xf32>
    %cst_478 = arith.constant 0.000000e+00 : f32
    %1685 = vector.broadcast %cst_478 : f32 to vector<8x128xf32>
    %1686 = arith.maximumf %1684, %1685 : vector<8x128xf32>
    %c0_479 = arith.constant 0 : index
    %c7_480 = arith.constant 7 : index
    %c0_481 = arith.constant 0 : index
    %c0_482 = arith.constant 0 : index
    %1687 = vector.load %arg8[%c0_479, %c7_480, %c0_481, %c0_482] : memref<1x8x8x128xf32, #tpu.memory_space<vmem>>, vector<1x1x8x128xf32>
    %1688 = vector.shape_cast %1687 : vector<1x1x8x128xf32> to vector<8x128xf32>
    %1689 = vector.shape_cast %1686 : vector<8x128xf32> to vector<1x1x8x128xf32>
    tpu.vector_store %arg8[%c0_479, %c7_480, %c0_481, %c0_482], %1689 {strides = array<i32>} : memref<1x8x8x128xf32, #tpu.memory_space<vmem>>, vector<1x1x8x128xf32>,
    return
  }
  func.func @transform_0(%arg0: i32, %arg1: i32) -> (i32, i32, i32, i32) {
    %c0_i32 = arith.constant 0 : i32
    %c0_i32_0 = arith.constant 0 : i32
    %c0_i32_1 = arith.constant 0 : i32
    return %arg0, %c0_i32, %c0_i32_0, %arg1 : i32, i32, i32, i32
  }
  func.func @transform_1(%arg0: i32, %arg1: i32) -> (i32, i32, i32, i32) {
    %c0_i32 = arith.constant 0 : i32
    %c0_i32_0 = arith.constant 0 : i32
    %c0_i32_1 = arith.constant 0 : i32
    return %arg0, %c0_i32, %c0_i32_0, %arg1 : i32, i32, i32, i32
  }
  func.func @transform_2(%arg0: i32, %arg1: i32) -> (i32, i32, i32, i32) {
    %c0_i32 = arith.constant 0 : i32
    %c0_i32_0 = arith.constant 0 : i32
    %c0_i32_1 = arith.constant 0 : i32
    return %arg0, %c0_i32, %c0_i32_0, %arg1 : i32, i32, i32, i32
  }
  func.func @transform_3(%arg0: i32, %arg1: i32) -> (i32, i32, i32, i32) {
    %c0_i32 = arith.constant 0 : i32
    %c0_i32_0 = arith.constant 0 : i32
    %c0_i32_1 = arith.constant 0 : i32
    return %arg0, %c0_i32, %c0_i32_0, %arg1 : i32, i32, i32, i32
  }
  func.func @transform_4(%arg0: i32, %arg1: i32) -> (i32, i32) {
    %c0_i32 = arith.constant 0 : i32
    %c0_i32_0 = arith.constant 0 : i32
    %c0_i32_1 = arith.constant 0 : i32
    return %c0_i32, %c0_i32_0 : i32, i32
  }
  func.func @transform_5(%arg0: i32, %arg1: i32) -> i32 {
    %c0_i32 = arith.constant 0 : i32
    %c0_i32_0 = arith.constant 0 : i32
    return %c0_i32 : i32
  }
  func.func @transform_6(%arg0: i32, %arg1: i32) -> (i32, i32, i32, i32) {
    %c0_i32 = arith.constant 0 : i32
    %c0_i32_0 = arith.constant 0 : i32
    %c0_i32_1 = arith.constant 0 : i32
    return %arg0, %c0_i32, %c0_i32_0, %arg1 : i32, i32, i32, i32
  }
}

</mosaic_0001>

<bundles_post_ra>
// kernel: tpu_custom_call.1
= control target key start
LH: loop header
LB: loop body
LE: loop exit
PB: predicated region body
PF: predicated region fallthrough
CT: control target
= control target key end

     0   :  { %s5384_s0 = inlined_call_operand.hbm [shape: f32[2,4,8,512], index: 0, kind: input, shape index: {}]   ;;  %s5385_s1 = inlined_call_operand.hbm [shape: f32[2,8,8,512], index: 1, kind: input, shape index: {}]   ;;  %s5386_s2 = inlined_call_operand.hbm [shape: f32[2,8,8,512], index: 2, kind: input, shape index: {}]   ;;  %s5387_s3 = inlined_call_operand.hbm [shape: f32[2,8,8,512], index: 3, kind: input, shape index: {}]   ;;  %s5388_s4 = inlined_call_operand.vmem [shape: f32[8,28], index: 4, kind: input, shape index: {}]   ;;  %s5389_s5 = inlined_call_operand.vmem [shape: f32[8], index: 5, kind: input, shape index: {}]   ;;  %s5390_s6 = inlined_call_operand.hbm [shape: f32[2,8,8,512], index: 6, kind: output, shape index: {}]  }
   0x1   :  { %5449 = sst [smem:[#allocation46_spill]] %s5384_s0 }
   0x2   :  { %5450 = sst [smem:[#allocation47_spill]] %s5385_s1 }
   0x3   :  { %5451 = sst [smem:[#allocation48_spill]] %s5388_s4 }
   0x4   :  { %5452 = sst [smem:[#allocation49_spill]] %s5389_s5 }
   0x5   :  { %11 = vsyncpa [#allocation3], 0 }
   0x6   :  { %13 = vsyncpa [#allocation3 + $0x1], 0 }
   0x7   :  { %14 = vsyncpa [#allocation7], 0 }
   0x8   :  { %16 = vsyncpa [#allocation7 + $0x1], 0 }
   0x9   :  { %17 = vsyncpa [#allocation10], 0 }
   0xa   :  { %19 = vsyncpa [#allocation10 + $0x1], 0 }
   0xb   :  { %20 = vsyncpa [#allocation5], 0 }
   0xc   :  { %21 = vsyncpa [#allocation13], 0 }
   0xd   :  { %22 = vsyncpa [#allocation4], 0 }
   0xe   :  { %24 = vsyncpa [#allocation4 + $0x1], 0  ;;  %s3174_s21 = smov 0   ;;  %s3176_s22 = smov 0  }
   0xf   :  { %s3178_s23 = smov 0   ;;  %s3180_s24 = smov 0  }
  0x10   :  { %s3182_s25 = smov 0   ;;  %s3184_s26 = smov 0  }
  0x11   :  { %s3186_s27 = smov 0   ;;  %s3188_s28 = smov 0  }
  0x12 LB: > { %5453 = sst [smem:[#allocation21_spill]] %s3096_s21  ;;  %s39_s29 = sadd.s32 1, %s3116_s26  ;;  %s3124_s28 = sphi %s3188_s28, %s30_s28   ;;  %s3120_s27 = sphi %s3186_s27, %s5550_s27   ;;  %s3116_s26 = sphi %s3184_s26, %s5549_s26   ;;  %s3112_s25 = sphi %s3182_s25, %s5548_s25   ;;  %s3108_s24 = sphi %s3180_s24, %s5547_s24   ;;  %s3104_s23 = sphi %s3178_s23, %s5542_s23   ;;  %s3100_s22 = sphi %s3176_s22, %s5546_s22   ;;  %s3096_s21 = sphi %s3174_s21, %s5545_s21  }
  0x13   : > { %5454 = sst [smem:[#allocation22_spill]] %s3104_s23  ;;  %s42_s30 = sadd.s32 1, %s3120_s27 }
  0x14   : > { %5455 = sst [smem:[#allocation23_spill]] %s3124_s28  ;;  %p40_p0 = scmp.ge.s32.totalorder %s39_s29, 4 }
  0x15   : > { %s51_s7 = sadd.s32 1, %s3104_s23  ;;  %p5393_p1 = scmp.ne.s32.totalorder %s3104_s23, %s3100_s22 }
  0x16   : > { %p59_p2 = scmp.eq.s32.totalorder %s3124_s28, 0  ;;  %s5552_s29 = smov (%p40_p0, %s39_s29), 0 }
  0x17   : > { %5456 = sst [smem:[#allocation24_spill]] %s5552_s29  ;;  %s5554_s30 = smov (!%p40_p0, %s42_s30), %s3120_s27 }
  0x18   : > { %s47_s8 = ssub.s32 %s3116_s26, %s5552_s29  ;;  %p60_p3 = por %p59_p2, %p5393_p1 }
  0x19   : > { %p44_p4 = scmp.ge.s32.totalorder %s5554_s30, 2  ;;  %p2784_p5 = scmp.lt.s32.totalorder %s3124_s28, 8 }
  0x1a   : > { %s3230_s9 = sand.u32 1, %s3104_s23   ;;  %s286_s13 = sand.u32 1, %s3124_s28  }
  0x1b   : > { %s5556_s30 = smov (%p44_p4, %s5554_s30), 0  ;;  %p3234_p6 = pnand %p2784_p5, %p60_p3 }
  0x1c   : > { %5457 = sst [smem:[#allocation25_spill]] %s5556_s30  ;;  %s46_s11 = ssub.s32 %s3120_s27, %s5556_s30 }
  0x1d   : > { %s5458_s10 = scalar_select %p3234_p6, 1, 0 }
  0x1e   : > { %s48_s12 = sor.u32 %s47_s8, %s46_s11  ;;  %s3242_s14 = sshll.u32 %s3230_s9, 6 }
  0x1f   : > { %p49_p7 = scmp.eq.s32.totalorder %s48_s12, 0  ;;  %s2482_s16 = sshll.u32 %s3120_s27, 5 }
  0x20   : > { %s290_s17 = scalar_lea.vmem [#allocation6], %s3242_s14  ;;  %s295_s19 = sadd.s32 %s3116_s26, %s2482_s16 }
  0x21   : > { %s3245_s15 = scalar_select %p49_p7, %s3104_s23, %s51_s7  }
  0x22   : > { %s298_s18 = sshll.u32 %s290_s17, 4  ;;  %s3252_s20 = sshll.u32 %s295_s19, 7  ;;  %s3250_s18 = int_to_ptr.vmem [resolvable:$true] %s298_s18 }
  0x23   : > { %5459 = sst [smem:[#allocation26_spill]] %s3245_s15  ;;  %s5460_s1 = sld [smem:[#allocation47_spill]] }
  0x24   : > { %s3260_s7 = scalar_lea.sflag [#allocation7], %s286_s13  ;;  %p3266_p9 = pneg %p3234_p6 }
  0x26   : > { %s5461_s12 = scalar_select %p3266_p9, 1, 0 }
  0x29   : > { %s3258_s8 = scalar_lea.hbm %s5460_s1, %s3252_s20  ;;  %s2865_s16 = scalar_lea.hbm %s5460_s1, 8192 }
  0x2a   : > { %s2860_s11 = scalar_lea.hbm %s3258_s8, 1024  ;;  %p2866_p12 = scmp.lt.u32.totalorder %s3258_s8, %s5460_s1 }
  0x2b   : > { %p2861_p8 = scmp.ne.s32.totalorder %s3258_s8, %s2860_s11  ;;  %p2867_p13 = scmp.lt.u32.totalorder %s2865_s16, %s2860_s11 }
  0x2c   : > { %p2869_p2 = scmp.lt.u32.totalorder %s2860_s11, %s3258_s8 }
  0x2d   : > { %p2863_p10 = pnand %p3266_p9, %p2861_p8  ;;  %p2868_p0 = por %p2867_p13, %p2866_p12 }
  0x2f   : > { %p2864_p11 = pneg %p2863_p10  ;;  %p2870_p3 = por %p2869_p2, %p2868_p0 }
  0x31   : > { %p2871_p4 = pnand %p2870_p3, %p2864_p11 }
  0x33   : > { %2874 = shalt.err (!%p2871_p4)
}
  0x34   : > { %s2875_s13 = scalar_lea.vmem %s3250_s18, 1024  ;;  %s3126_s29 = smov [#allocation6]  }
  0x35   : > { %p2876_p5 = scmp.ne.s32.totalorder %s3250_s18, %s2875_s13  ;;  %s2880_s30 = sshll.u32 %s3126_s29, 4  ;;  %s2881_s30 = int_to_ptr.vmem [resolvable:$false] %s2880_s30 }
  0x36   : > { %s2882_s17 = scalar_lea.vmem %s2881_s30, 2048  ;;  %p2883_p10 = scmp.lt.s32.totalorder %s3250_s18, %s2881_s30 }
  0x37   : > { %p2878_p7 = pnand %p2876_p5, %p3266_p9  ;;  %p2884_p1 = scmp.lt.s32.totalorder %s2882_s17, %s2875_s13 }
  0x39   : > { %p2879_p8 = pneg %p2878_p7  ;;  %p2885_p12 = por %p2884_p1, %p2883_p10 }
  0x3b   : > { %p2886_p13 = pnand %p2885_p12, %p2879_p8 }
  0x3d   : > { %2889 = shalt.err (!%p2886_p13)
}
  0x3e   : > { %s5394_s11 = smov 512   ;;  %s5396_s16 = smov 128  }
  0x3f   : > { %s5398_s19 = smov 8   ;;  %s3294_s13 = sadd.s32 4294967295, %s3124_s28  }
  0x40   : > { %2771 = dma.hbm_to_vmem [thread:$0]  (!%p3234_p6), %s3258_s8, 1024, %s3250_s18, %s3260_s7, %s5394_s11, %s5396_s16, %s5398_s19  }
  0x41   : > { %s2473_s29 = sadd.s32 4294967294, %s3124_s28   ;;  %p64_p1 = scmp.ne.s32.totalorder %s3100_s22, %s3096_s21 }
  0x42   : > { %p5407_p11 = scmp.eq.s32.totalorder %s3294_s13, 0  ;;  %p216_p0 = scmp.eq.s32.totalorder %s3294_s13, 7 }
  0x43   : > { %p222_p2 = scmp.eq.s32.totalorder %s2473_s29, 7  ;;  %p2474_p4 = scmp.ge.s32.totalorder %s3124_s28, 1 }
  0x44   : > { %p3303_p3 = por %p5407_p11, %p64_p1  ;;  %p5463_p5 = scmp.ne.s32.totalorder %s3104_s23, %s3100_s22 }
  0x45   : > { %p3315_p8 = por %p222_p2, %p64_p1  ;;  %p229_p10 = scmp.lt.s32.totalorder %s3124_s28, 9 }
  0x46   : > { %s5462_s30 = scalar_select %p3303_p3, 1, 0 }
  0x47   : > { %p3311_p7 = por %p216_p0, %p5463_p5  ;;  %s5467_s4 = sld [smem:[#allocation48_spill]] }
  0x48   : > { %s5465_s8 = scalar_select %p3315_p8, 1, 0 }
  0x49   : > { %s5464_s18 = scalar_select %p3311_p7, 1, 0 }
  0x4a   : > { %5466 = sst [smem:[#allocation27_spill]] %s5465_s8  ;;  %p3323_p12 = pnand %p2474_p4, %p229_p10 }
  0x4b   : > { %s5469_s5 = sld [smem:[#allocation49_spill]]  ;;  %s2478_s23 = sshll.u32 %s3230_s9, 5 }
  0x4c   : > { %s5468_s16 = scalar_select %p3323_p12, 1, 0 }
  0x4d   : > { %s242_s29 = sshll.u32 %s5467_s4, 4  ;;  %p2758_p13 = pneg %p3323_p12  ;;  %s243_s29 = int_to_ptr.vmem [resolvable:$true] %s242_s29 }
  0x4e   : > { %s2479_s11 = sshll.u32 %s3120_s27, 4  ;;  %s268_s17 = scalar_lea.vmem [#allocation2], %s2478_s23 }
  0x4f   : > { %p3337_p1 = pnand %p2758_p13, %p5407_p11  ;;  %s276_s4 = sshll.u32 %s268_s17, 4  ;;  %s3354_s4 = int_to_ptr.vmem [resolvable:$true] %s276_s4 }
  0x50   : > { %s273_s21 = sadd.s32 %s3116_s26, %s2479_s11  ;;  %s2890_s28 = scalar_lea.vmem %s243_s29, 128 }
  0x51   : > { %s253_s15 = sshll.u32 %s5469_s5, 4  ;;  %p2891_p0 = scmp.ne.s32.totalorder %s243_s29, %s2890_s28  ;;  %s3332_s15 = int_to_ptr.vmem [resolvable:$true] %s253_s15 }
  0x52   : > { %p2892_p2 = pneg %p3337_p1  ;;  %p2898_p10 = scmp.lt.s32.totalorder %s243_s29, %s243_s29 }
  0x53   : > { %p2899_p8 = scmp.lt.s32.totalorder %s2890_s28, %s2890_s28 }
  0x54   : > { %p2893_p4 = pnand %p2892_p2, %p2891_p0 }
  0x55   : > { %p2900_p7 = por %p2899_p8, %p2898_p10 }
  0x56   : > { %p2894_p5 = pneg %p2893_p4 }
  0x58   : > { %p2901_p3 = pnand %p2900_p7, %p2894_p5 }
  0x5a   : > { %2904 = shalt.err (!%p2901_p3)
}
  0x5b   : > { %s3130_s1 = smov [#allocation11]   ;;  %s2905_s23 = scalar_lea.vmem %s3332_s15, 16 }
  0x5c   : > { %2761 = dma.vmem_to_smem (!%p3337_p1), %s243_s29, 128, %s3130_s1, [#allocation5]  }
  0x5d   : > { %p2906_p13 = scmp.ne.s32.totalorder %s3332_s15, %s2905_s23  ;;  %p2913_p6 = scmp.lt.s32.totalorder %s3332_s15, %s3332_s15 }
  0x5e   : > { %p2914_p0 = scmp.lt.s32.totalorder %s2905_s23, %s2905_s23 }
  0x5f   : > { %p2908_p11 = pnand %p2906_p13, %p2892_p2 }
  0x60   : > { %p2915_p4 = por %p2914_p0, %p2913_p6 }
  0x61   : > { %p2909_p12 = pneg %p2908_p11 }
  0x63   : > { %p2916_p9 = pnand %p2915_p4, %p2909_p12 }
  0x65   : > { %2919 = shalt.err (!%p2916_p9)
}
  0x66   : > { %s3131_s28 = smov [#allocation12]   ;;  %s2480_s19 = sshll.u32 %s273_s21, 7 }
  0x67   : > { %2764 = dma.vmem_to_smem (!%p3337_p1), %s3332_s15, 16, %s3131_s28, [#allocation13]  }
  0x68   : > { %s5471_s0 = sld [smem:[#allocation46_spill]]  ;;  %s265_s1 = scalar_lea.sflag [#allocation3], %s3230_s9 }
  0x69   : > { %p5472_p9 = scmp.ne.s32.totalorder %s5461_s12, 0 }
  0x6e   : > { %s3359_s17 = scalar_lea.hbm %s5471_s0, %s2480_s19  ;;  %s2925_s21 = scalar_lea.hbm %s5471_s0, 4096 }
  0x6f   : > { %s2920_s23 = scalar_lea.hbm %s3359_s17, 512  ;;  %p2926_p7 = scmp.lt.u32.totalorder %s3359_s17, %s5471_s0 }
  0x70   : > { %p2921_p6 = scmp.ne.s32.totalorder %s3359_s17, %s2920_s23  ;;  %p2927_p8 = scmp.lt.u32.totalorder %s2925_s21, %s2920_s23 }
  0x71   : > { %p2929_p1 = scmp.lt.u32.totalorder %s2920_s23, %s3359_s17 }
  0x72   : > { %p2923_p11 = pnand %p2921_p6, %p5472_p9  ;;  %p2928_p12 = por %p2927_p8, %p2926_p7 }
  0x74   : > { %p2924_p3 = pneg %p2923_p11  ;;  %p2930_p2 = por %p2929_p1, %p2928_p12 }
  0x76   : > { %p2931_p5 = pnand %p2930_p2, %p2924_p3 }
  0x78   : > { %2934 = shalt.err (!%p2931_p5)
}
  0x79   : > { %s2935_s19 = scalar_lea.vmem %s3354_s4, 512  ;;  %s3132_s29 = smov [#allocation2]  }
  0x7a   : > { %p2936_p10 = scmp.ne.s32.totalorder %s3354_s4, %s2935_s19  ;;  %s2940_s11 = sshll.u32 %s3132_s29, 4  ;;  %s2941_s11 = int_to_ptr.vmem [resolvable:$false] %s2940_s11 }
  0x7b   : > { %s2942_s5 = scalar_lea.vmem %s2941_s11, 1024  ;;  %p2943_p4 = scmp.lt.s32.totalorder %s3354_s4, %s2941_s11 }
  0x7c   : > { %p2938_p13 = pnand %p2936_p10, %p5472_p9  ;;  %p2944_p6 = scmp.lt.s32.totalorder %s2942_s5, %s2935_s19 }
  0x7e   : > { %p2939_p0 = pneg %p2938_p13  ;;  %p2945_p11 = por %p2944_p6, %p2943_p4 }
  0x80   : > { %p2946_p7 = pnand %p2945_p11, %p2939_p0 }
  0x82   : > { %2949 = shalt.err (!%p2946_p7)
}
  0x83   : > { %p5473_p3 = scmp.ne.s32.totalorder %s5458_s10, 0  ;;  %s5474_s23 = smov 8  }
  0x84   : > { %s5475_s8 = smov 128   ;;  %s5476_s15 = smov 512  }
  0x85   : > { %2768 = dma.hbm_to_vmem [thread:$0]  (!%p5473_p3), %s3359_s17, 512, %s3354_s4, %s265_s1, %s5476_s15, %s5475_s8, %s5474_s23  }
  0x86   : > { %s3392_s19 = scalar_lea.hbm %s5386_s2, %s3252_s20  ;;  %s312_s29 = scalar_lea.vmem [#allocation8], %s3242_s14 }
  0x87   : > { %s320_s11 = sshll.u32 %s312_s29, 4  ;;  %s2950_s5 = scalar_lea.hbm %s3392_s19, 1024  ;;  %s3395_s11 = int_to_ptr.vmem [resolvable:$true] %s320_s11 }
  0x88   : > { %p2951_p8 = scmp.ne.s32.totalorder %s3392_s19, %s2950_s5  ;;  %s2955_s17 = scalar_lea.hbm %s5386_s2, 8192 }
  0x89   : > { %p2956_p2 = scmp.lt.u32.totalorder %s3392_s19, %s5386_s2  ;;  %p2957_p5 = scmp.lt.u32.totalorder %s2955_s17, %s2950_s5 }
  0x8a   : > { %p2953_p12 = pnand %p2951_p8, %p5472_p9  ;;  %p2959_p13 = scmp.lt.u32.totalorder %s2950_s5, %s3392_s19 }
  0x8b   : > { %p2958_p10 = por %p2957_p5, %p2956_p2 }
  0x8c   : > { %p2954_p1 = pneg %p2953_p12 }
  0x8d   : > { %p2960_p0 = por %p2959_p13, %p2958_p10 }
  0x8f   : > { %p2961_p4 = pnand %p2960_p0, %p2954_p1 }
  0x91   : > { %2964 = shalt.err (!%p2961_p4)
}
  0x92   : > { %s2965_s28 = scalar_lea.vmem %s3395_s11, 1024  ;;  %s3133_s0 = smov [#allocation8]  }
  0x93   : > { %p2966_p6 = scmp.ne.s32.totalorder %s3395_s11, %s2965_s28  ;;  %s2970_s29 = sshll.u32 %s3133_s0, 4  ;;  %s2971_s29 = int_to_ptr.vmem [resolvable:$false] %s2970_s29 }
  0x94   : > { %s2972_s4 = scalar_lea.vmem %s2971_s29, 2048  ;;  %p2973_p8 = scmp.lt.s32.totalorder %s3395_s11, %s2971_s29 }
  0x95   : > { %p2968_p11 = pnand %p2966_p6, %p5472_p9  ;;  %p2974_p12 = scmp.lt.s32.totalorder %s2972_s4, %s2965_s28 }
  0x97   : > { %p2969_p7 = pneg %p2968_p11  ;;  %p2975_p2 = por %p2974_p12, %p2973_p8 }
  0x99   : > { %p2976_p5 = pnand %p2975_p2, %p2969_p7 }
  0x9b   : > { %2979 = shalt.err (!%p2976_p5)
}
  0x9c   : > { %2774 = dma.hbm_to_vmem [thread:$0]  (!%p5473_p3), %s3392_s19, 1024, %s3395_s11, %s3260_s7, %s5476_s15, %s5475_s8, %s5474_s23  }
  0x9d   : > { %s3426_s1 = scalar_lea.hbm %s5387_s3, %s3252_s20  ;;  %s334_s21 = scalar_lea.vmem [#allocation9], %s3242_s14 }
  0x9e   : > { %s342_s28 = sshll.u32 %s334_s21, 4  ;;  %s331_s0 = scalar_lea.sflag [#allocation10], %s3230_s9  ;;  %s3429_s28 = int_to_ptr.vmem [resolvable:$true] %s342_s28 }
  0x9f   : > { %s2980_s29 = scalar_lea.hbm %s3426_s1, 1024  ;;  %s2985_s11 = scalar_lea.hbm %s5387_s3, 8192 }
  0xa0   : > { %p2981_p1 = scmp.ne.s32.totalorder %s3426_s1, %s2980_s29  ;;  %p2986_p0 = scmp.lt.u32.totalorder %s3426_s1, %s5387_s3 }
  0xa1   : > { %p2987_p4 = scmp.lt.u32.totalorder %s2985_s11, %s2980_s29  ;;  %p2989_p11 = scmp.lt.u32.totalorder %s2980_s29, %s3426_s1 }
  0xa2   : > { %p2983_p10 = pnand %p2981_p1, %p5472_p9 }
  0xa3   : > { %p2988_p6 = por %p2987_p4, %p2986_p0 }
  0xa4   : > { %p2984_p13 = pneg %p2983_p10 }
  0xa5   : > { %p2990_p7 = por %p2989_p11, %p2988_p6 }
  0xa7   : > { %p2991_p8 = pnand %p2990_p7, %p2984_p13 }
  0xa9   : > { %2994 = shalt.err (!%p2991_p8)
}
  0xaa   : > { %s2995_s14 = scalar_lea.vmem %s3429_s28, 1024  ;;  %s3134_s5 = smov [#allocation9]  }
  0xab   : > { %p2996_p12 = scmp.ne.s32.totalorder %s3429_s28, %s2995_s14  ;;  %s3000_s17 = sshll.u32 %s3134_s5, 4  ;;  %s3001_s17 = int_to_ptr.vmem [resolvable:$false] %s3000_s17 }
  0xac   : > { %s3002_s21 = scalar_lea.vmem %s3001_s17, 2048  ;;  %p3003_p1 = scmp.lt.s32.totalorder %s3429_s28, %s3001_s17 }
  0xad   : > { %p2998_p2 = pnand %p2996_p12, %p5472_p9  ;;  %p3004_p10 = scmp.lt.s32.totalorder %s3002_s21, %s2995_s14 }
  0xaf   : > { %p2999_p5 = pneg %p2998_p2  ;;  %p3005_p0 = por %p3004_p10, %p3003_p1 }
  0xb1   : > { %p3006_p4 = pnand %p3005_p0, %p2999_p5 }
  0xb3   : > { %3009 = shalt.err (!%p3006_p4)
}
  0xb4   : > { %2777 = dma.hbm_to_vmem [thread:$0]  (!%p5473_p3), %s3426_s1, 1024, %s3429_s28, %s331_s0, %s5476_s15, %s5475_s8, %s5474_s23  }
  0xb5   : > { %p5477_p9 = scmp.ne.s32.totalorder %s5468_s16, 0 }
  0xb7   : > { %354 = sbr.rel (%p5477_p9) target bundleno = 532 (0x214), region = 44 }
  0xbe   : > { %s3461_s12 = sand.u32 1, %s3100_s22   ;;  %p5478_p13 = scmp.ne.s32.totalorder %s5462_s30, 0 }
  0xbf   : > { %s2491_s29 = sshll.u32 %s3461_s12, 5  ;;  %s357_s7 = scalar_lea.sflag [#allocation3], %s3461_s12 }
  0xc0   : > { %s3465_s10 = scalar_lea.vmem [#allocation2], %s2491_s29 }
  0xc1   : > { %3071 = dma.done.wait (%p5478_p13), %s357_s7, 512  }
  0xc2   : > { %3073 = vsyncadd (%p5478_p13), %s357_s7, 4294966784  ;;  %s365_s9 = sand.u32 1, %s3294_s13   ;;  %s3473_s16 = sshll.u32 %s3461_s12, 6 }
  0xc3   : > { %s366_s23 = scalar_lea.sflag [#allocation7], %s365_s9  ;;  %s3476_s8 = scalar_lea.vmem [#allocation6], %s3473_s16 }
  0xc4   : > { %3075 = dma.done.wait (%p5478_p13), %s366_s23, 2048  }
  0xc5   : > { %3077 = vsyncadd (%p5478_p13), %s366_s23, 4294965248  ;;  %s3483_s15 = scalar_lea.vmem [#allocation8], %s3473_s16  ;;  %s384_s1 = scalar_lea.sflag [#allocation10], %s3461_s12 }
  0xc6   : > { %s3487_s28 = scalar_lea.vmem [#allocation9], %s3473_s16 }
  0xc7   : > { %3079 = dma.done.wait (%p5478_p13), %s384_s1, 1024  }
  0xc8   : > { %3081 = vsyncadd (%p5478_p13), %s384_s1, 4294966272  ;;  %p5479_p3 = scmp.eq.s32.totalorder %s3294_s13, 0 }
  0xca   : > { %3083 = dma.done.wait (%p5479_p3), [#allocation5], 128   ;;  %p5480_p6 = pmov %p5479_p3 }
  0xcb   : > { %p5481_p11 = pmov %p5479_p3 }
  0xcc   : > { %3085 = vsyncadd (%p5480_p6), [#allocation5], 4294967168 }
  0xcd   : > { %3087 = dma.done.wait (%p5481_p11), [#allocation13], 16   ;;  %p5482_p7 = pmov %p5479_p3 }
  0xcf   : > { %3089 = vsyncadd (%p5482_p7), [#allocation13], 4294967280 }
  0xd0   : > { %400 = sfence }
  0xd1   : > { %s444_s0 = sld [smem:[#allocation11]]  ;;  %s2498_s19 = sld [smem:[#allocation11 + $0x1]]  ;;  %v572_v0 = vlaneseq  ;;  %v3516_v2 = vld [vmem:[%s3465_s10] sm:$0xff]  ;;  %v3519_v3 = vld [vmem:[%s3465_s10 + $0x8] sm:$0xff]  ;;  %v3526_v5 = vld [vmem:[%s3465_s10 + $0x10] sm:$0xff] }
  0xd2   : > { %s2499_s11 = sld [smem:[#allocation11 + $0x2]]  ;;  %s2500_s30 = sld [smem:[#allocation11 + $0x3]]  ;;  %v3537_v10 = vld [vmem:[%s3465_s10 + $0x18] sm:$0xff] }
  0xd3   : > { %s2501_s20 = sld [smem:[#allocation11 + $0x80]]  ;;  %s3501_s4 = sld [smem:[#allocation11 + $0x81]]  ;;  %v3513_v1 = vshrl.u32 %v572_v0, 7 }
  0xd4   : > { %s3503_s14 = sld [smem:[#allocation11 + $0x82]]  ;;  %s3505_s5 = sld [smem:[#allocation11 + $0x83]] }
  0xd5   : > { %s3507_s17 = sld [smem:[#allocation11 + $0x100]]  ;;  %s3509_s13 = sld [smem:[#allocation11 + $0x101]]  ;;  %v3534_v9 = vsub.s32 0, %v3513_v1 }
  0xd6   : > { %s3511_s21 = sld [smem:[#allocation11 + $0x102]]  ;;  %s3521_s29 = sld [smem:[#allocation11 + $0x103]] }
  0xd7   : > { %v445_v4 = vstv %s444_s0  ;;  %s3523_s7 = sld [smem:[#allocation11 + $0x180]]  ;;  %v448_v7 = vstv %s2498_s19  ;;  %s3529_s9 = sld [smem:[#allocation11 + $0x181]] }
  0xd8   : > { %v446_v6 = vmul.f32 %v445_v4, %v3516_v2  ;;  %v452_v8 = vstv %s2499_s11  ;;  %s3531_s23 = sld [smem:[#allocation11 + $0x182]]  ;;  %v449_v11 = vmul.f32 %v448_v7, %v3519_v3  ;;  %v456_v13 = vstv %s2500_s30  ;;  %s3541_s1 = sld [smem:[#allocation11 + $0x183]] }
  0xd9   : > { %v453_v12 = vmul.f32 %v452_v8, %v3526_v5  ;;  %v460_v14 = vstv %s2501_s20  ;;  %s3543_s0 = sld [smem:[#allocation11 + $0x200]]  ;;  %v457_v15 = vmul.f32 %v456_v13, %v3537_v10  ;;  %v463_v17 = vstv %s3501_s4  ;;  %s3549_s10 = sld [smem:[#allocation11 + $0x201]] }
  0xda   : > { %v461_v16 = vmul.f32 %v460_v14, %v3516_v2  ;;  %v467_v18 = vstv %s3503_s14  ;;  %s3551_s19 = sld [smem:[#allocation11 + $0x202]]  ;;  %v450_v19 = vadd.f32 %v449_v11, %v446_v6  ;;  %v464_v20 = vmul.f32 %v463_v17, %v3519_v3  ;;  %s3556_s11 = sld [smem:[#allocation11 + $0x203]] }
  0xdb   : > { %v468_v21 = vmul.f32 %v467_v18, %v3526_v5  ;;  %v471_v22 = vstv %s3505_s5  ;;  %v475_v24 = vstv %s3507_s17  ;;  %v478_v25 = vstv %s3509_s13  ;;  %s3562_s30 = sld [smem:[#allocation11 + $0x280]]  ;;  %s3564_s20 = sld [smem:[#allocation11 + $0x281]] }
  0xdc   : > { %v472_v23 = vmul.f32 %v471_v22, %v3537_v10  ;;  %v482_v26 = vstv %s3511_s21  ;;  %v454_v27 = vadd.f32 %v453_v12, %v450_v19  ;;  %v465_v28 = vadd.f32 %v464_v20, %v461_v16  ;;  %s3568_s4 = sld [smem:[#allocation11 + $0x282]]  ;;  %s3574_s14 = sld [smem:[#allocation11 + $0x283]] }
  0xdd   : > { %v476_v29 = vmul.f32 %v475_v24, %v3516_v2  ;;  %v479_v30 = vmul.f32 %v478_v25, %v3519_v3  ;;  %v483_v31 = vmul.f32 %v482_v26, %v3526_v5  ;;  %v486_v32 = vstv %s3521_s29  ;;  %s3576_s5 = sld [smem:[#allocation11 + $0x300]]  ;;  %s3581_s17 = sld [smem:[#allocation11 + $0x301]] }
  0xde   : > { %v490_v33 = vstv %s3523_s7  ;;  %v493_v34 = vstv %s3529_s9  ;;  %v3578_v35 = vadd.f32 %v457_v15, %v454_v27  ;;  %v469_v36 = vadd.f32 %v468_v21, %v465_v28  ;;  %s3587_s13 = sld [smem:[#allocation11 + $0x302]]  ;;  %s3589_s21 = sld [smem:[#allocation11 + $0x303]] }
  0xdf   : > { %v480_v37 = vadd.f32 %v479_v30, %v476_v29  ;;  %v487_v38 = vmul.f32 %v486_v32, %v3537_v10  ;;  %v491_v39 = vmul.f32 %v490_v33, %v3516_v2  ;;  %v494_v40 = vmul.f32 %v493_v34, %v3519_v3  ;;  %s3595_s29 = sld [smem:[#allocation11 + $0x380]]  ;;  %s3600_s7 = sld [smem:[#allocation11 + $0x381]]  ;;  %v3641_v29 = vld [vmem:[%s3476_s8] sm:$0xff] }
  0xe0   : > { %v497_v41 = vstv %s3531_s23  ;;  %v501_v42 = vstv %s3541_s1  ;;  %v3591_v43 = vadd.f32 %v472_v23, %v469_v36  ;;  %v505_v48 = vstv %s3543_s0  ;;  %s3602_s9 = sld [smem:[#allocation11 + $0x382]]  ;;  %s3612_s23 = sld [smem:[#allocation11 + $0x383]] }
  0xe1   : > { %v484_v44 = vadd.f32 %v483_v31, %v480_v37  ;;  %v498_v45 = vmul.f32 %v497_v41, %v3526_v5  ;;  %v502_v46 = vmul.f32 %v501_v42, %v3537_v10  ;;  %v495_v47 = vadd.f32 %v494_v40, %v491_v39  ;;  %s3761_s1 = sld [smem:[#allocation11 + $0x4]]  ;;  %s3779_s0 = sld [smem:[#allocation11 + $0x5]] }
  0xe2   : > { %v508_v49 = vstv %s3549_s10  ;;  %v512_v50 = vstv %s3551_s19  ;;  %v506_v52 = vmul.f32 %v505_v48, %v3516_v2  ;;  %v516_v56 = vstv %s3556_s11  ;;  %s3820_s10 = sld [smem:[#allocation11 + $0x6]]  ;;  %s3828_s19 = sld [smem:[#allocation11 + $0x7]] }
  0xe3   : > { %v3604_v51 = vadd.f32 %v487_v38, %v484_v44  ;;  %v509_v53 = vmul.f32 %v508_v49, %v3519_v3  ;;  %v513_v54 = vmul.f32 %v512_v50, %v3526_v5  ;;  %v499_v55 = vadd.f32 %v498_v45, %v495_v47  ;;  %v3680_v49 = vld [vmem:[%s3476_s8 + $0x10] sm:$0xff]  ;;  %s3830_s11 = sld [smem:[#allocation11 + $0x84]]  ;;  %p5536_p12 = scmp.ne.s32.totalorder %s5464_s18, 0 }
  0xe4   : > { %v520_v57 = vstv %s3562_s30  ;;  %v523_v58 = vstv %s3564_s20  ;;  %v517_v60 = vmul.f32 %v516_v56, %v3537_v10  ;;  %v527_v0 = vstv %s3568_s4  ;;  %s3841_s30 = sld [smem:[#allocation11 + $0x85]]  ;;  %s3843_s20 = sld [smem:[#allocation11 + $0x86]] }
  0xe5   : > { %v510_v59 = vadd.f32 %v509_v53, %v506_v52  ;;  %v521_v61 = vmul.f32 %v520_v57, %v3516_v2  ;;  %v524_v62 = vmul.f32 %v523_v58, %v3519_v3  ;;  %v3617_v63 = vadd.f32 %v502_v46, %v499_v55  ;;  %v3672_v46 = vld [vmem:[%s3476_s8 + $0x8] sm:$0xff]  ;;  %s3849_s4 = sld [smem:[#allocation11 + $0x87]] }
  0xe6   : > { %v531_v4 = vstv %s3574_s14  ;;  %v535_v6 = vstv %s3576_s5  ;;  %v528_v11 = vmul.f32 %v527_v0, %v3526_v5  ;;  %v538_v14 = vstv %s3581_s17  ;;  %s3851_s14 = sld [smem:[#allocation11 + $0x104]]  ;;  %s3896_s5 = sld [smem:[#allocation11 + $0x106]] }
  0xe7   : > { %v514_v7 = vadd.f32 %v513_v54, %v510_v59  ;;  %v525_v8 = vadd.f32 %v524_v62, %v521_v61  ;;  %v532_v12 = vmul.f32 %v531_v4, %v3537_v10  ;;  %v536_v13 = vmul.f32 %v535_v6, %v3516_v2  ;;  %s3906_s17 = sld [smem:[#allocation11 + $0x107]] }
  0xe8   : > { %v542_v15 = vstv %s3587_s13  ;;  %v546_v16 = vstv %s3589_s21  ;;  %v539_v19 = vmul.f32 %v538_v14, %v3519_v3  ;;  %v550_v22 = vstv %s3595_s29  ;;  %s3908_s13 = sld [smem:[#allocation11 + $0x184]]  ;;  %s3915_s21 = sld [smem:[#allocation11 + $0x185]] }
  0xe9   : > { %v3628_v17 = vadd.f32 %v517_v60, %v514_v7  ;;  %v529_v18 = vadd.f32 %v528_v11, %v525_v8  ;;  %v543_v20 = vmul.f32 %v542_v15, %v3526_v5  ;;  %v547_v21 = vmul.f32 %v546_v16, %v3537_v10  ;;  %s3917_s29 = sld [smem:[#allocation11 + $0x186]] }
  0xea   : > { %v553_v23 = vstv %s3600_s7  ;;  %v557_v24 = vstv %s3602_s9  ;;  %v540_v26 = vadd.f32 %v539_v19, %v536_v13  ;;  %v551_v27 = vmul.f32 %v550_v22, %v3516_v2  ;;  %v3741_v19 = vld [vmem:[%s3476_s8 + $0x18] sm:$0xff]  ;;  %s3931_s7 = sld [smem:[#allocation11 + $0x187]]  ;;  %s3933_s9 = sld [smem:[#allocation11 + $0x204]] }
  0xeb   : > { %v3636_v25 = vadd.f32 %v532_v12, %v529_v18  ;;  %v554_v28 = vmul.f32 %v553_v23, %v3519_v3  ;;  %v558_v30 = vmul.f32 %v557_v24, %v3526_v5  ;;  %v561_v31 = vstv %s3612_s23  ;;  %v3747_v24 = vld [vmem:[%s3476_s8 + $0x20] sm:$0xff]  ;;  %s3943_s23 = sld [smem:[#allocation11 + $0x205]] }
  0xec   : > { %v3647_v32 = vrot.slane %v3516_v2, %v3534_v9  ;;  %v3651_v33 = vrot.slane %v3519_v3, %v3534_v9  ;;  %v544_v34 = vadd.f32 %v543_v20, %v540_v26  ;;  %v562_v37 = vmul.f32 %v561_v31, %v3537_v10 }
  0xed   : > { %v555_v36 = vadd.f32 %v554_v28, %v551_v27  ;;  %v3656_v38 = vrot.slane %v3526_v5, %v3534_v9  ;;  %v3660_v39 = vrot.slane %v3537_v10, %v3534_v9  ;;  %v3667_v42 = vsub.s32 1, %v3513_v1 }
  0xee   : > { %v588_v40 = vmul.f32 %v3647_v32, %v3641_v29  ;;  %v589_v41 = vmul.f32 %v3651_v33, %v3641_v29  ;;  %v3669_v44 = vadd.f32 %v547_v21, %v544_v34  ;;  %v3677_v48 = vsub.s32 2, %v3513_v1 }
  0xef   : > { %5483 = vst [vmem:[#allocation28_spill] sm:$0xff] %v3667_v42  ;;  %v559_v45 = vadd.f32 %v558_v30, %v555_v36  ;;  %v590_v47 = vmul.f32 %v3656_v38, %v3641_v29  ;;  %v591_v50 = vmul.f32 %v3660_v39, %v3641_v29  ;;  %v3686_v52 = vrot.slane %v3516_v2, %v3667_v42 }
  0xf0   : > { %v3690_v53 = vrot.slane %v3519_v3, %v3667_v42  ;;  %v3694_v54 = vrot.slane %v3526_v5, %v3667_v42  ;;  %v3700_v56 = vrot.slane %v3537_v10, %v3667_v42  ;;  %v3704_v57 = vrot.slane %v3516_v2, %v3677_v48 }
  0xf1   : > { %v3696_v55 = vadd.f32 %v562_v37, %v559_v45  ;;  %v3708_v58 = vrot.slane %v3519_v3, %v3677_v48  ;;  %v608_v59 = vmul.f32 %v3686_v52, %v3672_v46  ;;  %v3718_v62 = vrot.slane %v3526_v5, %v3677_v48 }
  0xf2   : > { %v609_v60 = vmul.f32 %v3690_v53, %v3672_v46  ;;  %v610_v61 = vmul.f32 %v3694_v54, %v3672_v46  ;;  %v611_v0 = vmul.f32 %v3700_v56, %v3672_v46  ;;  %v3724_v4 = vrot.slane %v3537_v10, %v3677_v48 }
  0xf3   : > { %v632_v6 = vmul.f32 %v3704_v57, %v3680_v49  ;;  %v633_v7 = vmul.f32 %v3708_v58, %v3680_v49  ;;  %v612_v8 = vadd.f32 %v608_v59, %v588_v40  ;;  %v634_v13 = vmul.f32 %v3718_v62, %v3680_v49 }
  0xf4   : > { %v613_v11 = vadd.f32 %v609_v60, %v589_v41  ;;  %v614_v12 = vadd.f32 %v610_v61, %v590_v47  ;;  %v615_v14 = vadd.f32 %v611_v0, %v591_v50  ;;  %v635_v15 = vmul.f32 %v3724_v4, %v3680_v49  ;;  %v3800_v0 = vld [vmem:[%s3476_s8 + $0x28] sm:$0xff] }
  0xf5   : > { %v3735_v16 = vsub.s32 3, %v3513_v1  ;;  %v3738_v18 = vsub.s32 4, %v3513_v1  ;;  %v636_v20 = vadd.f32 %v632_v6, %v612_v8  ;;  %v3744_v23 = vsub.s32 5, %v3513_v1 }
  0xf6   : > { %v637_v21 = vadd.f32 %v633_v7, %v613_v11  ;;  %v638_v22 = vadd.f32 %v634_v13, %v614_v12  ;;  %v639_v26 = vadd.f32 %v635_v15, %v615_v14 }
  0xf7   : > { %v3751_v27 = vrot.slane %v3516_v2, %v3735_v16  ;;  %v3755_v28 = vrot.slane %v3519_v3, %v3735_v16  ;;  %v3759_v30 = vrot.slane %v3526_v5, %v3735_v16  ;;  %v3765_v31 = vrot.slane %v3537_v10, %v3735_v16 }
  0xf8   : > { %v3769_v34 = vrot.slane %v3516_v2, %v3738_v18  ;;  %v3773_v36 = vrot.slane %v3519_v3, %v3738_v18  ;;  %v3777_v37 = vrot.slane %v3526_v5, %v3738_v18  ;;  %v3789_v47 = vrot.slane %v3537_v10, %v3738_v18 }
  0xf9   : > { %5484 = vst [vmem:[#allocation29_spill] sm:$0xff] %v3765_v31  ;;  %v656_v40 = vmul.f32 %v3751_v27, %v3741_v19  ;;  %v657_v41 = vmul.f32 %v3755_v28, %v3741_v19  ;;  %v658_v45 = vmul.f32 %v3759_v30, %v3741_v19  ;;  %v659_v50 = vmul.f32 %v3765_v31, %v3741_v19 }
  0xfa   : > { %5485 = vst [vmem:[#allocation30_spill] sm:$0xff] %v3769_v34  ;;  %5486 = vst [vmem:[#allocation31_spill] sm:$0xff] %v3773_v36  ;;  %v680_v59 = vmul.f32 %v3769_v34, %v3747_v24  ;;  %v681_v60 = vmul.f32 %v3773_v36, %v3747_v24  ;;  %v682_v61 = vmul.f32 %v3777_v37, %v3747_v24  ;;  %v777_v36 = vstv %s3830_s11  ;;  %s3963_s11 = sld [smem:[#allocation11 + $0x286]] }
  0xfb   : > { %5487 = vst [vmem:[#allocation32_spill] sm:$0xff] %v3777_v37  ;;  %5488 = vst [vmem:[#allocation33_spill] sm:$0xff] %v3789_v47  ;;  %v660_v6 = vadd.f32 %v656_v40, %v636_v20  ;;  %v661_v7 = vadd.f32 %v657_v41, %v637_v21  ;;  %v662_v8 = vadd.f32 %v658_v45, %v638_v22  ;;  %v769_v37 = vstv %s3820_s10  ;;  %s3957_s10 = sld [smem:[#allocation11 + $0x284]] }
  0xfc   : > { %v683_v11 = vmul.f32 %v3789_v47, %v3747_v24  ;;  %v663_v12 = vadd.f32 %v659_v50, %v639_v26  ;;  %v3806_v13 = vrot.slane %v3516_v2, %v3744_v23  ;;  %v3810_v14 = vrot.slane %v3519_v3, %v3744_v23 }
  0xfd   : > { %v3814_v15 = vrot.slane %v3526_v5, %v3744_v23  ;;  %v684_v20 = vadd.f32 %v680_v59, %v660_v6  ;;  %v685_v21 = vadd.f32 %v681_v60, %v661_v7  ;;  %v686_v22 = vadd.f32 %v682_v61, %v662_v8  ;;  %v3846_v7 = vld [vmem:[%s3476_s8 + $0x30] sm:$0xff] }
  0xfe   : > { %5489 = vst [vmem:[#allocation34_spill] sm:$0xff] %v3806_v13  ;;  %5490 = vst [vmem:[#allocation35_spill] sm:$0xff] %v3810_v14  ;;  %v3818_v26 = vrot.slane %v3537_v10, %v3744_v23  ;;  %v687_v40 = vadd.f32 %v683_v11, %v663_v12  ;;  %v704_v41 = vmul.f32 %v3806_v13, %v3800_v0  ;;  %v3835_v60 = vsub.s32 6, %v3513_v1 }
  0xff   : > { %5491 = vst [vmem:[#allocation36_spill] sm:$0xff] %v3814_v15  ;;  %v705_v45 = vmul.f32 %v3810_v14, %v3800_v0  ;;  %v706_v50 = vmul.f32 %v3814_v15, %v3800_v0  ;;  %v3838_v61 = vsub.s32 7, %v3513_v1  ;;  %v761_v6 = vstv %s3761_s1  ;;  %s3945_s1 = sld [smem:[#allocation11 + $0x206]] }
 0x100   : > { %5492 = vst [vmem:[#allocation37_spill] sm:$0xff] %v3818_v26  ;;  %v707_v59 = vmul.f32 %v3818_v26, %v3800_v0  ;;  %v708_v8 = vadd.f32 %v704_v41, %v684_v20  ;;  %v765_v15 = vstv %s3779_s0  ;;  %v3854_v26 = vld [vmem:[%s3476_s8 + $0x38] sm:$0xff]  ;;  %v3858_v1 = vrot.slane %v3516_v2, %v3835_v60  ;;  %s3894_s8 = sld [smem:[#allocation11 + $0x105]]  ;;  %s3951_s0 = sld [smem:[#allocation11 + $0x207]] }
 0x101   : > { %v709_v11 = vadd.f32 %v705_v45, %v685_v21  ;;  %v710_v12 = vadd.f32 %v706_v50, %v686_v22  ;;  %v3862_v13 = vrot.slane %v3519_v3, %v3835_v60  ;;  %v3866_v20 = vrot.slane %v3526_v5, %v3835_v60 }
 0x102   : > { %v711_v14 = vadd.f32 %v707_v59, %v687_v40  ;;  %5493 = vst [vmem:[#allocation38_spill] sm:$0xff] %v3858_v1  ;;  %v3870_v21 = vrot.slane %v3537_v10, %v3835_v60  ;;  %v3874_v22 = vrot.slane %v3516_v2, %v3838_v61  ;;  %v3878_v40 = vrot.slane %v3519_v3, %v3838_v61 }
 0x103   : > { %5494 = vst [vmem:[#allocation39_spill] sm:$0xff] %v3862_v13  ;;  %5495 = vst [vmem:[#allocation40_spill] sm:$0xff] %v3866_v20  ;;  %v3882_v41 = vrot.slane %v3526_v5, %v3838_v61  ;;  %v728_v45 = vmul.f32 %v3858_v1, %v3846_v7  ;;  %v729_v50 = vmul.f32 %v3862_v13, %v3846_v7 }
 0x104   : > { %5496 = vst [vmem:[#allocation41_spill] sm:$0xff] %v3870_v21  ;;  %5497 = vst [vmem:[#allocation42_spill] sm:$0xff] %v3874_v22  ;;  %v730_v59 = vmul.f32 %v3866_v20, %v3846_v7  ;;  %v3892_v2 = vrot.slane %v3537_v10, %v3838_v61  ;;  %v731_v3 = vmul.f32 %v3870_v21, %v3846_v7 }
 0x105   : > { %5498 = vst [vmem:[#allocation43_spill] sm:$0xff] %v3878_v40  ;;  %5499 = vst [vmem:[#allocation44_spill] sm:$0xff] %v3882_v41  ;;  %v752_v5 = vmul.f32 %v3874_v22, %v3854_v26  ;;  %v753_v13 = vmul.f32 %v3878_v40, %v3854_v26  ;;  %v754_v20 = vmul.f32 %v3882_v41, %v3854_v26  ;;  %v773_v40 = vstv %s3828_s19  ;;  %s3959_s19 = sld [smem:[#allocation11 + $0x285]] }
 0x106   : > { %5500 = vst [vmem:[#allocation45_spill] sm:$0xff] %v3892_v2  ;;  %v732_v10 = vadd.f32 %v728_v45, %v708_v8  ;;  %v733_v1 = vadd.f32 %v729_v50, %v709_v11  ;;  %v734_v21 = vadd.f32 %v730_v59, %v710_v12  ;;  %v755_v22 = vmul.f32 %v3892_v2, %v3854_v26 }
 0x107   : > { %v735_v47 = vadd.f32 %v731_v3, %v711_v14  ;;  %v781_v11 = vstv %s3841_s30  ;;  %v785_v12 = vstv %s3843_s20  ;;  %v789_v50 = vstv %s3849_s4  ;;  %s3965_s30 = sld [smem:[#allocation11 + $0x287]]  ;;  %s3972_s20 = sld [smem:[#allocation11 + $0x304]] }
 0x108   : > { %v3919_v41 = vadd.f32 %v752_v5, %v732_v10  ;;  %v3921_v34 = vadd.f32 %v753_v13, %v733_v1  ;;  %v3923_v8 = vadd.f32 %v754_v20, %v734_v21  ;;  %v793_v59 = vstv %s3851_s14  ;;  %s3974_s4 = sld [smem:[#allocation11 + $0x305]]  ;;  %s3980_s14 = sld [smem:[#allocation11 + $0x306]] }
 0x109   : > { %v3926_v45 = vadd.f32 %v755_v22, %v735_v47  ;;  %v797_v5 = vstv %s3894_s8  ;;  %v805_v10 = vstv %s3906_s17  ;;  %s3987_s8 = sld [smem:[#allocation11 + $0x307]]  ;;  %s3994_s17 = sld [smem:[#allocation11 + $0x385]] }
 0x10a   : > { %v762_v14 = vmul.f32 %v761_v6, %v3919_v41  ;;  %v766_v3 = vmul.f32 %v765_v15, %v3921_v34  ;;  %v770_v13 = vmul.f32 %v769_v37, %v3923_v8  ;;  %v778_v47 = vmul.f32 %v777_v36, %v3919_v41 }
 0x10b   : > { %v774_v1 = vmul.f32 %v773_v40, %v3926_v45  ;;  %v782_v20 = vmul.f32 %v781_v11, %v3921_v34  ;;  %v786_v21 = vmul.f32 %v785_v12, %v3923_v8  ;;  %v790_v22 = vmul.f32 %v789_v50, %v3926_v45 }
 0x10c   : > { %v763_v15 = vadd.f32 %v762_v14, %v3578_v35  ;;  %v779_v6 = vadd.f32 %v778_v47, %v3591_v43  ;;  %v794_v37 = vmul.f32 %v793_v59, %v3919_v41  ;;  %v798_v36 = vmul.f32 %v797_v5, %v3921_v34 }
 0x10d   : > { %v801_v40 = vstv %s3896_s5  ;;  %v809_v11 = vstv %s3908_s13  ;;  %v806_v59 = vmul.f32 %v805_v10, %v3926_v45  ;;  %v813_v47 = vstv %s3915_s21  ;;  %s3989_s5 = sld [smem:[#allocation11 + $0x384]]  ;;  %s4001_s13 = sld [smem:[#allocation11 + $0x386]] }
 0x10e   : > { %v767_v12 = vadd.f32 %v766_v3, %v763_v15  ;;  %v783_v35 = vadd.f32 %v782_v20, %v779_v6  ;;  %v795_v43 = vadd.f32 %v794_v37, %v3604_v51  ;;  %v802_v50 = vmul.f32 %v801_v40, %v3923_v8  ;;  %s4003_s21 = sld [smem:[#allocation11 + $0x387]] }
 0x10f   : > { %v810_v14 = vmul.f32 %v809_v11, %v3919_v41  ;;  %v817_v5 = vstv %s3917_s29  ;;  %v814_v20 = vmul.f32 %v813_v47, %v3921_v34  ;;  %v821_v6 = vstv %s3931_s7  ;;  %s4110_s29 = sld [smem:[#allocation11 + $0x8]]  ;;  %s4112_s7 = sld [smem:[#allocation11 + $0x9]] }
 0x110   : > { %v771_v2 = vadd.f32 %v770_v13, %v767_v12  ;;  %v787_v31 = vadd.f32 %v786_v21, %v783_v35  ;;  %v799_v3 = vadd.f32 %v798_v36, %v795_v43  ;;  %v818_v15 = vmul.f32 %v817_v5, %v3923_v8 }
 0x111   : > { %v811_v51 = vadd.f32 %v810_v14, %v3617_v63  ;;  %v825_v37 = vstv %s3933_s9  ;;  %v822_v40 = vmul.f32 %v821_v6, %v3926_v45  ;;  %v829_v11 = vstv %s3943_s23  ;;  %s4118_s9 = sld [smem:[#allocation11 + $0xa]]  ;;  %s4120_s23 = sld [smem:[#allocation11 + $0xb]] }
 0x112   : > { %v3982_v13 = vadd.f32 %v774_v1, %v771_v2  ;;  %v3984_v21 = vadd.f32 %v790_v22, %v787_v31  ;;  %v803_v36 = vadd.f32 %v802_v50, %v799_v3  ;;  %v826_v10 = vmul.f32 %v825_v37, %v3919_v41 }
 0x113   : > { %v815_v63 = vadd.f32 %v814_v20, %v811_v51  ;;  %v833_v12 = vstv %s3945_s1  ;;  %v830_v2 = vmul.f32 %v829_v11, %v3921_v34  ;;  %v837_v22 = vstv %s3951_s0  ;;  %s4127_s1 = sld [smem:[#allocation11 + $0x88]]  ;;  %s4129_s0 = sld [smem:[#allocation11 + $0x89]] }
 0x114   : > { %v3996_v31 = vadd.f32 %v806_v59, %v803_v36  ;;  %v834_v1 = vmul.f32 %v833_v12, %v3923_v8  ;;  %v827_v43 = vadd.f32 %v826_v10, %v3628_v17  ;;  %v838_v50 = vmul.f32 %v837_v22, %v3926_v45 }
 0x115   : > { %v819_v35 = vadd.f32 %v818_v15, %v815_v63  ;;  %v841_v14 = vstv %s3957_s10  ;;  %v845_v47 = vstv %s3959_s19  ;;  %v849_v5 = vstv %s3963_s11  ;;  %s4138_s10 = sld [smem:[#allocation11 + $0x8a]]  ;;  %s4140_s19 = sld [smem:[#allocation11 + $0x8b]] }
 0x116   : > { %v842_v59 = vmul.f32 %v841_v14, %v3919_v41  ;;  %v853_v3 = vstv %s3965_s30  ;;  %v831_v51 = vadd.f32 %v830_v2, %v827_v43  ;;  %v846_v6 = vmul.f32 %v845_v47, %v3921_v34  ;;  %s4147_s11 = sld [smem:[#allocation11 + $0x108]]  ;;  %s4152_s30 = sld [smem:[#allocation11 + $0x109]] }
 0x117   : > { %v4012_v20 = vadd.f32 %v822_v40, %v819_v35  ;;  %v850_v15 = vmul.f32 %v849_v5, %v3923_v8  ;;  %v854_v37 = vmul.f32 %v853_v3, %v3926_v45  ;;  %v857_v36 = vstv %s3972_s20  ;;  %s4154_s20 = sld [smem:[#allocation11 + $0x10a]] }
 0x118   : > { %v843_v17 = vadd.f32 %v842_v59, %v3636_v25  ;;  %v861_v63 = vstv %s3974_s4  ;;  %v835_v10 = vadd.f32 %v834_v1, %v831_v51  ;;  %v858_v11 = vmul.f32 %v857_v36, %v3919_v41  ;;  %s4160_s4 = sld [smem:[#allocation11 + $0x10b]] }
 0x119   : > { %v862_v40 = vmul.f32 %v861_v63, %v3921_v34  ;;  %v865_v12 = vstv %s3980_s14  ;;  %v869_v35 = vstv %s3987_s8  ;;  %v873_v43 = vstv %s3989_s5  ;;  %s4165_s14 = sld [smem:[#allocation11 + $0x188]]  ;;  %s4167_s8 = sld [smem:[#allocation11 + $0x189]] }
 0x11a   : > { %v847_v2 = vadd.f32 %v846_v6, %v843_v17  ;;  %v866_v22 = vmul.f32 %v865_v12, %v3923_v8  ;;  %v4026_v14 = vadd.f32 %v838_v50, %v835_v10  ;;  %v859_v25 = vadd.f32 %v858_v11, %v3669_v44  ;;  %s4180_s5 = sld [smem:[#allocation11 + $0x18a]] }
 0x11b   : > { %v870_v59 = vmul.f32 %v869_v35, %v3926_v45  ;;  %v874_v47 = vmul.f32 %v873_v43, %v3919_v41  ;;  %v877_v1 = vstv %s3994_s17  ;;  %v881_v3 = vstv %s4001_s13  ;;  %s4182_s17 = sld [smem:[#allocation11 + $0x18b]]  ;;  %s4193_s13 = sld [smem:[#allocation11 + $0x208]] }
 0x11c   : > { %v851_v5 = vadd.f32 %v850_v15, %v847_v2  ;;  %v885_v51 = vstv %s4003_s21  ;;  %v863_v36 = vadd.f32 %v862_v40, %v859_v25  ;;  %v878_v6 = vmul.f32 %v877_v1, %v3921_v34  ;;  %s4195_s21 = sld [smem:[#allocation11 + $0x209]] }
 0x11d   : > { %v875_v63 = vadd.f32 %v874_v47, %v3696_v55  ;;  %v882_v17 = vmul.f32 %v881_v3, %v3923_v8  ;;  %v886_v50 = vmul.f32 %v885_v51, %v3926_v45  ;;  %v891_v44 = vrot.slane %v3919_v41, %v3534_v9 }
 0x11e   : > { %v4037_v12 = vadd.f32 %v854_v37, %v851_v5  ;;  %v895_v15 = vrot.slane %v3921_v34, %v3534_v9  ;;  %v867_v10 = vadd.f32 %v866_v22, %v863_v36  ;;  %v899_v40 = vrot.slane %v3923_v8, %v3534_v9 }
 0x11f   : > { %v879_v11 = vadd.f32 %v878_v6, %v875_v63  ;;  %v903_v55 = vrot.slane %v3926_v45, %v3534_v9  ;;  %v904_v2 = vmul.f32 %v891_v44, %v3641_v29  ;;  %v911_v35 = vrot.slane %v3919_v41, %v3667_v42 }
 0x120   : > { %v905_v37 = vmul.f32 %v895_v15, %v3641_v29  ;;  %v915_v43 = vrot.slane %v3921_v34, %v3667_v42  ;;  %v4054_v25 = vadd.f32 %v870_v59, %v867_v10  ;;  %v906_v47 = vmul.f32 %v899_v40, %v3641_v29 }
 0x121   : > { %v883_v22 = vadd.f32 %v882_v17, %v879_v11  ;;  %v907_v5 = vmul.f32 %v903_v55, %v3641_v29  ;;  %v919_v1 = vrot.slane %v3923_v8, %v3667_v42  ;;  %v923_v3 = vrot.slane %v3926_v45, %v3667_v42 }
 0x122   : > { %v924_v51 = vmul.f32 %v911_v35, %v3672_v46  ;;  %v925_v36 = vmul.f32 %v915_v43, %v3672_v46  ;;  %v935_v59 = vrot.slane %v3919_v41, %v3677_v48  ;;  %v939_v6 = vrot.slane %v3921_v34, %v3677_v48 }
 0x123   : > { %v4064_v63 = vadd.f32 %v886_v50, %v883_v22  ;;  %v943_v29 = vrot.slane %v3923_v8, %v3677_v48  ;;  %v926_v17 = vmul.f32 %v919_v1, %v3672_v46  ;;  %v927_v44 = vmul.f32 %v923_v3, %v3672_v46 }
 0x124   : > { %v928_v15 = vadd.f32 %v924_v51, %v904_v2  ;;  %v929_v10 = vadd.f32 %v925_v36, %v905_v37  ;;  %v947_v11 = vrot.slane %v3926_v45, %v3677_v48  ;;  %v948_v50 = vmul.f32 %v935_v59, %v3680_v49 }
 0x125   : > { %v949_v40 = vmul.f32 %v939_v6, %v3680_v49  ;;  %v950_v55 = vmul.f32 %v943_v29, %v3680_v49  ;;  %v930_v35 = vadd.f32 %v926_v17, %v906_v47  ;;  %v931_v43 = vadd.f32 %v927_v44, %v907_v5 }
 0x126   : > { %v959_v22 = vrot.slane %v3919_v41, %v3735_v16  ;;  %v963_v1 = vrot.slane %v3921_v34, %v3735_v16  ;;  %v951_v46 = vmul.f32 %v947_v11, %v3680_v49  ;;  %v952_v2 = vadd.f32 %v948_v50, %v928_v15 }
 0x127   : > { %v953_v37 = vadd.f32 %v949_v40, %v929_v10  ;;  %v967_v3 = vrot.slane %v3923_v8, %v3735_v16  ;;  %v954_v51 = vadd.f32 %v950_v55, %v930_v35  ;;  %v971_v36 = vrot.slane %v3926_v45, %v3735_v16 }
 0x128   : > { %v972_v47 = vmul.f32 %v959_v22, %v3741_v19  ;;  %v973_v5 = vmul.f32 %v963_v1, %v3741_v19  ;;  %v955_v59 = vadd.f32 %v951_v46, %v931_v43  ;;  %v983_v29 = vrot.slane %v3919_v41, %v3738_v18 }
 0x129   : > { %v974_v6 = vmul.f32 %v967_v3, %v3741_v19  ;;  %v987_v49 = vrot.slane %v3921_v34, %v3738_v18  ;;  %v975_v17 = vmul.f32 %v971_v36, %v3741_v19  ;;  %v991_v10 = vrot.slane %v3923_v8, %v3738_v18 }
 0x12a   : > { %v976_v44 = vadd.f32 %v972_v47, %v952_v2  ;;  %v977_v15 = vadd.f32 %v973_v5, %v953_v37  ;;  %v995_v50 = vrot.slane %v3926_v45, %v3738_v18  ;;  %v996_v40 = vmul.f32 %v983_v29, %v3747_v24 }
 0x12b   : > { %v978_v11 = vadd.f32 %v974_v6, %v954_v51  ;;  %v997_v55 = vmul.f32 %v987_v49, %v3747_v24  ;;  %v979_v35 = vadd.f32 %v975_v17, %v955_v59  ;;  %v998_v43 = vmul.f32 %v991_v10, %v3747_v24 }
 0x12c   : > { %v1007_v22 = vrot.slane %v3919_v41, %v3744_v23  ;;  %v1011_v19 = vrot.slane %v3921_v34, %v3744_v23  ;;  %v999_v1 = vmul.f32 %v995_v50, %v3747_v24  ;;  %v1000_v46 = vadd.f32 %v996_v40, %v976_v44 }
 0x12d   : > { %v1001_v2 = vadd.f32 %v997_v55, %v977_v15  ;;  %v1015_v37 = vrot.slane %v3923_v8, %v3744_v23  ;;  %v1002_v3 = vadd.f32 %v998_v43, %v978_v11  ;;  %v1019_v51 = vrot.slane %v3926_v45, %v3744_v23 }
 0x12e   : > { %v1020_v36 = vmul.f32 %v1007_v22, %v3800_v0  ;;  %v1021_v47 = vmul.f32 %v1011_v19, %v3800_v0  ;;  %v1003_v24 = vadd.f32 %v999_v1, %v979_v35  ;;  %v1031_v59 = vrot.slane %v3919_v41, %v3835_v60 }
 0x12f   : > { %v1022_v5 = vmul.f32 %v1015_v37, %v3800_v0  ;;  %v1035_v6 = vrot.slane %v3921_v34, %v3835_v60  ;;  %v1023_v29 = vmul.f32 %v1019_v51, %v3800_v0  ;;  %v1039_v44 = vrot.slane %v3923_v8, %v3835_v60 }
 0x130   : > { %v1024_v49 = vadd.f32 %v1020_v36, %v1000_v46  ;;  %v1025_v17 = vadd.f32 %v1021_v47, %v1001_v2  ;;  %v1043_v10 = vrot.slane %v3926_v45, %v3835_v60  ;;  %v1044_v11 = vmul.f32 %v1031_v59, %v3846_v7 }
 0x131   : > { %v1026_v15 = vadd.f32 %v1022_v5, %v1002_v3  ;;  %v1045_v50 = vmul.f32 %v1035_v6, %v3846_v7  ;;  %v1027_v40 = vadd.f32 %v1023_v29, %v1003_v24  ;;  %v1046_v0 = vmul.f32 %v1039_v44, %v3846_v7 }
 0x132   : > { %v1055_v55 = vrot.slane %v3919_v41, %v3838_v61  ;;  %v1059_v35 = vrot.slane %v3921_v34, %v3838_v61  ;;  %v1047_v43 = vmul.f32 %v1043_v10, %v3846_v7  ;;  %v1048_v22 = vadd.f32 %v1044_v11, %v1024_v49 }
 0x133   : > { %v1049_v19 = vadd.f32 %v1045_v50, %v1025_v17  ;;  %v1063_v1 = vrot.slane %v3923_v8, %v3838_v61  ;;  %v1050_v41 = vadd.f32 %v1046_v0, %v1026_v15  ;;  %v1067_v34 = vrot.slane %v3926_v45, %v3838_v61 }
 0x134   : > { %v1068_v46 = vmul.f32 %v1055_v55, %v3854_v26  ;;  %v1069_v7 = vmul.f32 %v1059_v35, %v3854_v26  ;;  %v1051_v2 = vadd.f32 %v1047_v43, %v1027_v40  ;;  %v1077_v37 = vstv %s4110_s29  ;;  %s4201_s29 = sld [smem:[#allocation11 + $0x20a]] }
 0x135   : > { %v1070_v8 = vmul.f32 %v1063_v1, %v3854_v26  ;;  %v1081_v3 = vstv %s4112_s7  ;;  %v1071_v51 = vmul.f32 %v1067_v34, %v3854_v26  ;;  %v1085_v47 = vstv %s4118_s9  ;;  %s4207_s7 = sld [smem:[#allocation11 + $0x20b]]  ;;  %s4209_s9 = sld [smem:[#allocation11 + $0x288]] }
 0x136   : > { %v4170_v45 = vadd.f32 %v1068_v46, %v1048_v22  ;;  %v4172_v36 = vadd.f32 %v1069_v7, %v1049_v19  ;;  %v1089_v5 = vstv %s4120_s23  ;;  %v1093_v59 = vstv %s4127_s1  ;;  %s4213_s23 = sld [smem:[#allocation11 + $0x289]]  ;;  %s4219_s1 = sld [smem:[#allocation11 + $0x28a]] }
 0x137   : > { %v4175_v24 = vadd.f32 %v1070_v8, %v1050_v41  ;;  %v1097_v6 = vstv %s4129_s0  ;;  %v4184_v29 = vadd.f32 %v1071_v51, %v1051_v2  ;;  %v1101_v10 = vstv %s4138_s10  ;;  %s4221_s0 = sld [smem:[#allocation11 + $0x28b]]  ;;  %s4229_s10 = sld [smem:[#allocation11 + $0x308]] }
 0x138   : > { %v1078_v26 = vmul.f32 %v1077_v37, %v4170_v45  ;;  %v1082_v49 = vmul.f32 %v1081_v3, %v4172_v36  ;;  %v1094_v17 = vmul.f32 %v1093_v59, %v4170_v45  ;;  %v1098_v15 = vmul.f32 %v1097_v6, %v4172_v36 }
 0x139   : > { %v1086_v44 = vmul.f32 %v1085_v47, %v4175_v24  ;;  %v1105_v11 = vstv %s4140_s19  ;;  %v1090_v40 = vmul.f32 %v1089_v5, %v4184_v29  ;;  %v1102_v55 = vmul.f32 %v1101_v10, %v4175_v24  ;;  %s4231_s19 = sld [smem:[#allocation11 + $0x309]] }
 0x13a   : > { %v1079_v50 = vadd.f32 %v1078_v26, %v3982_v13  ;;  %v1095_v0 = vadd.f32 %v1094_v17, %v3984_v21  ;;  %v1106_v35 = vmul.f32 %v1105_v11, %v4184_v29  ;;  %v1109_v43 = vstv %s4147_s11  ;;  %s4238_s11 = sld [smem:[#allocation11 + $0x30a]] }
 0x13b   : > { %v1113_v22 = vstv %s4152_s30  ;;  %v1117_v19 = vstv %s4154_s20  ;;  %v1110_v21 = vmul.f32 %v1109_v43, %v4170_v45  ;;  %v1121_v46 = vstv %s4160_s4  ;;  %s4240_s30 = sld [smem:[#allocation11 + $0x30b]]  ;;  %s4246_s20 = sld [smem:[#allocation11 + $0x388]] }
 0x13c   : > { %v1083_v13 = vadd.f32 %v1082_v49, %v1079_v50  ;;  %v1099_v1 = vadd.f32 %v1098_v15, %v1095_v0  ;;  %v1114_v41 = vmul.f32 %v1113_v22, %v4172_v36  ;;  %v1118_v34 = vmul.f32 %v1117_v19, %v4175_v24  ;;  %s4248_s4 = sld [smem:[#allocation11 + $0x389]] }
 0x13d   : > { %v1125_v7 = vstv %s4165_s14  ;;  %v1129_v2 = vstv %s4167_s8  ;;  %v1111_v3 = vadd.f32 %v1110_v21, %v3996_v31  ;;  %v1122_v51 = vmul.f32 %v1121_v46, %v4184_v29  ;;  %s4256_s14 = sld [smem:[#allocation11 + $0x38a]]  ;;  %s4263_s8 = sld [smem:[#allocation11 + $0x38b]] }
 0x13e   : > { %v1087_v8 = vadd.f32 %v1086_v44, %v1083_v13  ;;  %v1103_v37 = vadd.f32 %v1102_v55, %v1099_v1  ;;  %v1126_v47 = vmul.f32 %v1125_v7, %v4170_v45  ;;  %v1130_v5 = vmul.f32 %v1129_v2, %v4172_v36 }
 0x13f   : > { %v1133_v59 = vstv %s4180_s5  ;;  %v1137_v6 = vstv %s4182_s17  ;;  %v1115_v31 = vadd.f32 %v1114_v41, %v1111_v3  ;;  %v1141_v10 = vstv %s4193_s13  ;;  %s4350_s5 = sld [smem:[#allocation11 + $0xc]]  ;;  %s4361_s17 = sld [smem:[#allocation11 + $0xd]] }
 0x140   : > { %v4233_v26 = vadd.f32 %v1090_v40, %v1087_v8  ;;  %v4235_v49 = vadd.f32 %v1106_v35, %v1103_v37  ;;  %v1134_v17 = vmul.f32 %v1133_v59, %v4175_v24  ;;  %v1127_v44 = vadd.f32 %v1126_v47, %v4012_v20  ;;  %s4363_s13 = sld [smem:[#allocation11 + $0xe]] }
 0x141   : > { %v1138_v15 = vmul.f32 %v1137_v6, %v4184_v29  ;;  %v1145_v11 = vstv %s4195_s21  ;;  %v1119_v50 = vadd.f32 %v1118_v34, %v1115_v31  ;;  %v1142_v40 = vmul.f32 %v1141_v10, %v4170_v45  ;;  %s4369_s21 = sld [smem:[#allocation11 + $0xf]] }
 0x142   : > { %v1146_v0 = vmul.f32 %v1145_v11, %v4172_v36  ;;  %v1149_v55 = vstv %s4201_s29  ;;  %v1131_v35 = vadd.f32 %v1130_v5, %v1127_v44  ;;  %v1153_v43 = vstv %s4207_s7  ;;  %s4371_s29 = sld [smem:[#allocation11 + $0x8c]]  ;;  %s4380_s7 = sld [smem:[#allocation11 + $0x8d]] }
 0x143   : > { %v1150_v20 = vmul.f32 %v1149_v55, %v4175_v24  ;;  %v1157_v22 = vstv %s4209_s9  ;;  %v4258_v19 = vadd.f32 %v1122_v51, %v1119_v50  ;;  %v1143_v13 = vadd.f32 %v1142_v40, %v4026_v14  ;;  %v4287_v55 = vld [vmem:[%s3483_s15] sm:$0xff]  ;;  %s4392_s9 = sld [smem:[#allocation11 + $0x8f]] }
 0x144   : > { %v1154_v1 = vmul.f32 %v1153_v43, %v4184_v29  ;;  %v1158_v21 = vmul.f32 %v1157_v22, %v4170_v45  ;;  %v1135_v41 = vadd.f32 %v1134_v17, %v1131_v35  ;;  %v1161_v34 = vstv %s4213_s23  ;;  %s4394_s23 = sld [smem:[#allocation11 + $0x10c]] }
 0x145   : > { %v1165_v46 = vstv %s4219_s1  ;;  %v1169_v7 = vstv %s4221_s0  ;;  %v1147_v2 = vadd.f32 %v1146_v0, %v1143_v13  ;;  %v1162_v37 = vmul.f32 %v1161_v34, %v4172_v36  ;;  %v4294_v13 = vld [vmem:[%s3483_s15 + $0x8] sm:$0xff]  ;;  %s4400_s1 = sld [smem:[#allocation11 + $0x10d]]  ;;  %s4402_s0 = sld [smem:[#allocation11 + $0x10e]] }
 0x146   : > { %v1159_v8 = vadd.f32 %v1158_v21, %v4037_v12  ;;  %v1166_v14 = vmul.f32 %v1165_v46, %v4175_v24  ;;  %v4271_v3 = vadd.f32 %v1138_v15, %v1135_v41  ;;  %v1170_v51 = vmul.f32 %v1169_v7, %v4184_v29  ;;  %v4303_v7 = vld [vmem:[%s3483_s15 + $0x10] sm:$0xff] }
 0x147   : > { %v1173_v47 = vstv %s4229_s10  ;;  %v1177_v5 = vstv %s4231_s19  ;;  %v1151_v59 = vadd.f32 %v1150_v20, %v1147_v2  ;;  %v1181_v12 = vstv %s4238_s11  ;;  %s4408_s10 = sld [smem:[#allocation11 + $0x10f]]  ;;  %s4413_s19 = sld [smem:[#allocation11 + $0x18c]] }
 0x148   : > { %v1163_v6 = vadd.f32 %v1162_v37, %v1159_v8  ;;  %v1174_v31 = vmul.f32 %v1173_v47, %v4170_v45  ;;  %v1178_v17 = vmul.f32 %v1177_v5, %v4172_v36  ;;  %v1185_v44 = vstv %s4240_s30  ;;  %v4316_v37 = vld [vmem:[%s3483_s15 + $0x18] sm:$0xff]  ;;  %s4415_s11 = sld [smem:[#allocation11 + $0x18d]]  ;;  %s4429_s30 = sld [smem:[#allocation11 + $0x18e]] }
 0x149   : > { %v1189_v10 = vstv %s4246_s20  ;;  %v1193_v11 = vstv %s4248_s4  ;;  %v4282_v15 = vadd.f32 %v1154_v1, %v1151_v59  ;;  %v1182_v0 = vmul.f32 %v1181_v12, %v4175_v24  ;;  %s4431_s20 = sld [smem:[#allocation11 + $0x18f]]  ;;  %s4441_s4 = sld [smem:[#allocation11 + $0x20c]] }
 0x14a   : > { %v1167_v50 = vadd.f32 %v1166_v14, %v1163_v6  ;;  %v1175_v40 = vadd.f32 %v1174_v31, %v4054_v25  ;;  %v1186_v35 = vmul.f32 %v1185_v44, %v4184_v29  ;;  %v1190_v20 = vmul.f32 %v1189_v10, %v4170_v45 }
 0x14b   : > { %v1194_v43 = vmul.f32 %v1193_v11, %v4172_v36  ;;  %v1197_v22 = vstv %s4256_s14  ;;  %v1201_v25 = vstv %s4263_s8  ;;  %v1212_v45 = vmul.f32 %v4287_v55, %v3647_v32  ;;  %v4331_v11 = vld [vmem:[%s3483_s15 + $0x20] sm:$0xff]  ;;  %s4443_s14 = sld [smem:[#allocation11 + $0x20d]]  ;;  %s4449_s8 = sld [smem:[#allocation11 + $0x20e]] }
 0x14c   : > { %v4296_v1 = vadd.f32 %v1170_v51, %v1167_v50  ;;  %v1179_v21 = vadd.f32 %v1178_v17, %v1175_v40  ;;  %v1198_v41 = vmul.f32 %v1197_v22, %v4175_v24  ;;  %v1191_v34 = vadd.f32 %v1190_v20, %v4064_v63 }
 0x14d   : > { %v1202_v46 = vmul.f32 %v1201_v25, %v4184_v29  ;;  %v1213_v36 = vmul.f32 %v4287_v55, %v3651_v33  ;;  %v1214_v8 = vmul.f32 %v4287_v55, %v3656_v38  ;;  %v1215_v24 = vmul.f32 %v4287_v55, %v3660_v39 }
 0x14e   : > { %v1183_v2 = vadd.f32 %v1182_v0, %v1179_v21  ;;  %v1216_v63 = vmul.f32 %v4294_v13, %v3686_v52  ;;  %v1195_v29 = vadd.f32 %v1194_v43, %v1191_v34  ;;  %v1217_v14 = vmul.f32 %v4294_v13, %v3690_v53  ;;  %v4342_v43 = vld [vmem:[%s3483_s15 + $0x28] sm:$0xff] }
 0x14f   : > { %v1218_v51 = vmul.f32 %v4294_v13, %v3694_v54  ;;  %v1219_v47 = vmul.f32 %v4294_v13, %v3700_v56  ;;  %v1224_v6 = vmul.f32 %v4303_v7, %v3704_v57  ;;  %v1225_v31 = vmul.f32 %v4303_v7, %v3708_v58 }
 0x150   : > { %v4324_v5 = vadd.f32 %v1186_v35, %v1183_v2  ;;  %v1220_v59 = vadd.f32 %v1216_v63, %v1212_v45  ;;  %v1199_v17 = vadd.f32 %v1198_v41, %v1195_v29  ;;  %v1221_v12 = vadd.f32 %v1217_v14, %v1213_v36  ;;  %v5501_v45 = vld [vmem:[#allocation29_spill] sm:$0xff]  ;;  %v5503_v29 = vld [vmem:[#allocation31_spill] sm:$0xff] }
 0x151   : > { %v1222_v44 = vadd.f32 %v1218_v51, %v1214_v8  ;;  %v1223_v10 = vadd.f32 %v1219_v47, %v1215_v24  ;;  %v1226_v50 = vmul.f32 %v4303_v7, %v3718_v62  ;;  %v1227_v40 = vmul.f32 %v4303_v7, %v3724_v4  ;;  %v5502_v24 = vld [vmem:[#allocation30_spill] sm:$0xff]  ;;  %v5504_v51 = vld [vmem:[#allocation32_spill] sm:$0xff] }
 0x152   : > { %v1228_v0 = vadd.f32 %v1224_v6, %v1220_v59  ;;  %v1232_v35 = vmul.f32 %v4316_v37, %v3751_v27  ;;  %v4339_v20 = vadd.f32 %v1202_v46, %v1199_v17  ;;  %v1229_v22 = vadd.f32 %v1225_v31, %v1221_v12  ;;  %v4353_v46 = vld [vmem:[%s3483_s15 + $0x30] sm:$0xff]  ;;  %v5505_v31 = vld [vmem:[#allocation33_spill] sm:$0xff] }
 0x153   : > { %v1233_v21 = vmul.f32 %v4316_v37, %v3755_v28  ;;  %v1234_v41 = vmul.f32 %v4316_v37, %v3759_v30  ;;  %v1230_v25 = vadd.f32 %v1226_v50, %v1222_v44  ;;  %v1231_v34 = vadd.f32 %v1227_v40, %v1223_v10  ;;  %v5506_v12 = vld [vmem:[#allocation34_spill] sm:$0xff]  ;;  %v4374_v10 = vld [vmem:[%s3483_s15 + $0x38] sm:$0xff]  ;;  %s4386_s15 = sld [smem:[#allocation11 + $0x8e]] }
 0x154   : > { %v1235_v36 = vmul.f32 %v4316_v37, %v5501_v45  ;;  %v1236_v2 = vadd.f32 %v1232_v35, %v1228_v0  ;;  %v1240_v63 = vmul.f32 %v4331_v11, %v5502_v24  ;;  %v1241_v14 = vmul.f32 %v4331_v11, %v5503_v29  ;;  %v5507_v0 = vld [vmem:[#allocation35_spill] sm:$0xff] }
 0x155   : > { %v1237_v8 = vadd.f32 %v1233_v21, %v1229_v22  ;;  %v1242_v47 = vmul.f32 %v4331_v11, %v5504_v51  ;;  %v1238_v59 = vadd.f32 %v1234_v41, %v1230_v25  ;;  %v1243_v17 = vmul.f32 %v4331_v11, %v5505_v31  ;;  %v5508_v22 = vld [vmem:[#allocation36_spill] sm:$0xff] }
 0x156   : > { %v1239_v6 = vadd.f32 %v1235_v36, %v1231_v34  ;;  %v1248_v44 = vmul.f32 %v4342_v43, %v5506_v12  ;;  %v1244_v50 = vadd.f32 %v1240_v63, %v1236_v2  ;;  %v1249_v35 = vmul.f32 %v4342_v43, %v5507_v0  ;;  %v5509_v34 = vld [vmem:[#allocation37_spill] sm:$0xff]  ;;  %v5510_v12 = vld [vmem:[#allocation38_spill] sm:$0xff]  ;;  %v5511_v63 = vld [vmem:[#allocation39_spill] sm:$0xff] }
 0x157   : > { %v1245_v40 = vadd.f32 %v1241_v14, %v1237_v8  ;;  %v1250_v21 = vmul.f32 %v4342_v43, %v5508_v22  ;;  %v1246_v41 = vadd.f32 %v1242_v47, %v1238_v59  ;;  %v1251_v36 = vmul.f32 %v4342_v43, %v5509_v34  ;;  %v5512_v0 = vld [vmem:[#allocation40_spill] sm:$0xff] }
 0x158   : > { %v1247_v25 = vadd.f32 %v1243_v17, %v1239_v6  ;;  %v1256_v31 = vmul.f32 %v4353_v46, %v5510_v12  ;;  %v1252_v2 = vadd.f32 %v1248_v44, %v1244_v50  ;;  %v1257_v14 = vmul.f32 %v4353_v46, %v5511_v63  ;;  %v5513_v6 = vld [vmem:[#allocation41_spill] sm:$0xff]  ;;  %v5514_v12 = vld [vmem:[#allocation42_spill] sm:$0xff] }
 0x159   : > { %v1253_v8 = vadd.f32 %v1249_v35, %v1245_v40  ;;  %v1258_v22 = vmul.f32 %v4353_v46, %v5512_v0  ;;  %v1254_v47 = vadd.f32 %v1250_v21, %v1246_v41  ;;  %v1259_v17 = vmul.f32 %v4353_v46, %v5513_v6  ;;  %v5515_v35 = vld [vmem:[#allocation43_spill] sm:$0xff]  ;;  %v5516_v21 = vld [vmem:[#allocation44_spill] sm:$0xff] }
 0x15a   : > { %v1255_v59 = vadd.f32 %v1251_v36, %v1247_v25  ;;  %v1264_v44 = vmul.f32 %v4374_v10, %v5514_v12  ;;  %v1260_v50 = vadd.f32 %v1256_v31, %v1252_v2  ;;  %v1265_v0 = vmul.f32 %v4374_v10, %v5515_v35  ;;  %v5517_v12 = vld [vmem:[#allocation45_spill] sm:$0xff] }
 0x15b   : > { %v1261_v40 = vadd.f32 %v1257_v14, %v1253_v8  ;;  %v1266_v41 = vmul.f32 %v4374_v10, %v5516_v21  ;;  %v1262_v25 = vadd.f32 %v1258_v22, %v1254_v47  ;;  %v1267_v6 = vmul.f32 %v4374_v10, %v5517_v12 }
 0x15c   : > { %v1263_v36 = vadd.f32 %v1259_v17, %v1255_v59  ;;  %v1273_v63 = vstv %s4350_s5  ;;  %v4417_v31 = vadd.f32 %v1264_v44, %v1260_v50  ;;  %v1277_v8 = vstv %s4361_s17  ;;  %s4455_s5 = sld [smem:[#allocation11 + $0x20f]]  ;;  %s4457_s17 = sld [smem:[#allocation11 + $0x28c]] }
 0x15d   : > { %v4419_v2 = vadd.f32 %v1265_v0, %v1261_v40  ;;  %v1281_v14 = vstv %s4363_s13  ;;  %v4423_v21 = vadd.f32 %v1266_v41, %v1262_v25  ;;  %v1285_v47 = vstv %s4369_s21  ;;  %s4461_s13 = sld [smem:[#allocation11 + $0x28d]]  ;;  %s4467_s21 = sld [smem:[#allocation11 + $0x28e]] }
 0x15e   : > { %v4425_v22 = vadd.f32 %v1267_v6, %v1263_v36  ;;  %v1289_v59 = vstv %s4371_s29  ;;  %v1274_v17 = vmul.f32 %v1273_v63, %v4417_v31  ;;  %v1293_v50 = vstv %s4380_s7  ;;  %s4469_s29 = sld [smem:[#allocation11 + $0x28f]]  ;;  %s4477_s7 = sld [smem:[#allocation11 + $0x30c]] }
 0x15f   : > { %v1278_v0 = vmul.f32 %v1277_v8, %v4419_v2  ;;  %v1290_v44 = vmul.f32 %v1289_v59, %v4417_v31  ;;  %v1282_v6 = vmul.f32 %v1281_v14, %v4423_v21  ;;  %v1294_v41 = vmul.f32 %v1293_v50, %v4419_v2 }
 0x160   : > { %v1286_v40 = vmul.f32 %v1285_v47, %v4425_v22  ;;  %v1297_v25 = vstv %s4386_s15  ;;  %v1275_v63 = vadd.f32 %v1274_v17, %v4233_v26  ;;  %v1301_v59 = vstv %s4392_s9  ;;  %s4479_s15 = sld [smem:[#allocation11 + $0x30d]]  ;;  %s4486_s9 = sld [smem:[#allocation11 + $0x30e]] }
 0x161   : > { %v1291_v36 = vadd.f32 %v1290_v44, %v4235_v49  ;;  %v1298_v8 = vmul.f32 %v1297_v25, %v4423_v21  ;;  %v1302_v14 = vmul.f32 %v1301_v59, %v4425_v22  ;;  %v1305_v47 = vstv %s4394_s23  ;;  %s4488_s23 = sld [smem:[#allocation11 + $0x30f]] }
 0x162   : > { %v1309_v50 = vstv %s4400_s1  ;;  %v1313_v12 = vstv %s4402_s0  ;;  %v1279_v26 = vadd.f32 %v1278_v0, %v1275_v63  ;;  %v1306_v49 = vmul.f32 %v1305_v47, %v4417_v31  ;;  %s4494_s1 = sld [smem:[#allocation11 + $0x38c]]  ;;  %s4496_s0 = sld [smem:[#allocation11 + $0x38d]] }
 0x163   : > { %v1295_v17 = vadd.f32 %v1294_v41, %v1291_v36  ;;  %v1310_v44 = vmul.f32 %v1309_v50, %v4419_v2  ;;  %v1314_v25 = vmul.f32 %v1313_v12, %v4423_v21  ;;  %v1317_v59 = vstv %s4408_s10  ;;  %s4504_s10 = sld [smem:[#allocation11 + $0x38e]] }
 0x164   : > { %v1321_v35 = vstv %s4413_s19  ;;  %v1325_v34 = vstv %s4415_s11  ;;  %v1283_v51 = vadd.f32 %v1282_v6, %v1279_v26  ;;  %v1307_v41 = vadd.f32 %v1306_v49, %v4258_v19  ;;  %s4511_s19 = sld [smem:[#allocation11 + $0x38f]]  ;;  %s4614_s11 = sld [smem:[#allocation11 + $0x10]] }
 0x165   : > { %v1299_v0 = vadd.f32 %v1298_v8, %v1295_v17  ;;  %v1318_v63 = vmul.f32 %v1317_v59, %v4425_v22  ;;  %v1322_v36 = vmul.f32 %v1321_v35, %v4417_v31  ;;  %v1326_v47 = vmul.f32 %v1325_v34, %v4419_v2 }
 0x166   : > { %v1329_v12 = vstv %s4429_s30  ;;  %v1333_v50 = vstv %s4431_s20  ;;  %v4481_v29 = vadd.f32 %v1286_v40, %v1283_v51  ;;  %v1311_v19 = vadd.f32 %v1310_v44, %v1307_v41  ;;  %s4616_s30 = sld [smem:[#allocation11 + $0x11]]  ;;  %s4622_s20 = sld [smem:[#allocation11 + $0x12]] }
 0x167   : > { %v4483_v6 = vadd.f32 %v1302_v14, %v1299_v0  ;;  %v1330_v8 = vmul.f32 %v1329_v12, %v4423_v21  ;;  %v1323_v34 = vadd.f32 %v1322_v36, %v4271_v3  ;;  %v1334_v35 = vmul.f32 %v1333_v50, %v4425_v22 }
 0x168   : > { %v1337_v26 = vstv %s4441_s4  ;;  %v1341_v17 = vstv %s4443_s14  ;;  %v1315_v51 = vadd.f32 %v1314_v25, %v1311_v19  ;;  %v1345_v49 = vstv %s4449_s8  ;;  %s4624_s4 = sld [smem:[#allocation11 + $0x13]]  ;;  %s4631_s14 = sld [smem:[#allocation11 + $0x90]] }
 0x169   : > { %v1338_v40 = vmul.f32 %v1337_v26, %v4417_v31  ;;  %v1342_v14 = vmul.f32 %v1341_v17, %v4419_v2  ;;  %v1327_v44 = vadd.f32 %v1326_v47, %v1323_v34  ;;  %v1346_v3 = vmul.f32 %v1345_v49, %v4423_v21  ;;  %s4633_s8 = sld [smem:[#allocation11 + $0x91]] }
 0x16a   : > { %v1349_v59 = vstv %s4455_s5  ;;  %v1353_v0 = vstv %s4457_s17  ;;  %v4506_v41 = vadd.f32 %v1318_v63, %v1315_v51  ;;  %v1357_v47 = vstv %s4461_s13  ;;  %s4642_s5 = sld [smem:[#allocation11 + $0x92]]  ;;  %s4644_s17 = sld [smem:[#allocation11 + $0x93]] }
 0x16b   : > { %v1339_v25 = vadd.f32 %v1338_v40, %v4282_v15  ;;  %v1350_v36 = vmul.f32 %v1349_v59, %v4425_v22  ;;  %v1354_v12 = vmul.f32 %v1353_v0, %v4417_v31  ;;  %v1331_v50 = vadd.f32 %v1330_v8, %v1327_v44  ;;  %s4651_s13 = sld [smem:[#allocation11 + $0x110]] }
 0x16c   : > { %v1361_v19 = vstv %s4467_s21  ;;  %v1365_v34 = vstv %s4469_s29  ;;  %v1358_v17 = vmul.f32 %v1357_v47, %v4419_v2  ;;  %v1369_v49 = vstv %s4477_s7  ;;  %s4656_s21 = sld [smem:[#allocation11 + $0x111]]  ;;  %s4658_s29 = sld [smem:[#allocation11 + $0x112]] }
 0x16d   : > { %v1343_v26 = vadd.f32 %v1342_v14, %v1339_v25  ;;  %v1355_v63 = vadd.f32 %v1354_v12, %v4296_v1  ;;  %v1362_v15 = vmul.f32 %v1361_v19, %v4423_v21  ;;  %v4519_v51 = vadd.f32 %v1334_v35, %v1331_v50  ;;  %s4664_s7 = sld [smem:[#allocation11 + $0x113]] }
 0x16e   : > { %v1366_v40 = vmul.f32 %v1365_v34, %v4425_v22  ;;  %v1373_v8 = vstv %s4479_s15  ;;  %v1370_v0 = vmul.f32 %v1369_v49, %v4417_v31  ;;  %v1377_v14 = vstv %s4486_s9  ;;  %s4669_s15 = sld [smem:[#allocation11 + $0x190]]  ;;  %s4671_s9 = sld [smem:[#allocation11 + $0x191]] }
 0x16f   : > { %v1347_v44 = vadd.f32 %v1346_v3, %v1343_v26  ;;  %v1359_v59 = vadd.f32 %v1358_v17, %v1355_v63  ;;  %v1374_v24 = vmul.f32 %v1373_v8, %v4419_v2  ;;  %v1381_v1 = vstv %s4488_s23  ;;  %s4684_s23 = sld [smem:[#allocation11 + $0x192]] }
 0x170   : > { %v1385_v25 = vstv %s4494_s1  ;;  %v1389_v12 = vstv %s4496_s0  ;;  %v1371_v50 = vadd.f32 %v1370_v0, %v4324_v5  ;;  %v1378_v19 = vmul.f32 %v1377_v14, %v4423_v21  ;;  %s4686_s1 = sld [smem:[#allocation11 + $0x193]]  ;;  %s4697_s0 = sld [smem:[#allocation11 + $0x210]] }
 0x171   : > { %v4530_v47 = vadd.f32 %v1350_v36, %v1347_v44  ;;  %v1363_v35 = vadd.f32 %v1362_v15, %v1359_v59  ;;  %v1382_v34 = vmul.f32 %v1381_v1, %v4425_v22  ;;  %v1386_v3 = vmul.f32 %v1385_v25, %v4417_v31 }
 0x172   : > { %v1390_v26 = vmul.f32 %v1389_v12, %v4419_v2  ;;  %v1393_v63 = vstv %s4504_s10  ;;  %v1375_v49 = vadd.f32 %v1374_v24, %v1371_v50  ;;  %v1397_v45 = vstv %s4511_s19  ;;  %s4699_s10 = sld [smem:[#allocation11 + $0x211]]  ;;  %s4705_s19 = sld [smem:[#allocation11 + $0x212]] }
 0x173   : > { %v4538_v17 = vadd.f32 %v1366_v40, %v1363_v35  ;;  %v1394_v8 = vmul.f32 %v1393_v63, %v4423_v21  ;;  %v1387_v36 = vadd.f32 %v1386_v3, %v4339_v20  ;;  %v1398_v15 = vmul.f32 %v1397_v45, %v4425_v22 }
 0x174   : > { %v1403_v5 = vrot.slane %v4417_v31, %v3534_v9  ;;  %v1407_v44 = vrot.slane %v4419_v2, %v3534_v9  ;;  %v1379_v59 = vadd.f32 %v1378_v19, %v1375_v49  ;;  %v1411_v0 = vrot.slane %v4423_v21, %v3534_v9 }
 0x175   : > { %v1415_v24 = vrot.slane %v4425_v22, %v3534_v9  ;;  %v1423_v40 = vrot.slane %v4417_v31, %v3667_v42  ;;  %v1391_v14 = vadd.f32 %v1390_v26, %v1387_v36  ;;  %v1427_v1 = vrot.slane %v4419_v2, %v3667_v42 }
 0x176   : > { %v1416_v20 = vmul.f32 %v1403_v5, %v4287_v55  ;;  %v1417_v45 = vmul.f32 %v1407_v44, %v4287_v55  ;;  %v4558_v25 = vadd.f32 %v1382_v34, %v1379_v59  ;;  %v1418_v12 = vmul.f32 %v1411_v0, %v4287_v55 }
 0x177   : > { %v1419_v35 = vmul.f32 %v1415_v24, %v4287_v55  ;;  %v1431_v50 = vrot.slane %v4423_v21, %v3667_v42  ;;  %v1395_v19 = vadd.f32 %v1394_v8, %v1391_v14  ;;  %v1435_v3 = vrot.slane %v4425_v22, %v3667_v42 }
 0x178   : > { %v1436_v26 = vmul.f32 %v1423_v40, %v4294_v13  ;;  %v1437_v63 = vmul.f32 %v1427_v1, %v4294_v13  ;;  %v1447_v34 = vrot.slane %v4417_v31, %v3677_v48  ;;  %v1451_v36 = vrot.slane %v4419_v2, %v3677_v48 }
 0x179   : > { %v1438_v49 = vmul.f32 %v1431_v50, %v4294_v13  ;;  %v1455_v55 = vrot.slane %v4423_v21, %v3677_v48  ;;  %v4575_v5 = vadd.f32 %v1398_v15, %v1395_v19  ;;  %v1439_v8 = vmul.f32 %v1435_v3, %v4294_v13 }
 0x17a   : > { %v1440_v44 = vadd.f32 %v1436_v26, %v1416_v20  ;;  %v1441_v59 = vadd.f32 %v1437_v63, %v1417_v45  ;;  %v1459_v24 = vrot.slane %v4425_v22, %v3677_v48  ;;  %v1460_v40 = vmul.f32 %v1447_v34, %v4303_v7 }
 0x17b   : > { %v1442_v0 = vadd.f32 %v1438_v49, %v1418_v12  ;;  %v1461_v14 = vmul.f32 %v1451_v36, %v4303_v7  ;;  %v1443_v1 = vadd.f32 %v1439_v8, %v1419_v35  ;;  %v1462_v50 = vmul.f32 %v1455_v55, %v4303_v7 }
 0x17c   : > { %v1471_v42 = vrot.slane %v4417_v31, %v3735_v16  ;;  %v1475_v15 = vrot.slane %v4419_v2, %v3735_v16  ;;  %v1463_v13 = vmul.f32 %v1459_v24, %v4303_v7  ;;  %v1464_v20 = vadd.f32 %v1460_v40, %v1440_v44 }
 0x17d   : > { %v1465_v45 = vadd.f32 %v1461_v14, %v1441_v59  ;;  %v1479_v12 = vrot.slane %v4423_v21, %v3735_v16  ;;  %v1466_v19 = vadd.f32 %v1462_v50, %v1442_v0  ;;  %v1483_v3 = vrot.slane %v4425_v22, %v3735_v16 }
 0x17e   : > { %v1484_v35 = vmul.f32 %v1471_v42, %v4316_v37  ;;  %v1485_v26 = vmul.f32 %v1475_v15, %v4316_v37  ;;  %v1467_v63 = vadd.f32 %v1463_v13, %v1443_v1  ;;  %v1495_v34 = vrot.slane %v4417_v31, %v3738_v18 }
 0x17f   : > { %v1486_v49 = vmul.f32 %v1479_v12, %v4316_v37  ;;  %v1499_v7 = vrot.slane %v4419_v2, %v3738_v18  ;;  %v1487_v36 = vmul.f32 %v1483_v3, %v4316_v37  ;;  %v1503_v44 = vrot.slane %v4423_v21, %v3738_v18 }
 0x180   : > { %v1488_v55 = vadd.f32 %v1484_v35, %v1464_v20  ;;  %v1489_v8 = vadd.f32 %v1485_v26, %v1465_v45  ;;  %v1507_v42 = vrot.slane %v4425_v22, %v3738_v18  ;;  %v1508_v0 = vmul.f32 %v1495_v34, %v4331_v11 }
 0x181   : > { %v1490_v59 = vadd.f32 %v1486_v49, %v1466_v19  ;;  %v1509_v24 = vmul.f32 %v1499_v7, %v4331_v11  ;;  %v1491_v40 = vadd.f32 %v1487_v36, %v1467_v63  ;;  %v1510_v14 = vmul.f32 %v1503_v44, %v4331_v11 }
 0x182   : > { %v1519_v1 = vrot.slane %v4417_v31, %v3744_v23  ;;  %v1523_v37 = vrot.slane %v4419_v2, %v3744_v23  ;;  %v1511_v50 = vmul.f32 %v1507_v42, %v4331_v11  ;;  %v1512_v15 = vadd.f32 %v1508_v0, %v1488_v55 }
 0x183   : > { %v1513_v13 = vadd.f32 %v1509_v24, %v1489_v8  ;;  %v1527_v20 = vrot.slane %v4423_v21, %v3744_v23  ;;  %v1514_v45 = vadd.f32 %v1510_v14, %v1490_v59  ;;  %v1531_v12 = vrot.slane %v4425_v22, %v3744_v23 }
 0x184   : > { %v1532_v19 = vmul.f32 %v1519_v1, %v4342_v43  ;;  %v1533_v3 = vmul.f32 %v1523_v37, %v4342_v43  ;;  %v1515_v11 = vadd.f32 %v1511_v50, %v1491_v40  ;;  %v1543_v26 = vrot.slane %v4417_v31, %v3835_v60 }
 0x185   : > { %v1534_v35 = vmul.f32 %v1527_v20, %v4342_v43  ;;  %v1547_v63 = vrot.slane %v4419_v2, %v3835_v60  ;;  %v1535_v49 = vmul.f32 %v1531_v12, %v4342_v43  ;;  %v1551_v36 = vrot.slane %v4423_v21, %v3835_v60 }
 0x186   : > { %v1536_v34 = vadd.f32 %v1532_v19, %v1512_v15  ;;  %v1537_v7 = vadd.f32 %v1533_v3, %v1513_v13  ;;  %v1555_v8 = vrot.slane %v4425_v22, %v3835_v60  ;;  %v1556_v44 = vmul.f32 %v1543_v26, %v4353_v46 }
 0x187   : > { %v1538_v55 = vadd.f32 %v1534_v35, %v1514_v45  ;;  %v1557_v59 = vmul.f32 %v1547_v63, %v4353_v46  ;;  %v1539_v42 = vadd.f32 %v1535_v49, %v1515_v11  ;;  %v1558_v43 = vmul.f32 %v1551_v36, %v4353_v46 }
 0x188   : > { %v1567_v0 = vrot.slane %v4417_v31, %v3838_v61  ;;  %v1571_v24 = vrot.slane %v4419_v2, %v3838_v61  ;;  %v1559_v40 = vmul.f32 %v1555_v8, %v4353_v46  ;;  %v1560_v14 = vadd.f32 %v1556_v44, %v1536_v34 }
 0x189   : > { %v1561_v1 = vadd.f32 %v1557_v59, %v1537_v7  ;;  %v1575_v37 = vrot.slane %v4423_v21, %v3838_v61  ;;  %v1562_v31 = vadd.f32 %v1558_v43, %v1538_v55  ;;  %v1579_v2 = vrot.slane %v4425_v22, %v3838_v61 }
 0x18a   : > { %v1580_v50 = vmul.f32 %v1567_v0, %v4374_v10  ;;  %v1581_v46 = vmul.f32 %v1571_v24, %v4374_v10  ;;  %v1563_v15 = vadd.f32 %v1559_v40, %v1539_v42  ;;  %v1589_v13 = vstv %s4614_s11  ;;  %s4711_s11 = sld [smem:[#allocation11 + $0x213]] }
 0x18b   : > { %v1582_v21 = vmul.f32 %v1575_v37, %v4374_v10  ;;  %v1593_v20 = vstv %s4616_s30  ;;  %v1583_v45 = vmul.f32 %v1579_v2, %v4374_v10  ;;  %v1597_v19 = vstv %s4622_s20  ;;  %s4713_s30 = sld [smem:[#allocation11 + $0x290]]  ;;  %s4717_s20 = sld [smem:[#allocation11 + $0x291]] }
 0x18c   : > { %v4674_v22 = vadd.f32 %v1580_v50, %v1560_v14  ;;  %v4676_v12 = vadd.f32 %v1581_v46, %v1561_v1  ;;  %v1601_v11 = vstv %s4624_s4  ;;  %v1605_v35 = vstv %s4631_s14  ;;  %s4723_s4 = sld [smem:[#allocation11 + $0x292]]  ;;  %s4725_s14 = sld [smem:[#allocation11 + $0x293]] }
 0x18d   : > { %v4679_v3 = vadd.f32 %v1582_v21, %v1562_v31  ;;  %v1609_v26 = vstv %s4633_s8  ;;  %v4688_v63 = vadd.f32 %v1583_v45, %v1563_v15  ;;  %v1613_v55 = vstv %s4642_s5  ;;  %s4733_s8 = sld [smem:[#allocation11 + $0x310]]  ;;  %s4735_s5 = sld [smem:[#allocation11 + $0x311]] }
 0x18e   : > { %v1590_v10 = vmul.f32 %v1589_v13, %v4674_v22  ;;  %v1594_v49 = vmul.f32 %v1593_v20, %v4676_v12  ;;  %v1606_v34 = vmul.f32 %v1605_v35, %v4674_v22  ;;  %v1610_v36 = vmul.f32 %v1609_v26, %v4676_v12 }
 0x18f   : > { %v1598_v7 = vmul.f32 %v1597_v19, %v4679_v3  ;;  %v1617_v8 = vstv %s4644_s17  ;;  %v1602_v59 = vmul.f32 %v1601_v11, %v4688_v63  ;;  %v1614_v43 = vmul.f32 %v1613_v55, %v4679_v3  ;;  %s4742_s17 = sld [smem:[#allocation11 + $0x312]] }
 0x190   : > { %v1591_v44 = vadd.f32 %v1590_v10, %v4481_v29  ;;  %v1607_v42 = vadd.f32 %v1606_v34, %v4483_v6  ;;  %v1618_v0 = vmul.f32 %v1617_v8, %v4688_v63  ;;  %v1621_v24 = vstv %s4651_s13  ;;  %s4744_s13 = sld [smem:[#allocation11 + $0x313]] }
 0x191   : > { %v1625_v40 = vstv %s4656_s21  ;;  %v1629_v14 = vstv %s4658_s29  ;;  %v1622_v6 = vmul.f32 %v1621_v24, %v4674_v22  ;;  %v1633_v2 = vstv %s4664_s7  ;;  %s4750_s21 = sld [smem:[#allocation11 + $0x390]]  ;;  %s4752_s29 = sld [smem:[#allocation11 + $0x391]] }
 0x192   : > { %v1595_v29 = vadd.f32 %v1594_v49, %v1591_v44  ;;  %v1611_v1 = vadd.f32 %v1610_v36, %v1607_v42  ;;  %v1626_v37 = vmul.f32 %v1625_v40, %v4676_v12  ;;  %v1630_v31 = vmul.f32 %v1629_v14, %v4679_v3  ;;  %s4760_s7 = sld [smem:[#allocation11 + $0x392]] }
 0x193   : > { %v1637_v50 = vstv %s4669_s15  ;;  %v1641_v46 = vstv %s4671_s9  ;;  %v1623_v13 = vadd.f32 %v1622_v6, %v4506_v41  ;;  %v1634_v20 = vmul.f32 %v1633_v2, %v4688_v63  ;;  %s4767_s15 = sld [smem:[#allocation11 + $0x393]]  ;;  %s4854_s9 = sld [smem:[#allocation11 + $0x14]] }
 0x194   : > { %v1599_v15 = vadd.f32 %v1598_v7, %v1595_v29  ;;  %v1615_v21 = vadd.f32 %v1614_v43, %v1611_v1  ;;  %v1638_v45 = vmul.f32 %v1637_v50, %v4674_v22  ;;  %v1642_v19 = vmul.f32 %v1641_v46, %v4676_v12 }
 0x195   : > { %v1645_v11 = vstv %s4684_s23  ;;  %v1649_v35 = vstv %s4686_s1  ;;  %v1627_v41 = vadd.f32 %v1626_v37, %v1623_v13  ;;  %v1653_v36 = vstv %s4697_s0  ;;  %s4865_s23 = sld [smem:[#allocation11 + $0x15]]  ;;  %s4867_s1 = sld [smem:[#allocation11 + $0x16]] }
 0x196   : > { %v4737_v26 = vadd.f32 %v1602_v59, %v1599_v15  ;;  %v4739_v10 = vadd.f32 %v1618_v0, %v1615_v21  ;;  %v1646_v49 = vmul.f32 %v1645_v11, %v4679_v3  ;;  %v1639_v34 = vadd.f32 %v1638_v45, %v4519_v51  ;;  %s4873_s0 = sld [smem:[#allocation11 + $0x17]] }
 0x197   : > { %v1650_v7 = vmul.f32 %v1649_v35, %v4688_v63  ;;  %v1657_v55 = vstv %s4699_s10  ;;  %v1631_v8 = vadd.f32 %v1630_v31, %v1627_v41  ;;  %v1654_v44 = vmul.f32 %v1653_v36, %v4674_v22  ;;  %s4875_s10 = sld [smem:[#allocation11 + $0x94]] }
 0x198   : > { %v1658_v59 = vmul.f32 %v1657_v55, %v4676_v12  ;;  %v1661_v42 = vstv %s4705_s19  ;;  %v1643_v43 = vadd.f32 %v1642_v19, %v1639_v34  ;;  %v1665_v0 = vstv %s4711_s11  ;;  %s4884_s19 = sld [smem:[#allocation11 + $0x95]]  ;;  %s4896_s11 = sld [smem:[#allocation11 + $0x97]] }
 0x199   : > { %v1662_v51 = vmul.f32 %v1661_v42, %v4679_v3  ;;  %v1669_v24 = vstv %s4713_s30  ;;  %v4762_v40 = vadd.f32 %v1634_v20, %v1631_v8  ;;  %v1655_v14 = vadd.f32 %v1654_v44, %v4530_v47  ;;  %s4898_s30 = sld [smem:[#allocation11 + $0x114]] }
 0x19a   : > { %v1666_v29 = vmul.f32 %v1665_v0, %v4688_v63  ;;  %v1670_v1 = vmul.f32 %v1669_v24, %v4674_v22  ;;  %v1647_v6 = vadd.f32 %v1646_v49, %v1643_v43  ;;  %v1673_v37 = vstv %s4717_s20  ;;  %v4798_v24 = vld [vmem:[%s3487_s28 + $0x8] sm:$0xff]  ;;  %s4904_s20 = sld [smem:[#allocation11 + $0x115]] }
 0x19b   : > { %v1677_v31 = vstv %s4723_s4  ;;  %v1681_v2 = vstv %s4725_s14  ;;  %v1659_v50 = vadd.f32 %v1658_v59, %v1655_v14  ;;  %v1674_v15 = vmul.f32 %v1673_v37, %v4676_v12  ;;  %v4791_v59 = vld [vmem:[%s3487_s28] sm:$0xff]  ;;  %s4906_s4 = sld [smem:[#allocation11 + $0x116]]  ;;  %s4912_s14 = sld [smem:[#allocation11 + $0x194]] }
 0x19c   : > { %v1671_v46 = vadd.f32 %v1670_v1, %v4538_v17  ;;  %v1678_v47 = vmul.f32 %v1677_v31, %v4679_v3  ;;  %v4775_v21 = vadd.f32 %v1650_v7, %v1647_v6  ;;  %v1682_v13 = vmul.f32 %v1681_v2, %v4688_v63  ;;  %v4807_v31 = vld [vmem:[%s3487_s28 + $0x10] sm:$0xff] }
 0x19d   : > { %v1685_v20 = vstv %s4733_s8  ;;  %v1689_v45 = vstv %s4735_s5  ;;  %v1663_v19 = vadd.f32 %v1662_v51, %v1659_v50  ;;  %v1693_v17 = vstv %s4742_s17  ;;  %s4917_s8 = sld [smem:[#allocation11 + $0x117]]  ;;  %s4919_s5 = sld [smem:[#allocation11 + $0x195]] }
 0x19e   : > { %v1675_v11 = vadd.f32 %v1674_v15, %v1671_v46  ;;  %v1686_v35 = vmul.f32 %v1685_v20, %v4674_v22  ;;  %v1690_v41 = vmul.f32 %v1689_v45, %v4676_v12  ;;  %v1697_v49 = vstv %s4744_s13  ;;  %v4820_v46 = vld [vmem:[%s3487_s28 + $0x18] sm:$0xff]  ;;  %s4933_s17 = sld [smem:[#allocation11 + $0x196]]  ;;  %s4935_s13 = sld [smem:[#allocation11 + $0x197]] }
 0x19f   : > { %v1701_v34 = vstv %s4750_s21  ;;  %v1705_v36 = vstv %s4752_s29  ;;  %v4786_v7 = vadd.f32 %v1666_v29, %v1663_v19  ;;  %v1694_v44 = vmul.f32 %v1693_v17, %v4679_v3  ;;  %v4835_v19 = vld [vmem:[%s3487_s28 + $0x20] sm:$0xff]  ;;  %s4945_s21 = sld [smem:[#allocation11 + $0x214]]  ;;  %s4947_s29 = sld [smem:[#allocation11 + $0x215]] }
 0x1a0   : > { %v1679_v55 = vadd.f32 %v1678_v47, %v1675_v11  ;;  %v1687_v8 = vadd.f32 %v1686_v35, %v4558_v25  ;;  %v1698_v42 = vmul.f32 %v1697_v49, %v4688_v63  ;;  %v1702_v43 = vmul.f32 %v1701_v34, %v4674_v22 }
 0x1a1   : > { %v1706_v51 = vmul.f32 %v1705_v36, %v4676_v12  ;;  %v1709_v0 = vstv %s4760_s7  ;;  %v1713_v25 = vstv %s4767_s15  ;;  %v1724_v22 = vmul.f32 %v4791_v59, %v3647_v32  ;;  %v5518_v36 = vld [vmem:[#allocation29_spill] sm:$0xff]  ;;  %s4953_s7 = sld [smem:[#allocation11 + $0x216]]  ;;  %s4959_s15 = sld [smem:[#allocation11 + $0x217]] }
 0x1a2   : > { %v4800_v14 = vadd.f32 %v1682_v13, %v1679_v55  ;;  %v1691_v29 = vadd.f32 %v1690_v41, %v1687_v8  ;;  %v1710_v1 = vmul.f32 %v1709_v0, %v4679_v3  ;;  %v1703_v6 = vadd.f32 %v1702_v43, %v4575_v5  ;;  %v5520_v43 = vld [vmem:[#allocation31_spill] sm:$0xff] }
 0x1a3   : > { %v1714_v37 = vmul.f32 %v1713_v25, %v4688_v63  ;;  %v1725_v12 = vmul.f32 %v4791_v59, %v3651_v33  ;;  %v1726_v50 = vmul.f32 %v4791_v59, %v3656_v38  ;;  %v1727_v3 = vmul.f32 %v4791_v59, %v3660_v39 }
 0x1a4   : > { %v1695_v2 = vadd.f32 %v1694_v44, %v1691_v29  ;;  %v1728_v5 = vmul.f32 %v4798_v24, %v3686_v52  ;;  %v1707_v63 = vadd.f32 %v1706_v51, %v1703_v6  ;;  %v1729_v32 = vmul.f32 %v4798_v24, %v3690_v53  ;;  %v5519_v44 = vld [vmem:[#allocation30_spill] sm:$0xff]  ;;  %v5521_v51 = vld [vmem:[#allocation32_spill] sm:$0xff] }
 0x1a5   : > { %v1730_v33 = vmul.f32 %v4798_v24, %v3694_v54  ;;  %v1731_v38 = vmul.f32 %v4798_v24, %v3700_v56  ;;  %v1736_v39 = vmul.f32 %v4807_v31, %v3704_v57  ;;  %v1737_v52 = vmul.f32 %v4807_v31, %v3708_v58  ;;  %v4846_v58 = vld [vmem:[%s3487_s28 + $0x28] sm:$0xff]  ;;  %v5523_v6 = vld [vmem:[#allocation34_spill] sm:$0xff] }
 0x1a6   : > { %v4828_v15 = vadd.f32 %v1698_v42, %v1695_v2  ;;  %v1732_v47 = vadd.f32 %v1728_v5, %v1724_v22  ;;  %v1711_v13 = vadd.f32 %v1710_v1, %v1707_v63  ;;  %v1733_v20 = vadd.f32 %v1729_v32, %v1725_v12  ;;  %v5522_v1 = vld [vmem:[#allocation33_spill] sm:$0xff]  ;;  %v4878_v22 = vld [vmem:[%s3487_s28 + $0x38] sm:$0xff]  ;;  %v5525_v5 = vld [vmem:[#allocation36_spill] sm:$0xff] }
 0x1a7   : > { %v1734_v45 = vadd.f32 %v1730_v33, %v1726_v50  ;;  %v1735_v53 = vadd.f32 %v1731_v38, %v1727_v3  ;;  %v1738_v54 = vmul.f32 %v4807_v31, %v3718_v62  ;;  %v1739_v56 = vmul.f32 %v4807_v31, %v3724_v4  ;;  %v5524_v50 = vld [vmem:[#allocation35_spill] sm:$0xff]  ;;  %v5526_v38 = vld [vmem:[#allocation37_spill] sm:$0xff] }
 0x1a8   : > { %v1740_v11 = vadd.f32 %v1736_v39, %v1732_v47  ;;  %v1744_v57 = vmul.f32 %v4820_v46, %v3751_v27  ;;  %v4843_v35 = vadd.f32 %v1714_v37, %v1711_v13  ;;  %v1741_v41 = vadd.f32 %v1737_v52, %v1733_v20  ;;  %v4857_v27 = vld [vmem:[%s3487_s28 + $0x30] sm:$0xff]  ;;  %s4890_s28 = sld [smem:[#allocation11 + $0x96]] }
 0x1a9   : > { %v1745_v17 = vmul.f32 %v4820_v46, %v3755_v28  ;;  %v1746_v49 = vmul.f32 %v4820_v46, %v3759_v30  ;;  %v1742_v34 = vadd.f32 %v1738_v54, %v1734_v45  ;;  %v1743_v62 = vadd.f32 %v1739_v56, %v1735_v53  ;;  %v5527_v39 = vld [vmem:[#allocation38_spill] sm:$0xff]  ;;  %v5528_v45 = vld [vmem:[#allocation39_spill] sm:$0xff]  ;;  %v5529_v54 = vld [vmem:[#allocation40_spill] sm:$0xff] }
 0x1aa   : > { %v1747_v4 = vmul.f32 %v4820_v46, %v5518_v36  ;;  %v1748_v55 = vadd.f32 %v1744_v57, %v1740_v11  ;;  %v1752_v42 = vmul.f32 %v4835_v19, %v5519_v44  ;;  %v1753_v28 = vmul.f32 %v4835_v19, %v5520_v43 }
 0x1ab   : > { %v1749_v8 = vadd.f32 %v1745_v17, %v1741_v41  ;;  %v1754_v30 = vmul.f32 %v4835_v19, %v5521_v51  ;;  %v1750_v0 = vadd.f32 %v1746_v49, %v1742_v34  ;;  %v1755_v25 = vmul.f32 %v4835_v19, %v5522_v1  ;;  %v5530_v41 = vld [vmem:[#allocation41_spill] sm:$0xff]  ;;  %v5531_v49 = vld [vmem:[#allocation42_spill] sm:$0xff] }
 0x1ac   : > { %v1751_v29 = vadd.f32 %v1747_v4, %v1743_v62  ;;  %v1760_v37 = vmul.f32 %v4846_v58, %v5523_v6  ;;  %v1756_v12 = vadd.f32 %v1752_v42, %v1748_v55  ;;  %v1761_v3 = vmul.f32 %v4846_v58, %v5524_v50  ;;  %v5532_v4 = vld [vmem:[#allocation43_spill] sm:$0xff] }
 0x1ad   : > { %v1757_v2 = vadd.f32 %v1753_v28, %v1749_v8  ;;  %v1762_v63 = vmul.f32 %v4846_v58, %v5525_v5  ;;  %v1758_v32 = vadd.f32 %v1754_v30, %v1750_v0  ;;  %v1763_v47 = vmul.f32 %v4846_v58, %v5526_v38  ;;  %v5533_v8 = vld [vmem:[#allocation44_spill] sm:$0xff]  ;;  %v5534_v28 = vld [vmem:[#allocation45_spill] sm:$0xff] }
 0x1ae   : > { %v1759_v33 = vadd.f32 %v1755_v25, %v1751_v29  ;;  %v1768_v52 = vmul.f32 %v4857_v27, %v5527_v39  ;;  %v1764_v13 = vadd.f32 %v1760_v37, %v1756_v12  ;;  %v1769_v53 = vmul.f32 %v4857_v27, %v5528_v45 }
 0x1af   : > { %v1765_v20 = vadd.f32 %v1761_v3, %v1757_v2  ;;  %v1770_v56 = vmul.f32 %v4857_v27, %v5529_v54  ;;  %v1766_v11 = vadd.f32 %v1762_v63, %v1758_v32  ;;  %v1771_v17 = vmul.f32 %v4857_v27, %v5530_v41 }
 0x1b0   : > { %v1767_v57 = vadd.f32 %v1763_v47, %v1759_v33  ;;  %v1776_v34 = vmul.f32 %v4878_v22, %v5531_v49  ;;  %v1772_v62 = vadd.f32 %v1768_v52, %v1764_v13  ;;  %v1777_v55 = vmul.f32 %v4878_v22, %v5532_v4 }
 0x1b1   : > { %v1773_v36 = vadd.f32 %v1769_v53, %v1765_v20  ;;  %v1778_v44 = vmul.f32 %v4878_v22, %v5533_v8  ;;  %v1774_v42 = vadd.f32 %v1770_v56, %v1766_v11  ;;  %v1779_v51 = vmul.f32 %v4878_v22, %v5534_v28 }
 0x1b2   : > { %v1775_v43 = vadd.f32 %v1771_v17, %v1767_v57  ;;  %v1785_v30 = vstv %s4854_s9  ;;  %v4921_v0 = vadd.f32 %v1776_v34, %v1772_v62  ;;  %v1789_v1 = vstv %s4865_s23  ;;  %s4961_s9 = sld [smem:[#allocation11 + $0x294]]  ;;  %s4965_s23 = sld [smem:[#allocation11 + $0x295]] }
 0x1b3   : > { %v4923_v29 = vadd.f32 %v1777_v55, %v1773_v36  ;;  %v1793_v25 = vstv %s4867_s1  ;;  %v4927_v6 = vadd.f32 %v1778_v44, %v1774_v42  ;;  %v1797_v12 = vstv %s4873_s0  ;;  %s4971_s1 = sld [smem:[#allocation11 + $0x296]]  ;;  %s4973_s0 = sld [smem:[#allocation11 + $0x297]] }
 0x1b4   : > { %v4929_v37 = vadd.f32 %v1779_v51, %v1775_v43  ;;  %v1801_v2 = vstv %s4875_s10  ;;  %v1786_v50 = vmul.f32 %v1785_v30, %v4921_v0  ;;  %v1805_v63 = vstv %s4884_s19  ;;  %s4981_s10 = sld [smem:[#allocation11 + $0x314]]  ;;  %s4983_s19 = sld [smem:[#allocation11 + $0x315]] }
 0x1b5   : > { %v1790_v3 = vmul.f32 %v1789_v1, %v4923_v29  ;;  %v1802_v5 = vmul.f32 %v1801_v2, %v4921_v0  ;;  %v1794_v32 = vmul.f32 %v1793_v25, %v4927_v6  ;;  %v1806_v38 = vmul.f32 %v1805_v63, %v4923_v29 }
 0x1b6   : > { %v1798_v33 = vmul.f32 %v1797_v12, %v4929_v37  ;;  %v1809_v47 = vstv %s4890_s28  ;;  %v1787_v39 = vadd.f32 %v1786_v50, %v4737_v26  ;;  %v1813_v20 = vstv %s4896_s11  ;;  %s4990_s28 = sld [smem:[#allocation11 + $0x316]]  ;;  %s4992_s11 = sld [smem:[#allocation11 + $0x317]] }
 0x1b7   : > { %v1803_v52 = vadd.f32 %v1802_v5, %v4739_v10  ;;  %v1810_v13 = vmul.f32 %v1809_v47, %v4927_v6  ;;  %v1814_v45 = vmul.f32 %v1813_v20, %v4929_v37  ;;  %v1817_v53 = vstv %s4898_s30  ;;  %s4998_s30 = sld [smem:[#allocation11 + $0x394]] }
 0x1b8   : > { %v1821_v54 = vstv %s4904_s20  ;;  %v1825_v56 = vstv %s4906_s4  ;;  %v1791_v26 = vadd.f32 %v1790_v3, %v1787_v39  ;;  %v1818_v10 = vmul.f32 %v1817_v53, %v4921_v0  ;;  %s5000_s20 = sld [smem:[#allocation11 + $0x395]]  ;;  %s5008_s4 = sld [smem:[#allocation11 + $0x396]] }
 0x1b9   : > { %v1807_v11 = vadd.f32 %v1806_v38, %v1803_v52  ;;  %v1822_v57 = vmul.f32 %v1821_v54, %v4923_v29  ;;  %v1826_v41 = vmul.f32 %v1825_v56, %v4927_v6  ;;  %v1829_v17 = vstv %s4917_s8  ;;  %s5118_s8 = sld [smem:[#allocation11 + $0x18]] }
 0x1ba   : > { %v1833_v49 = vstv %s4912_s14  ;;  %v1837_v34 = vstv %s4919_s5  ;;  %v1795_v62 = vadd.f32 %v1794_v32, %v1791_v26  ;;  %v1819_v4 = vadd.f32 %v1818_v10, %v4762_v40  ;;  %s5015_s14 = sld [smem:[#allocation11 + $0x397]]  ;;  %s5120_s5 = sld [smem:[#allocation11 + $0x19]] }
 0x1bb   : > { %v1811_v36 = vadd.f32 %v1810_v13, %v1807_v11  ;;  %v1830_v55 = vmul.f32 %v1829_v17, %v4929_v37  ;;  %v1834_v8 = vmul.f32 %v1833_v49, %v4921_v0  ;;  %v1838_v44 = vmul.f32 %v1837_v34, %v4923_v29 }
 0x1bc   : > { %v1841_v42 = vstv %s4933_s17  ;;  %v1845_v43 = vstv %s4935_s13  ;;  %v4985_v28 = vadd.f32 %v1798_v33, %v1795_v62  ;;  %v1823_v40 = vadd.f32 %v1822_v57, %v1819_v4  ;;  %s5126_s17 = sld [smem:[#allocation11 + $0x1a]]  ;;  %s5128_s13 = sld [smem:[#allocation11 + $0x98]] }
 0x1bd   : > { %v4987_v51 = vadd.f32 %v1814_v45, %v1811_v36  ;;  %v1842_v30 = vmul.f32 %v1841_v42, %v4927_v6  ;;  %v1835_v1 = vadd.f32 %v1834_v8, %v4775_v21  ;;  %v1846_v25 = vmul.f32 %v1845_v43, %v4929_v37 }
 0x1be   : > { %v1849_v12 = vstv %s4945_s21  ;;  %v1853_v2 = vstv %s4947_s29  ;;  %v1827_v50 = vadd.f32 %v1826_v41, %v1823_v40  ;;  %v1857_v63 = vstv %s4953_s7  ;;  %s5135_s21 = sld [smem:[#allocation11 + $0x1b]]  ;;  %s5137_s29 = sld [smem:[#allocation11 + $0x99]] }
 0x1bf   : > { %v1850_v3 = vmul.f32 %v1849_v12, %v4921_v0  ;;  %v1854_v5 = vmul.f32 %v1853_v2, %v4923_v29  ;;  %v1839_v32 = vadd.f32 %v1838_v44, %v1835_v1  ;;  %v1858_v21 = vmul.f32 %v1857_v63, %v4927_v6  ;;  %s5146_s7 = sld [smem:[#allocation11 + $0x9a]] }
 0x1c0   : > { %v1861_v33 = vstv %s4959_s15  ;;  %v1865_v38 = vstv %s4961_s9  ;;  %v5010_v47 = vadd.f32 %v1830_v55, %v1827_v50  ;;  %v1869_v45 = vstv %s4965_s23  ;;  %s5148_s15 = sld [smem:[#allocation11 + $0x9b]]  ;;  %s5155_s9 = sld [smem:[#allocation11 + $0x118]] }
 0x1c1   : > { %v1851_v39 = vadd.f32 %v1850_v3, %v4786_v7  ;;  %v1862_v52 = vmul.f32 %v1861_v33, %v4929_v37  ;;  %v1866_v13 = vmul.f32 %v1865_v38, %v4921_v0  ;;  %v1843_v20 = vadd.f32 %v1842_v30, %v1839_v32  ;;  %s5160_s23 = sld [smem:[#allocation11 + $0x119]] }
 0x1c2   : > { %v1873_v53 = vstv %s4971_s1  ;;  %v1877_v54 = vstv %s4973_s0  ;;  %v1870_v11 = vmul.f32 %v1869_v45, %v4923_v29  ;;  %v1881_v41 = vstv %s4981_s10  ;;  %s5162_s1 = sld [smem:[#allocation11 + $0x11a]]  ;;  %s5168_s0 = sld [smem:[#allocation11 + $0x198]] }
 0x1c3   : > { %v1855_v56 = vadd.f32 %v1854_v5, %v1851_v39  ;;  %v1867_v26 = vadd.f32 %v1866_v13, %v4800_v14  ;;  %v1874_v7 = vmul.f32 %v1873_v53, %v4927_v6  ;;  %v5023_v10 = vadd.f32 %v1846_v25, %v1843_v20  ;;  %s5173_s10 = sld [smem:[#allocation11 + $0x11b]] }
 0x1c4   : > { %v1878_v57 = vmul.f32 %v1877_v54, %v4929_v37  ;;  %v1885_v17 = vstv %s4983_s19  ;;  %v1882_v62 = vmul.f32 %v1881_v41, %v4921_v0  ;;  %v1889_v4 = vstv %s4990_s28  ;;  %s5175_s19 = sld [smem:[#allocation11 + $0x199]]  ;;  %s5188_s28 = sld [smem:[#allocation11 + $0x19a]] }
 0x1c5   : > { %v1859_v49 = vadd.f32 %v1858_v21, %v1855_v56  ;;  %v1871_v34 = vadd.f32 %v1870_v11, %v1867_v26  ;;  %v1886_v36 = vmul.f32 %v1885_v17, %v4923_v29  ;;  %v1893_v14 = vstv %s4992_s11  ;;  %s5190_s11 = sld [smem:[#allocation11 + $0x19b]] }
 0x1c6   : > { %v1897_v55 = vstv %s4998_s30  ;;  %v1901_v8 = vstv %s5000_s20  ;;  %v1883_v43 = vadd.f32 %v1882_v62, %v4828_v15  ;;  %v1890_v40 = vmul.f32 %v1889_v4, %v4927_v6  ;;  %s5201_s30 = sld [smem:[#allocation11 + $0x218]]  ;;  %s5203_s20 = sld [smem:[#allocation11 + $0x219]] }
 0x1c7   : > { %v5034_v44 = vadd.f32 %v1862_v52, %v1859_v49  ;;  %v1875_v42 = vadd.f32 %v1874_v7, %v1871_v34  ;;  %v1894_v30 = vmul.f32 %v1893_v14, %v4929_v37  ;;  %v1898_v1 = vmul.f32 %v1897_v55, %v4921_v0  ;;  %v5535_v52 = vld [vmem:[#allocation28_spill] sm:$0xff] }
 0x1c8   : > { %v1902_v25 = vmul.f32 %v1901_v8, %v4923_v29  ;;  %v1905_v12 = vstv %s5008_s4  ;;  %v1887_v50 = vadd.f32 %v1886_v36, %v1883_v43  ;;  %v1909_v5 = vstv %s5015_s14  ;;  %s5209_s4 = sld [smem:[#allocation11 + $0x21a]]  ;;  %s5215_s14 = sld [smem:[#allocation11 + $0x21b]] }
 0x1c9   : > { %v5042_v2 = vadd.f32 %v1878_v57, %v1875_v42  ;;  %v1906_v3 = vmul.f32 %v1905_v12, %v4927_v6  ;;  %v1899_v63 = vadd.f32 %v1898_v1, %v4843_v35  ;;  %v1910_v32 = vmul.f32 %v1909_v5, %v4929_v37 }
 0x1ca   : > { %v1915_v15 = vrot.slane %v4921_v0, %v3534_v9  ;;  %v1919_v21 = vrot.slane %v4923_v29, %v3534_v9  ;;  %v1891_v33 = vadd.f32 %v1890_v40, %v1887_v50  ;;  %v1923_v38 = vrot.slane %v4927_v6, %v3534_v9 }
 0x1cb   : > { %v1927_v39 = vrot.slane %v4929_v37, %v3534_v9  ;;  %v1935_v13 = vrot.slane %v4921_v0, %v5535_v52  ;;  %v1903_v20 = vadd.f32 %v1902_v25, %v1899_v63  ;;  %v1939_v53 = vrot.slane %v4923_v29, %v5535_v52 }
 0x1cc   : > { %v1928_v35 = vmul.f32 %v1915_v15, %v4791_v59  ;;  %v1929_v45 = vmul.f32 %v1919_v21, %v4791_v59  ;;  %v5062_v54 = vadd.f32 %v1894_v30, %v1891_v33  ;;  %v1930_v56 = vmul.f32 %v1923_v38, %v4791_v59 }
 0x1cd   : > { %v1931_v26 = vmul.f32 %v1927_v39, %v4791_v59  ;;  %v1943_v9 = vrot.slane %v4927_v6, %v5535_v52  ;;  %v1907_v11 = vadd.f32 %v1906_v3, %v1903_v20  ;;  %v1947_v7 = vrot.slane %v4929_v37, %v5535_v52 }
 0x1ce   : > { %v1948_v57 = vmul.f32 %v1935_v13, %v4798_v24  ;;  %v1949_v41 = vmul.f32 %v1939_v53, %v4798_v24  ;;  %v1959_v49 = vrot.slane %v4921_v0, %v3677_v48  ;;  %v1963_v34 = vrot.slane %v4923_v29, %v3677_v48 }
 0x1cf   : > { %v1950_v17 = vmul.f32 %v1943_v9, %v4798_v24  ;;  %v1967_v59 = vrot.slane %v4927_v6, %v3677_v48  ;;  %v5079_v62 = vadd.f32 %v1910_v32, %v1907_v11  ;;  %v1951_v36 = vmul.f32 %v1947_v7, %v4798_v24 }
 0x1d0   : > { %v1952_v4 = vadd.f32 %v1948_v57, %v1928_v35  ;;  %v1953_v14 = vadd.f32 %v1949_v41, %v1929_v45  ;;  %v1971_v8 = vrot.slane %v4929_v37, %v3677_v48  ;;  %v1972_v42 = vmul.f32 %v1959_v49, %v4807_v31 }
 0x1d1   : > { %v1954_v55 = vadd.f32 %v1950_v17, %v1930_v56  ;;  %v1973_v43 = vmul.f32 %v1963_v34, %v4807_v31  ;;  %v1955_v40 = vadd.f32 %v1951_v36, %v1931_v26  ;;  %v1974_v30 = vmul.f32 %v1967_v59, %v4807_v31 }
 0x1d2   : > { %v1983_v1 = vrot.slane %v4921_v0, %v3735_v16  ;;  %v1987_v25 = vrot.slane %v4923_v29, %v3735_v16  ;;  %v1975_v24 = vmul.f32 %v1971_v8, %v4807_v31  ;;  %v1976_v12 = vadd.f32 %v1972_v42, %v1952_v4 }
 0x1d3   : > { %v1977_v50 = vadd.f32 %v1973_v43, %v1953_v14  ;;  %v1991_v48 = vrot.slane %v4927_v6, %v3735_v16  ;;  %v1978_v3 = vadd.f32 %v1974_v30, %v1954_v55  ;;  %v1995_v5 = vrot.slane %v4929_v37, %v3735_v16 }
 0x1d4   : > { %v1996_v63 = vmul.f32 %v1983_v1, %v4820_v46  ;;  %v1997_v32 = vmul.f32 %v1987_v25, %v4820_v46  ;;  %v1979_v15 = vadd.f32 %v1975_v24, %v1955_v40  ;;  %v2007_v33 = vrot.slane %v4921_v0, %v3738_v18 }
 0x1d5   : > { %v1998_v21 = vmul.f32 %v1991_v48, %v4820_v46  ;;  %v2011_v31 = vrot.slane %v4923_v29, %v3738_v18  ;;  %v1999_v38 = vmul.f32 %v1995_v5, %v4820_v46  ;;  %v2015_v16 = vrot.slane %v4927_v6, %v3738_v18 }
 0x1d6   : > { %v2000_v39 = vadd.f32 %v1996_v63, %v1976_v12  ;;  %v2001_v52 = vadd.f32 %v1997_v32, %v1977_v50  ;;  %v2019_v20 = vrot.slane %v4929_v37, %v3738_v18  ;;  %v2020_v35 = vmul.f32 %v2007_v33, %v4835_v19 }
 0x1d7   : > { %v2002_v13 = vadd.f32 %v1998_v21, %v1978_v3  ;;  %v2021_v45 = vmul.f32 %v2011_v31, %v4835_v19  ;;  %v2003_v53 = vadd.f32 %v1999_v38, %v1979_v15  ;;  %v2022_v56 = vmul.f32 %v2015_v16, %v4835_v19 }
 0x1d8   : > { %v2031_v26 = vrot.slane %v4921_v0, %v3744_v23  ;;  %v2035_v46 = vrot.slane %v4923_v29, %v3744_v23  ;;  %v2023_v9 = vmul.f32 %v2019_v20, %v4835_v19  ;;  %v2024_v11 = vadd.f32 %v2020_v35, %v2000_v39 }
 0x1d9   : > { %v2025_v7 = vadd.f32 %v2021_v45, %v2001_v52  ;;  %v2039_v18 = vrot.slane %v4927_v6, %v3744_v23  ;;  %v2026_v57 = vadd.f32 %v2022_v56, %v2002_v13  ;;  %v2043_v41 = vrot.slane %v4929_v37, %v3744_v23 }
 0x1da   : > { %v2044_v17 = vmul.f32 %v2031_v26, %v4846_v58  ;;  %v2045_v49 = vmul.f32 %v2035_v46, %v4846_v58  ;;  %v2027_v19 = vadd.f32 %v2023_v9, %v2003_v53  ;;  %v2055_v59 = vrot.slane %v4921_v0, %v3835_v60 }
 0x1db   : > { %v2046_v34 = vmul.f32 %v2039_v18, %v4846_v58  ;;  %v2059_v36 = vrot.slane %v4923_v29, %v3835_v60  ;;  %v2047_v23 = vmul.f32 %v2043_v41, %v4846_v58  ;;  %v2063_v55 = vrot.slane %v4927_v6, %v3835_v60 }
 0x1dc   : > { %v2048_v4 = vadd.f32 %v2044_v17, %v2024_v11  ;;  %v2049_v14 = vadd.f32 %v2045_v49, %v2025_v7  ;;  %v2067_v42 = vrot.slane %v4929_v37, %v3835_v60  ;;  %v2068_v43 = vmul.f32 %v2055_v59, %v4857_v27 }
 0x1dd   : > { %v2050_v8 = vadd.f32 %v2046_v34, %v2026_v57  ;;  %v2069_v40 = vmul.f32 %v2059_v36, %v4857_v27  ;;  %v2051_v30 = vadd.f32 %v2047_v23, %v2027_v19  ;;  %v2070_v58 = vmul.f32 %v2063_v55, %v4857_v27 }
 0x1de   : > { %v2079_v1 = vrot.slane %v4921_v0, %v3838_v61  ;;  %v2083_v25 = vrot.slane %v4923_v29, %v3838_v61  ;;  %v2071_v60 = vmul.f32 %v2067_v42, %v4857_v27  ;;  %v2072_v24 = vadd.f32 %v2068_v43, %v2048_v4 }
 0x1df   : > { %v2073_v12 = vadd.f32 %v2069_v40, %v2049_v14  ;;  %v2087_v50 = vrot.slane %v4927_v6, %v3838_v61  ;;  %v2074_v0 = vadd.f32 %v2070_v58, %v2050_v8  ;;  %v2091_v29 = vrot.slane %v4929_v37, %v3838_v61 }
 0x1e0   : > { %v2092_v48 = vmul.f32 %v2079_v1, %v4878_v22  ;;  %v2093_v27 = vmul.f32 %v2083_v25, %v4878_v22  ;;  %v2075_v3 = vadd.f32 %v2071_v60, %v2051_v30  ;;  %v2101_v5 = vstv %s5118_s8  ;;  %s5217_s8 = sld [smem:[#allocation11 + $0x298]] }
 0x1e1   : > { %v2094_v6 = vmul.f32 %v2087_v50, %v4878_v22  ;;  %v2105_v63 = vstv %s5120_s5  ;;  %v2095_v32 = vmul.f32 %v2091_v29, %v4878_v22  ;;  %v2109_v15 = vstv %s5126_s17  ;;  %s5221_s5 = sld [smem:[#allocation11 + $0x299]]  ;;  %s5227_s17 = sld [smem:[#allocation11 + $0x29a]] }
 0x1e2   : > { %v5178_v61 = vadd.f32 %v2092_v48, %v2072_v24  ;;  %v5180_v37 = vadd.f32 %v2093_v27, %v2073_v12  ;;  %v2113_v33 = vstv %s5135_s21  ;;  %v2117_v31 = vstv %s5128_s13  ;;  %s5229_s13 = sld [smem:[#allocation11 + $0x29b]]  ;;  %s5237_s21 = sld [smem:[#allocation11 + $0x318]] }
 0x1e3   : > { %v5183_v21 = vadd.f32 %v2094_v6, %v2074_v0  ;;  %v2121_v38 = vstv %s5137_s29  ;;  %v5192_v39 = vadd.f32 %v2095_v32, %v2075_v3  ;;  %v2125_v35 = vstv %s5146_s7  ;;  %s5239_s29 = sld [smem:[#allocation11 + $0x319]]  ;;  %s5246_s7 = sld [smem:[#allocation11 + $0x31a]] }
 0x1e4   : > { %v2102_v22 = vmul.f32 %v2101_v5, %v5178_v61  ;;  %v2106_v52 = vmul.f32 %v2105_v63, %v5180_v37  ;;  %v2118_v16 = vmul.f32 %v2117_v31, %v5178_v61  ;;  %v2122_v20 = vmul.f32 %v2121_v38, %v5180_v37 }
 0x1e5   : > { %v2110_v13 = vmul.f32 %v2109_v15, %v5183_v21  ;;  %v2129_v45 = vstv %s5148_s15  ;;  %v2114_v56 = vmul.f32 %v2113_v33, %v5192_v39  ;;  %v2126_v46 = vmul.f32 %v2125_v35, %v5183_v21  ;;  %s5248_s15 = sld [smem:[#allocation11 + $0x398]] }
 0x1e6   : > { %v2103_v53 = vadd.f32 %v2102_v22, %v4985_v28  ;;  %v2119_v26 = vadd.f32 %v2118_v16, %v4987_v51  ;;  %v2130_v9 = vmul.f32 %v2129_v45, %v5192_v39  ;;  %v2133_v11 = vstv %s5155_s9  ;;  %s5254_s9 = sld [smem:[#allocation11 + $0x31b]] }
 0x1e7   : > { %v2137_v7 = vstv %s5160_s23  ;;  %v2141_v18 = vstv %s5162_s1  ;;  %v2134_v51 = vmul.f32 %v2133_v11, %v5178_v61  ;;  %v2145_v49 = vstv %s5173_s10  ;;  %s5256_s23 = sld [smem:[#allocation11 + $0x399]]  ;;  %s5264_s1 = sld [smem:[#allocation11 + $0x39a]] }
 0x1e8   : > { %v2107_v28 = vadd.f32 %v2106_v52, %v2103_v53  ;;  %v2123_v57 = vadd.f32 %v2122_v20, %v2119_v26  ;;  %v2138_v41 = vmul.f32 %v2137_v7, %v5180_v37  ;;  %v2142_v17 = vmul.f32 %v2141_v18, %v5183_v21  ;;  %s5274_s10 = sld [smem:[#allocation12]] }
 0x1e9   : > { %v2149_v19 = vstv %s5168_s0  ;;  %v2153_v34 = vstv %s5175_s19  ;;  %v2135_v23 = vadd.f32 %v2134_v51, %v5010_v47  ;;  %v2146_v4 = vmul.f32 %v2145_v49, %v5192_v39  ;;  %s5269_s0 = sld [smem:[#allocation11 + $0x39b]]  ;;  %s5276_s19 = sld [smem:[#allocation12 + $0x1]] }
 0x1ea   : > { %v2111_v59 = vadd.f32 %v2110_v13, %v2107_v28  ;;  %v2127_v36 = vadd.f32 %v2126_v46, %v2123_v57  ;;  %v2150_v14 = vmul.f32 %v2149_v19, %v5178_v61  ;;  %v2154_v55 = vmul.f32 %v2153_v34, %v5180_v37 }
 0x1eb   : > { %v2157_v8 = vstv %s5188_s28  ;;  %v2161_v42 = vstv %s5190_s11  ;;  %v2139_v47 = vadd.f32 %v2138_v41, %v2135_v23  ;;  %v2165_v25 = vstv %s5201_s30  ;;  %s5281_s28 = sld [smem:[#allocation12 + $0x2]]  ;;  %s5286_s11 = sld [smem:[#allocation12 + $0x3]] }
 0x1ec   : > { %v5241_v43 = vadd.f32 %v2114_v56, %v2111_v59  ;;  %v5243_v40 = vadd.f32 %v2130_v9, %v2127_v36  ;;  %v2158_v30 = vmul.f32 %v2157_v8, %v5183_v21  ;;  %v2151_v58 = vadd.f32 %v2150_v14, %v5023_v10  ;;  %s5288_s30 = sld [smem:[#allocation12 + $0x4]] }
 0x1ed   : > { %v2162_v1 = vmul.f32 %v2161_v42, %v5192_v39  ;;  %v2169_v60 = vstv %s5203_s20  ;;  %v2143_v24 = vadd.f32 %v2142_v17, %v2139_v47  ;;  %v2166_v12 = vmul.f32 %v2165_v25, %v5178_v61  ;;  %s5296_s20 = sld [smem:[#allocation12 + $0x5]] }
 0x1ee   : > { %v2170_v50 = vmul.f32 %v2169_v60, %v5180_v37  ;;  %v2173_v0 = vstv %s5209_s4  ;;  %v2155_v29 = vadd.f32 %v2154_v55, %v2151_v58  ;;  %v2177_v48 = vstv %s5215_s14  ;;  %s5300_s4 = sld [smem:[#allocation12 + $0x6]]  ;;  %s5302_s14 = sld [smem:[#allocation12 + $0x7]] }
 0x1ef   : > { %v2174_v10 = vmul.f32 %v2173_v0, %v5183_v21  ;;  %v2181_v27 = vstv %s5217_s8  ;;  %v2147_v3 = vadd.f32 %v2146_v4, %v2143_v24  ;;  %v2167_v6 = vadd.f32 %v2166_v12, %v5034_v44  ;;  %s2736_s8 = sshll.u32 %s3112_s25, 5 }
 0x1f0   : > { %v2178_v5 = vmul.f32 %v2177_v48, %v5192_v39  ;;  %v2182_v63 = vmul.f32 %v2181_v27, %v5178_v61  ;;  %v2159_v32 = vadd.f32 %v2158_v30, %v2155_v29  ;;  %v2185_v15 = vstv %s5221_s5  ;;  %s2287_s25 = sadd.s32 %s3108_s24, %s2736_s8  ;;  %s439_s5 = scalar_lea.vmem [#allocation14], %s3473_s16 }
 0x1f1   : > { %v2189_v33 = vstv %s5227_s17  ;;  %v2193_v31 = vstv %s5229_s13  ;;  %v2171_v38 = vadd.f32 %v2170_v50, %v2167_v6  ;;  %v2186_v22 = vmul.f32 %v2185_v15, %v5180_v37  ;;  %s2737_s17 = sshll.u32 %s2287_s25, 7  ;;  %s2290_s24 = sshll.u32 %s439_s5, 4  ;;  %s5330_s24 = int_to_ptr.vmem [resolvable:$true] %s2290_s24 }
 0x1f2   : > { %v2183_v44 = vadd.f32 %v2182_v63, %v5042_v2  ;;  %v2190_v52 = vmul.f32 %v2189_v33, %v5183_v21  ;;  %v2163_v16 = vadd.f32 %v2162_v1, %v2159_v32  ;;  %v2194_v13 = vmul.f32 %v2193_v31, %v5192_v39 }
 0x1f3   : > { %v2197_v20 = vstv %s5237_s21  ;;  %v2201_v35 = vstv %s5239_s29  ;;  %v2175_v45 = vadd.f32 %v2174_v10, %v2171_v38  ;;  %v2205_v26 = vstv %s5246_s7  ;;  %s5328_s21 = scalar_lea.hbm %s5390_s6, %s2737_s17  ;;  %s2276_s29 = scalar_lea.sflag [#allocation4], %s3461_s12 }
 0x1f4   : > { %v2187_v53 = vadd.f32 %v2186_v22, %v2183_v44  ;;  %v2198_v2 = vmul.f32 %v2197_v20, %v5178_v61  ;;  %v2202_v56 = vmul.f32 %v2201_v35, %v5180_v37  ;;  %v2209_v46 = vstv %s5254_s9  ;;  %s3010_s7 = scalar_lea.vmem %s5330_s24, 1024 }
 0x1f5   : > { %v2213_v9 = vstv %s5248_s15  ;;  %v2217_v11 = vstv %s5256_s23  ;;  %v2179_v7 = vadd.f32 %v2178_v5, %v2175_v45  ;;  %v2206_v57 = vmul.f32 %v2205_v26, %v5183_v21  ;;  %p3011_p8 = scmp.ne.s32.totalorder %s5330_s24, %s3010_s7  ;;  %s3135_s15 = smov [#allocation14]  }
 0x1f6   : > { %v2191_v18 = vadd.f32 %v2190_v52, %v2187_v53  ;;  %v2199_v28 = vadd.f32 %v2198_v2, %v5062_v54  ;;  %v2210_v51 = vmul.f32 %v2209_v46, %v5192_v39  ;;  %v2214_v41 = vmul.f32 %v2213_v9, %v5178_v61  ;;  %s3014_s9 = sshll.u32 %s3135_s15, 4  ;;  %s3015_s9 = int_to_ptr.vmem [resolvable:$false] %s3014_s9 }
 0x1f7   : > { %v2218_v17 = vmul.f32 %v2217_v11, %v5180_v37  ;;  %v2221_v49 = vstv %s5264_s1  ;;  %v2225_v59 = vstv %s5269_s0  ;;  %v2229_v4 = vstv %s5274_s10  ;;  %p3012_p2 = pnand %p3011_p8, %p5536_p12  ;;  %s3016_s23 = scalar_lea.vmem %s3015_s9, 2048 }
 0x1f8   : > { %v2195_v19 = vadd.f32 %v2194_v13, %v2191_v18  ;;  %v2203_v34 = vadd.f32 %v2202_v56, %v2199_v28  ;;  %v2222_v54 = vmul.f32 %v2221_v49, %v5183_v21  ;;  %v2215_v36 = vadd.f32 %v2214_v41, %v5079_v62  ;;  %p3017_p1 = scmp.lt.s32.totalorder %s5330_s24, %s3015_s9  ;;  %p3018_p10 = scmp.lt.s32.totalorder %s3016_s23, %s3010_s7 }
 0x1f9   : > { %v2226_v23 = vmul.f32 %v2225_v59, %v5192_v39  ;;  %v2234_v14 = vstv %s5276_s19  ;;  %v2230_v61 = vadd.f32 %v2229_v4, %v5241_v43  ;;  %v2240_v8 = vstv %s5281_s28  ;;  %p3013_p5 = pneg %p3012_p2 }
 0x1fa   : > { %v2207_v55 = vadd.f32 %v2206_v57, %v2203_v34  ;;  %v2235_v37 = vadd.f32 %v2234_v14, %v5243_v40  ;;  %v2219_v42 = vadd.f32 %v2218_v17, %v2215_v36  ;;  %v2241_v47 = vadd.f32 %v2240_v8, %v2147_v3  ;;  %p3019_p0 = por %p3018_p10, %p3017_p1 }
 0x1fb   : > { %v2246_v30 = vstv %s5286_s11  ;;  %v2252_v21 = vstv %s5288_s30  ;;  %v2231_v58 = vmax.f32 %v2230_v61, 0.0  ;;  %v2258_v12 = vstv %s5296_s20 }
 0x1fc   : > { %v2211_v62 = vadd.f32 %v2210_v51, %v2207_v55  ;;  %v2236_v39 = vmax.f32 %v2235_v37, 0.0  ;;  %v2247_v1 = vadd.f32 %v2246_v30, %v2163_v16  ;;  %v2223_v25 = vadd.f32 %v2222_v54, %v2219_v42  ;;  %p3020_p4 = pnand %p3019_p0, %p3013_p5 }
 0x1fd   : > { %v2242_v60 = vmax.f32 %v2241_v47, 0.0  ;;  %v2253_v24 = vadd.f32 %v2252_v21, %v2179_v7  ;;  %2232 = vst [vmem:[%s439_s5] sm:$0xff] %v2231_v58  ;;  %v2259_v40 = vadd.f32 %v2258_v12, %v2195_v19  ;;  %v2264_v50 = vstv %s5300_s4 }
 0x1fe   : > { %2722 = vst [vmem:[%s439_s5 + $0x8] sm:$0xff] %v2236_v39  ;;  %v2248_v43 = vmax.f32 %v2247_v1, 0.0  ;;  %v2270_v0 = vstv %s5302_s14  ;;  %v2227_v29 = vadd.f32 %v2226_v23, %v2223_v25  ;;  %v2265_v48 = vadd.f32 %v2264_v50, %v2211_v62 }
 0x1ff   : > { %2724 = vst [vmem:[%s439_s5 + $0x10] sm:$0xff] %v2242_v60  ;;  %v2254_v10 = vmax.f32 %v2253_v24, 0.0  ;;  %v2260_v27 = vmax.f32 %v2259_v40, 0.0 }
 0x200   : > { %2726 = vst [vmem:[%s439_s5 + $0x18] sm:$0xff] %v2248_v43  ;;  %v2266_v3 = vmax.f32 %v2265_v48, 0.0  ;;  %v2271_v6 = vadd.f32 %v2270_v0, %v2227_v29 }
 0x201   : > { %2728 = vst [vmem:[%s439_s5 + $0x20] sm:$0xff] %v2254_v10  ;;  %2730 = vst [vmem:[%s439_s5 + $0x28] sm:$0xff] %v2260_v27 }
 0x202   : > { %2732 = vst [vmem:[%s439_s5 + $0x30] sm:$0xff] %v2266_v3  ;;  %v2272_v5 = vmax.f32 %v2271_v6, 0.0 }
 0x204   : > { %2734 = vst [vmem:[%s439_s5 + $0x38] sm:$0xff] %v2272_v5 }
 0x205   : > { %3023 = shalt.err (!%p3020_p4)
}
 0x206   : > { %s3024_s1 = scalar_lea.hbm %s5328_s21, 1024  ;;  %s3028_s19 = scalar_lea.hbm %s5390_s6, 8192 }
 0x207   : > { %p3025_p9 = scmp.ne.s32.totalorder %s5328_s21, %s3024_s1  ;;  %p3029_p6 = scmp.lt.u32.totalorder %s5328_s21, %s5390_s6 }
 0x208   : > { %p3030_p11 = scmp.lt.u32.totalorder %s3028_s19, %s3024_s1  ;;  %p3032_p8 = scmp.lt.u32.totalorder %s3024_s1, %s5328_s21 }
 0x209   : > { %p3026_p13 = pnand %p3025_p9, %p5536_p12 }
 0x20a   : > { %p3031_p7 = por %p3030_p11, %p3029_p6 }
 0x20b   : > { %p3027_p3 = pneg %p3026_p13 }
 0x20c   : > { %p3033_p2 = por %p3032_p8, %p3031_p7 }
 0x20e   : > { %p3034_p5 = pnand %p3033_p2, %p3027_p3 }
 0x210   : > { %3037 = shalt.err (!%p3034_p5)
}
 0x211   : > { %s3136_s30 = smov 128   ;;  %s3137_s20 = smov 512  }
 0x212   : > { %s3138_s4 = smov 8  }
 0x213   : > { %2756 = dma.vmem_to_hbm [thread:$0]  (%p5536_p12), %s5330_s24, 1024, %s5328_s21, %s2276_s29, %s3136_s30, %s3137_s20, %s3138_s4  }
 0x214 PF: > { %s5537_s14 = sld [smem:[#allocation23_spill]]  ;;  %s5538_s8 = sld [smem:[#allocation21_spill]] }
 0x215   : > { %s5539_s25 = sld [smem:[#allocation27_spill]] }
 0x21a   : > { %p2787_p1 = scmp.ge.s32.totalorder %s5537_s14, 2  ;;  %s2305_s5 = sand.u32 1, %s5538_s8  }
 0x21b   : > { %p5540_p10 = scmp.ne.s32.totalorder %s5539_s25, 0  ;;  %s2306_s17 = scalar_lea.sflag [#allocation4], %s2305_s5 }
 0x21d   : > { %p2779_p0 = pnand %p2787_p1, %p5540_p10 }
 0x21f   : > { %3091 = dma.done.wait (!%p2779_p0), %s2306_s17, 1024  }
 0x220   : > { %3093 = vsyncadd (!%p2779_p0), %s2306_s17, 4294966272  ;;  %s30_s28 = sadd.s32 1, %s5537_s14   ;;  %s5541_s16 = sld [smem:[#allocation22_spill]] }
 0x221   : > { %p27_p4 = scmp.ge.s32.totalorder %s30_s28, 10   ;;  %s5542_s23 = sld [smem:[#allocation26_spill]] }
 0x222   : > { %s5543_s18 = sld [smem:[#allocation24_spill]]  ;;  %s5544_s12 = sld [smem:[#allocation25_spill]] }
 0x223   : > { %s5545_s21 = smov %s3100_s22  ;;  %s5547_s24 = smov %s3116_s26 }
 0x224   : > { %s5548_s25 = smov %s3120_s27  ;;  %29 = sbr.rel (!%p27_p4) target bundleno = 18 (0x12), region = 142 }
 0x226   : > { %s5546_s22 = smov %s5541_s16 }
 0x228   : > { %s5549_s26 = smov %s5543_s18  ;;  %s5550_s27 = smov %s5544_s12 }
 0x22b   :  { %2311 = vsyncpa [#allocation3], 1 }
 0x22c   :  { %2313 = vsyncpa [#allocation3 + $0x1], 1 }
 0x22d   :  { %2314 = vsyncpa [#allocation7], 1 }
 0x22e   :  { %2316 = vsyncpa [#allocation7 + $0x1], 1 }
 0x22f   :  { %2317 = vsyncpa [#allocation10], 1 }
 0x230   :  { %2319 = vsyncpa [#allocation10 + $0x1], 1 }
 0x231   :  { %2320 = vsyncpa [#allocation4], 1 }
 0x232   :  { %2322 = vsyncpa [#allocation4 + $0x1], 1 }
 0x233   :  { %2323 = vsyncpa [#allocation5], 1 }
 0x234   :  { %2325 = vsyncpa [#allocation5 + $0x1], 1 }
 0x235   :  { %2326 = vsyncpa [#allocation13], 1 }

</bundles_post_ra>
